<compile_context>
chip_gen: v5e
topology: v5e:2x2
jax: 0.10.0
libtpu: 0.0.40
codegen_flags: <defaults>
</compile_context>

<pallas_src>
import functools

import jax
import jax.numpy as jnp
from jax.experimental import pallas as pl
from jax.experimental.pallas import tpu as pltpu

K = 7          # kernel_size
P = 3          # padding (kernel_size == 7)


def _spatial_attention_kernel(x_ref, w_ref, o_ref, acc_s, acc_m, flat_ref,
                              canvas_ref, *, C, H, W, sub, n_sub):
    # x_ref:      (1, c_tile, H*W) VMEM block of the flattened input
    # w_ref:      (2*K*K,) f32 SMEM, flattened conv weight, order (in_ch, kh, kw)
    # o_ref:      (1, 1, H, W) VMEM output block
    # acc_s/m:    (sub, H*W) f32 VMEM accumulators (persist across channel tiles)
    # flat_ref:   (2, H*W) f32 VMEM, pooled avg/max maps in flat layout
    # canvas_ref: (2*(H+2P), LW) f32 VMEM, zero-padded avg/max planes for the conv
    Hp = H + 2 * P
    LW = canvas_ref.shape[1]
    k = pl.program_id(1)

    # ---- init accumulators at the first channel tile ----
    @pl.when(k == 0)
    def _():
        acc_s[...] = jnp.zeros(acc_s.shape, acc_s.dtype)
        acc_m[...] = jnp.full(acc_m.shape, -jnp.inf, acc_m.dtype)

    # ---- lane-dense channel reduction for this tile (sub channels per op) ----
    s = acc_s[...]
    m = acc_m[...]
    if n_sub <= 8:
        for j in range(n_sub):                              # static unroll
            xc = x_ref[0, j * sub:(j + 1) * sub, :].astype(jnp.float32)
            s = s + xc
            m = jnp.maximum(m, xc)
    else:
        def red_body(j, carry):
            cs_, cm_ = carry
            start = pl.multiple_of(j * sub, sub)
            xc = x_ref[0, pl.ds(start, sub), :].astype(jnp.float32)
            return cs_ + xc, jnp.maximum(cm_, xc)
        s, m = jax.lax.fori_loop(0, n_sub, red_body, (s, m), unroll=2)
    acc_s[...] = s
    acc_m[...] = m

    # ---- finalize: 7x7 zero-padded conv + sigmoid on the pooled maps ----
    @pl.when(k == pl.num_programs(1) - 1)
    def _():
        avg = jnp.sum(acc_s[...], axis=0) * (1.0 / C)       # (H*W,)  torch.mean
        mx = jnp.max(acc_m[...], axis=0)                    # (H*W,)  torch.max
        flat_ref[0, :] = avg
        flat_ref[1, :] = mx

        # Zero-padded canvas: rows [P, P+H) of each plane hold the pooled map,
        # lanes [0, W) are valid; everything else is zero, so the conv needs no
        # border / wrap masks at all.
        canvas_ref[...] = jnp.zeros(canvas_ref.shape, canvas_ref.dtype)
        # TODO(synk): switch this static unroll to a fori_loop for very large H.
        for h in range(H):
            canvas_ref[P + h, 0:W] = flat_ref[0, h * W:(h + 1) * W]
            canvas_ref[Hp + P + h, 0:W] = flat_ref[1, h * W:(h + 1) * W]

        # Read the 98 conv weights into scalars once, outside the tap loops.
        w_avg = [[w_ref[dy * K + dx] for dx in range(K)] for dy in range(K)]
        w_max = [[w_ref[K * K + dy * K + dx] for dx in range(K)]
                 for dy in range(K)]

        cav = canvas_ref[...]                               # (2*Hp, LW)
        acc = jnp.zeros((H, LW), jnp.float32)
        for dx in range(K):
            # One lane roll per kernel column covers both pooled maps (stacked
            # along sublanes); wrapped lanes land in the zero padding.
            if dx == P:
                cs = cav
            else:
                cs = pltpu.roll(cav, shift=(P - dx) % LW, axis=1)
            for dy in range(K):
                acc = (acc
                       + w_avg[dy][dx] * cs[dy:dy + H, :]
                       + w_max[dy][dx] * cs[Hp + dy:Hp + dy + H, :])

        # sigmoid: exp on the EUP + exact reciprocal (keeps 1e-5 accuracy)
        e = jnp.exp(-acc)
        sig = pl.reciprocal(1.0 + e, approx=False)
        o_ref[0, 0] = sig[:, :W].astype(o_ref.dtype)


def spatial_attention(x, conv_weight):
    """x: (N, C, H, W); conv_weight: (1, 2, K, K) -> returns (N, 1, H, W)."""
    N, C, H, W = x.shape
    HW = H * W
    itemsize = jnp.dtype(x.dtype).itemsize

    # Free reshape (no transpose / no HBM copy): spatial flattened along lanes.
    xf = x.reshape(N, C, HW)
    w_flat = conv_weight.reshape(-1).astype(jnp.float32)    # (2*K*K,)

    # Channel tile: largest divisor of C that keeps the double-buffered input
    # block under ~4 MiB (must be a multiple of 8 unless it is all of C).
    cap = max(1, (4 << 20) // (2 * HW * itemsize))
    divs = [d for d in range(1, C + 1) if C % d == 0 and (d == C or d % 8 == 0)]
    fitting = [d for d in divs if d <= cap]
    c_tile = max(fitting) if fitting else min(divs)
    n_ct = C // c_tile
    sub = next(s_ for s_ in (8, 4, 2, 1) if c_tile % s_ == 0)
    n_sub = c_tile // sub

    Hp = H + 2 * P
    LW = -(-(W + P) // 128) * 128            # >= W + 3, multiple of 128 lanes

    kernel = functools.partial(
        _spatial_attention_kernel, C=C, H=H, W=W, sub=sub, n_sub=n_sub)

    # VMEM policy: blocks are small by construction so the chip-default scoped
    # limit is normally fine.  For extreme shapes, only RAISE the limit (never
    # lower it below the 32 MiB v6e/v7x default) and clamp to physical - 8 MiB.
    scratch_bytes = (2 * 8 * HW + 8 * HW + (2 * Hp + 8) * LW) * 4
    need = 2 * c_tile * HW * itemsize + scratch_bytes + (4 << 20)
    cp_kwargs = {}
    if need > (16 << 20):
        try:
            phys = pltpu.get_tpu_info().vmem_capacity_bytes
        except Exception:
            phys = 64 << 20
        cp_kwargs["vmem_limit_bytes"] = int(
            min(max(int(need), 32 << 20), phys - (8 << 20)))

    grid_spec = pltpu.PrefetchScalarGridSpec(
        num_scalar_prefetch=0,
        grid=(N, n_ct),
        in_specs=[
            pl.BlockSpec((1, c_tile, HW), lambda n, k: (n, k, 0)),
            pl.BlockSpec(memory_space=pltpu.MemorySpace.SMEM),
        ],
        out_specs=pl.BlockSpec((1, 1, H, W), lambda n, k: (n, 0, 0, 0)),
        scratch_shapes=[
            pltpu.VMEM((sub, HW), jnp.float32),      # channel-sum accumulator
            pltpu.VMEM((sub, HW), jnp.float32),      # channel-max accumulator
            pltpu.VMEM((2, HW), jnp.float32),        # pooled maps, flat layout
            pltpu.VMEM((2 * Hp, LW), jnp.float32),   # zero-padded conv canvas
        ],
    )

    out = pl.pallas_call(
        kernel,
        out_shape=jax.ShapeDtypeStruct((N, 1, H, W), x.dtype),
        grid_spec=grid_spec,
        compiler_params=pltpu.CompilerParams(
            dimension_semantics=("parallel", "arbitrary"), **cp_kwargs),
    )(xf, w_flat)
    return out


if __name__ == "__main__":
    key = jax.random.PRNGKey(0)
    kx, kw = jax.random.split(key)

    N, C, H, W = 2, 4, 16, 16
    x = jax.random.normal(kx, (N, C, H, W), dtype=jnp.float32)

    # Deterministic init of nn.Conv2d(2, 1, 7, padding=3, bias=False) weight.
    fan_in = 2 * K * K
    bound = (1.0 / fan_in) ** 0.5
    conv_weight = jax.random.uniform(
        kw, (1, 2, K, K), minval=-bound, maxval=bound, dtype=jnp.float32)

    out = jax.block_until_ready(spatial_attention(x, conv_weight))

    # Pure-JAX reference of the PyTorch forward.
    avg = jnp.mean(x, axis=1, keepdims=True)
    mx = jnp.max(x, axis=1, keepdims=True)
    cat = jnp.concatenate([avg, mx], axis=1)
    conv = jax.lax.conv_general_dilated(
        cat, conv_weight, window_strides=(1, 1),
        padding=((P, P), (P, P)),
        dimension_numbers=("NCHW", "OIHW", "NCHW"))
    ref = jax.nn.sigmoid(conv)

    assert out.shape == (N, 1, H, W)
    assert jnp.allclose(out, ref, atol=1e-5, rtol=1e-5), "mismatch vs reference"
    print("KERNEL_OK")
</pallas_src>

<mosaic_0001>
module attributes {stable_mosaic.version = 11 : i64} {
  func.func @_spatial_attention_kernel(%arg0: i32, %arg1: i32, %arg2: memref<1x4x256xf32, #tpu.memory_space<vmem>>, %arg3: memref<98xf32, #tpu.memory_space<smem>>, %arg4: memref<1x1x16x16xf32, #tpu.memory_space<vmem>>, %arg5: memref<4x256xf32, #tpu.memory_space<vmem>>, %arg6: memref<4x256xf32, #tpu.memory_space<vmem>>, %arg7: memref<2x256xf32, #tpu.memory_space<vmem>>, %arg8: memref<44x128xf32, #tpu.memory_space<vmem>>) attributes {dimension_semantics = [#tpu.dimension_semantics<parallel>, #tpu.dimension_semantics<arbitrary>], iteration_bounds = array<i64: 2, 1>, scalar_prefetch = 0 : i64, scratch_operands = 4 : i64, tpu.core_type = #tpu.core_type<tc>, window_params = [{transform_indices = @transform_0, window_bounds = array<i64: 1, 4, 256>}, {transform_indices = @transform_1, window_bounds = array<i64: 98>}, {transform_indices = @transform_2, window_bounds = array<i64: 1, 1, 16, 16>}]} {
    %c0_i32 = arith.constant 0 : i32
    %0 = arith.cmpi eq, %arg1, %c0_i32 : i32
    %1 = arith.extui %0 : i1 to i32
    %c0_i32_0 = arith.constant 0 : i32
    %2 = arith.cmpi ne, %1, %c0_i32_0 : i32
    scf.if %2 {
      %cst = arith.constant 0.000000e+00 : f32
      %14 = vector.broadcast %cst : f32 to vector<4x256xf32>
      %c0_13 = arith.constant 0 : index
      %c0_14 = arith.constant 0 : index
      %15 = vector.load %arg5[%c0_13, %c0_14] : memref<4x256xf32, #tpu.memory_space<vmem>>, vector<4x256xf32>
      tpu.vector_store %arg5[%c0_13, %c0_14], %14 {strides = array<i32>} : memref<4x256xf32, #tpu.memory_space<vmem>>, vector<4x256xf32>,
      %cst_15 = arith.constant 0xFF800000 : f32
      %16 = vector.broadcast %cst_15 : f32 to vector<4x256xf32>
      %c0_16 = arith.constant 0 : index
      %c0_17 = arith.constant 0 : index
      %17 = vector.load %arg6[%c0_16, %c0_17] : memref<4x256xf32, #tpu.memory_space<vmem>>, vector<4x256xf32>
      tpu.vector_store %arg6[%c0_16, %c0_17], %16 {strides = array<i32>} : memref<4x256xf32, #tpu.memory_space<vmem>>, vector<4x256xf32>,
    } else {
    }
    %c0 = arith.constant 0 : index
    %c0_1 = arith.constant 0 : index
    %3 = vector.load %arg5[%c0, %c0_1] : memref<4x256xf32, #tpu.memory_space<vmem>>, vector<4x256xf32>
    %c0_2 = arith.constant 0 : index
    %c0_3 = arith.constant 0 : index
    %4 = vector.load %arg6[%c0_2, %c0_3] : memref<4x256xf32, #tpu.memory_space<vmem>>, vector<4x256xf32>
    %c0_4 = arith.constant 0 : index
    %c0_5 = arith.constant 0 : index
    %c0_6 = arith.constant 0 : index
    %5 = vector.load %arg2[%c0_4, %c0_5, %c0_6] : memref<1x4x256xf32, #tpu.memory_space<vmem>>, vector<1x4x256xf32>
    %6 = vector.shape_cast %5 : vector<1x4x256xf32> to vector<4x256xf32>
    %7 = arith.addf %3, %6 : vector<4x256xf32>
    %8 = arith.maximumf %4, %6 : vector<4x256xf32>
    %c0_7 = arith.constant 0 : index
    %c0_8 = arith.constant 0 : index
    %9 = vector.load %arg5[%c0_7, %c0_8] : memref<4x256xf32, #tpu.memory_space<vmem>>, vector<4x256xf32>
    tpu.vector_store %arg5[%c0_7, %c0_8], %7 {strides = array<i32>} : memref<4x256xf32, #tpu.memory_space<vmem>>, vector<4x256xf32>,
    %c0_9 = arith.constant 0 : index
    %c0_10 = arith.constant 0 : index
    %10 = vector.load %arg6[%c0_9, %c0_10] : memref<4x256xf32, #tpu.memory_space<vmem>>, vector<4x256xf32>
    tpu.vector_store %arg6[%c0_9, %c0_10], %8 {strides = array<i32>} : memref<4x256xf32, #tpu.memory_space<vmem>>, vector<4x256xf32>,
    %c0_i32_11 = arith.constant 0 : i32
    %11 = arith.cmpi eq, %arg1, %c0_i32_11 : i32
    %12 = arith.extui %11 : i1 to i32
    %c0_i32_12 = arith.constant 0 : i32
    %13 = arith.cmpi ne, %12, %c0_i32_12 : i32
    scf.if %13 {
      %c0_13 = arith.constant 0 : index
      %c0_14 = arith.constant 0 : index
      %14 = vector.load %arg5[%c0_13, %c0_14] : memref<4x256xf32, #tpu.memory_space<vmem>>, vector<4x256xf32>
      %cst = arith.constant dense<0.000000e+00> : vector<256xf32>
      %15 = vector.multi_reduction <add>, %14, %cst [0] : vector<4x256xf32> to vector<256xf32>
      %cst_15 = arith.constant 2.500000e-01 : f32
      %16 = vector.broadcast %cst_15 : f32 to vector<256xf32>
      %17 = arith.mulf %15, %16 : vector<256xf32>
      %c0_16 = arith.constant 0 : index
      %c0_17 = arith.constant 0 : index
      %18 = vector.load %arg6[%c0_16, %c0_17] : memref<4x256xf32, #tpu.memory_space<vmem>>, vector<4x256xf32>
      %cst_18 = arith.constant dense<0xFF800000> : vector<256xf32>
      %19 = vector.multi_reduction <maximumf>, %18, %cst_18 [0] : vector<4x256xf32> to vector<256xf32>
      %c0_19 = arith.constant 0 : index
      %c0_20 = arith.constant 0 : index
      %20 = vector.load %arg7[%c0_19, %c0_20] : memref<2x256xf32, #tpu.memory_space<vmem>>, vector<1x256xf32>
      %21 = vector.shape_cast %20 : vector<1x256xf32> to vector<256xf32>
      %22 = vector.shape_cast %17 : vector<256xf32> to vector<1x256xf32>
      tpu.vector_store %arg7[%c0_19, %c0_20], %22 {strides = array<i32>} : memref<2x256xf32, #tpu.memory_space<vmem>>, vector<1x256xf32>,
      %c1 = arith.constant 1 : index
      %c0_21 = arith.constant 0 : index
      %23 = vector.load %arg7[%c1, %c0_21] : memref<2x256xf32, #tpu.memory_space<vmem>>, vector<1x256xf32>
      %24 = vector.shape_cast %23 : vector<1x256xf32> to vector<256xf32>
      %25 = vector.shape_cast %19 : vector<256xf32> to vector<1x256xf32>
      tpu.vector_store %arg7[%c1, %c0_21], %25 {strides = array<i32>} : memref<2x256xf32, #tpu.memory_space<vmem>>, vector<1x256xf32>,
      %cst_22 = arith.constant 0.000000e+00 : f32
      %26 = vector.broadcast %cst_22 : f32 to vector<44x128xf32>
      %c0_23 = arith.constant 0 : index
      %c0_24 = arith.constant 0 : index
      %27 = vector.load %arg8[%c0_23, %c0_24] : memref<44x128xf32, #tpu.memory_space<vmem>>, vector<44x128xf32>
      tpu.vector_store %arg8[%c0_23, %c0_24], %26 {strides = array<i32>} : memref<44x128xf32, #tpu.memory_space<vmem>>, vector<44x128xf32>,
      %c0_25 = arith.constant 0 : index
      %c0_26 = arith.constant 0 : index
      %28 = vector.load %arg7[%c0_25, %c0_26] : memref<2x256xf32, #tpu.memory_space<vmem>>, vector<1x16xf32>
      %29 = vector.shape_cast %28 : vector<1x16xf32> to vector<16xf32>
      %c3 = arith.constant 3 : index
      %c0_27 = arith.constant 0 : index
      %30 = vector.load %arg8[%c3, %c0_27] : memref<44x128xf32, #tpu.memory_space<vmem>>, vector<1x16xf32>
      %31 = vector.shape_cast %30 : vector<1x16xf32> to vector<16xf32>
      %32 = vector.shape_cast %29 : vector<16xf32> to vector<1x16xf32>
      tpu.vector_store %arg8[%c3, %c0_27], %32 {strides = array<i32>} : memref<44x128xf32, #tpu.memory_space<vmem>>, vector<1x16xf32>,
      %c1_28 = arith.constant 1 : index
      %c0_29 = arith.constant 0 : index
      %33 = vector.load %arg7[%c1_28, %c0_29] : memref<2x256xf32, #tpu.memory_space<vmem>>, vector<1x16xf32>
      %34 = vector.shape_cast %33 : vector<1x16xf32> to vector<16xf32>
      %c25 = arith.constant 25 : index
      %c0_30 = arith.constant 0 : index
      %35 = vector.load %arg8[%c25, %c0_30] : memref<44x128xf32, #tpu.memory_space<vmem>>, vector<1x16xf32>
      %36 = vector.shape_cast %35 : vector<1x16xf32> to vector<16xf32>
      %37 = vector.shape_cast %34 : vector<16xf32> to vector<1x16xf32>
      tpu.vector_store %arg8[%c25, %c0_30], %37 {strides = array<i32>} : memref<44x128xf32, #tpu.memory_space<vmem>>, vector<1x16xf32>,
      %c0_31 = arith.constant 0 : index
      %c16 = arith.constant 16 : index
      %38 = vector.load %arg7[%c0_31, %c16] : memref<2x256xf32, #tpu.memory_space<vmem>>, vector<1x16xf32>
      %39 = vector.shape_cast %38 : vector<1x16xf32> to vector<16xf32>
      %c4 = arith.constant 4 : index
      %c0_32 = arith.constant 0 : index
      %40 = vector.load %arg8[%c4, %c0_32] : memref<44x128xf32, #tpu.memory_space<vmem>>, vector<1x16xf32>
      %41 = vector.shape_cast %40 : vector<1x16xf32> to vector<16xf32>
      %42 = vector.shape_cast %39 : vector<16xf32> to vector<1x16xf32>
      tpu.vector_store %arg8[%c4, %c0_32], %42 {strides = array<i32>} : memref<44x128xf32, #tpu.memory_space<vmem>>, vector<1x16xf32>,
      %c1_33 = arith.constant 1 : index
      %c16_34 = arith.constant 16 : index
      %43 = vector.load %arg7[%c1_33, %c16_34] : memref<2x256xf32, #tpu.memory_space<vmem>>, vector<1x16xf32>
      %44 = vector.shape_cast %43 : vector<1x16xf32> to vector<16xf32>
      %c26 = arith.constant 26 : index
      %c0_35 = arith.constant 0 : index
      %45 = vector.load %arg8[%c26, %c0_35] : memref<44x128xf32, #tpu.memory_space<vmem>>, vector<1x16xf32>
      %46 = vector.shape_cast %45 : vector<1x16xf32> to vector<16xf32>
      %47 = vector.shape_cast %44 : vector<16xf32> to vector<1x16xf32>
      tpu.vector_store %arg8[%c26, %c0_35], %47 {strides = array<i32>} : memref<44x128xf32, #tpu.memory_space<vmem>>, vector<1x16xf32>,
      %c0_36 = arith.constant 0 : index
      %c32 = arith.constant 32 : index
      %48 = vector.load %arg7[%c0_36, %c32] : memref<2x256xf32, #tpu.memory_space<vmem>>, vector<1x16xf32>
      %49 = vector.shape_cast %48 : vector<1x16xf32> to vector<16xf32>
      %c5 = arith.constant 5 : index
      %c0_37 = arith.constant 0 : index
      %50 = vector.load %arg8[%c5, %c0_37] : memref<44x128xf32, #tpu.memory_space<vmem>>, vector<1x16xf32>
      %51 = vector.shape_cast %50 : vector<1x16xf32> to vector<16xf32>
      %52 = vector.shape_cast %49 : vector<16xf32> to vector<1x16xf32>
      tpu.vector_store %arg8[%c5, %c0_37], %52 {strides = array<i32>} : memref<44x128xf32, #tpu.memory_space<vmem>>, vector<1x16xf32>,
      %c1_38 = arith.constant 1 : index
      %c32_39 = arith.constant 32 : index
      %53 = vector.load %arg7[%c1_38, %c32_39] : memref<2x256xf32, #tpu.memory_space<vmem>>, vector<1x16xf32>
      %54 = vector.shape_cast %53 : vector<1x16xf32> to vector<16xf32>
      %c27 = arith.constant 27 : index
      %c0_40 = arith.constant 0 : index
      %55 = vector.load %arg8[%c27, %c0_40] : memref<44x128xf32, #tpu.memory_space<vmem>>, vector<1x16xf32>
      %56 = vector.shape_cast %55 : vector<1x16xf32> to vector<16xf32>
      %57 = vector.shape_cast %54 : vector<16xf32> to vector<1x16xf32>
      tpu.vector_store %arg8[%c27, %c0_40], %57 {strides = array<i32>} : memref<44x128xf32, #tpu.memory_space<vmem>>, vector<1x16xf32>,
      %c0_41 = arith.constant 0 : index
      %c48 = arith.constant 48 : index
      %58 = vector.load %arg7[%c0_41, %c48] : memref<2x256xf32, #tpu.memory_space<vmem>>, vector<1x16xf32>
      %59 = vector.shape_cast %58 : vector<1x16xf32> to vector<16xf32>
      %c6 = arith.constant 6 : index
      %c0_42 = arith.constant 0 : index
      %60 = vector.load %arg8[%c6, %c0_42] : memref<44x128xf32, #tpu.memory_space<vmem>>, vector<1x16xf32>
      %61 = vector.shape_cast %60 : vector<1x16xf32> to vector<16xf32>
      %62 = vector.shape_cast %59 : vector<16xf32> to vector<1x16xf32>
      tpu.vector_store %arg8[%c6, %c0_42], %62 {strides = array<i32>} : memref<44x128xf32, #tpu.memory_space<vmem>>, vector<1x16xf32>,
      %c1_43 = arith.constant 1 : index
      %c48_44 = arith.constant 48 : index
      %63 = vector.load %arg7[%c1_43, %c48_44] : memref<2x256xf32, #tpu.memory_space<vmem>>, vector<1x16xf32>
      %64 = vector.shape_cast %63 : vector<1x16xf32> to vector<16xf32>
      %c28 = arith.constant 28 : index
      %c0_45 = arith.constant 0 : index
      %65 = vector.load %arg8[%c28, %c0_45] : memref<44x128xf32, #tpu.memory_space<vmem>>, vector<1x16xf32>
      %66 = vector.shape_cast %65 : vector<1x16xf32> to vector<16xf32>
      %67 = vector.shape_cast %64 : vector<16xf32> to vector<1x16xf32>
      tpu.vector_store %arg8[%c28, %c0_45], %67 {strides = array<i32>} : memref<44x128xf32, #tpu.memory_space<vmem>>, vector<1x16xf32>,
      %c0_46 = arith.constant 0 : index
      %c64 = arith.constant 64 : index
      %68 = vector.load %arg7[%c0_46, %c64] : memref<2x256xf32, #tpu.memory_space<vmem>>, vector<1x16xf32>
      %69 = vector.shape_cast %68 : vector<1x16xf32> to vector<16xf32>
      %c7 = arith.constant 7 : index
      %c0_47 = arith.constant 0 : index
      %70 = vector.load %arg8[%c7, %c0_47] : memref<44x128xf32, #tpu.memory_space<vmem>>, vector<1x16xf32>
      %71 = vector.shape_cast %70 : vector<1x16xf32> to vector<16xf32>
      %72 = vector.shape_cast %69 : vector<16xf32> to vector<1x16xf32>
      tpu.vector_store %arg8[%c7, %c0_47], %72 {strides = array<i32>} : memref<44x128xf32, #tpu.memory_space<vmem>>, vector<1x16xf32>,
      %c1_48 = arith.constant 1 : index
      %c64_49 = arith.constant 64 : index
      %73 = vector.load %arg7[%c1_48, %c64_49] : memref<2x256xf32, #tpu.memory_space<vmem>>, vector<1x16xf32>
      %74 = vector.shape_cast %73 : vector<1x16xf32> to vector<16xf32>
      %c29 = arith.constant 29 : index
      %c0_50 = arith.constant 0 : index
      %75 = vector.load %arg8[%c29, %c0_50] : memref<44x128xf32, #tpu.memory_space<vmem>>, vector<1x16xf32>
      %76 = vector.shape_cast %75 : vector<1x16xf32> to vector<16xf32>
      %77 = vector.shape_cast %74 : vector<16xf32> to vector<1x16xf32>
      tpu.vector_store %arg8[%c29, %c0_50], %77 {strides = array<i32>} : memref<44x128xf32, #tpu.memory_space<vmem>>, vector<1x16xf32>,
      %c0_51 = arith.constant 0 : index
      %c80 = arith.constant 80 : index
      %78 = vector.load %arg7[%c0_51, %c80] : memref<2x256xf32, #tpu.memory_space<vmem>>, vector<1x16xf32>
      %79 = vector.shape_cast %78 : vector<1x16xf32> to vector<16xf32>
      %c8 = arith.constant 8 : index
      %c0_52 = arith.constant 0 : index
      %80 = vector.load %arg8[%c8, %c0_52] : memref<44x128xf32, #tpu.memory_space<vmem>>, vector<1x16xf32>
      %81 = vector.shape_cast %80 : vector<1x16xf32> to vector<16xf32>
      %82 = vector.shape_cast %79 : vector<16xf32> to vector<1x16xf32>
      tpu.vector_store %arg8[%c8, %c0_52], %82 {strides = array<i32>} : memref<44x128xf32, #tpu.memory_space<vmem>>, vector<1x16xf32>,
      %c1_53 = arith.constant 1 : index
      %c80_54 = arith.constant 80 : index
      %83 = vector.load %arg7[%c1_53, %c80_54] : memref<2x256xf32, #tpu.memory_space<vmem>>, vector<1x16xf32>
      %84 = vector.shape_cast %83 : vector<1x16xf32> to vector<16xf32>
      %c30 = arith.constant 30 : index
      %c0_55 = arith.constant 0 : index
      %85 = vector.load %arg8[%c30, %c0_55] : memref<44x128xf32, #tpu.memory_space<vmem>>, vector<1x16xf32>
      %86 = vector.shape_cast %85 : vector<1x16xf32> to vector<16xf32>
      %87 = vector.shape_cast %84 : vector<16xf32> to vector<1x16xf32>
      tpu.vector_store %arg8[%c30, %c0_55], %87 {strides = array<i32>} : memref<44x128xf32, #tpu.memory_space<vmem>>, vector<1x16xf32>,
      %c0_56 = arith.constant 0 : index
      %c96 = arith.constant 96 : index
      %88 = vector.load %arg7[%c0_56, %c96] : memref<2x256xf32, #tpu.memory_space<vmem>>, vector<1x16xf32>
      %89 = vector.shape_cast %88 : vector<1x16xf32> to vector<16xf32>
      %c9 = arith.constant 9 : index
      %c0_57 = arith.constant 0 : index
      %90 = vector.load %arg8[%c9, %c0_57] : memref<44x128xf32, #tpu.memory_space<vmem>>, vector<1x16xf32>
      %91 = vector.shape_cast %90 : vector<1x16xf32> to vector<16xf32>
      %92 = vector.shape_cast %89 : vector<16xf32> to vector<1x16xf32>
      tpu.vector_store %arg8[%c9, %c0_57], %92 {strides = array<i32>} : memref<44x128xf32, #tpu.memory_space<vmem>>, vector<1x16xf32>,
      %c1_58 = arith.constant 1 : index
      %c96_59 = arith.constant 96 : index
      %93 = vector.load %arg7[%c1_58, %c96_59] : memref<2x256xf32, #tpu.memory_space<vmem>>, vector<1x16xf32>
      %94 = vector.shape_cast %93 : vector<1x16xf32> to vector<16xf32>
      %c31 = arith.constant 31 : index
      %c0_60 = arith.constant 0 : index
      %95 = vector.load %arg8[%c31, %c0_60] : memref<44x128xf32, #tpu.memory_space<vmem>>, vector<1x16xf32>
      %96 = vector.shape_cast %95 : vector<1x16xf32> to vector<16xf32>
      %97 = vector.shape_cast %94 : vector<16xf32> to vector<1x16xf32>
      tpu.vector_store %arg8[%c31, %c0_60], %97 {strides = array<i32>} : memref<44x128xf32, #tpu.memory_space<vmem>>, vector<1x16xf32>,
      %c0_61 = arith.constant 0 : index
      %c112 = arith.constant 112 : index
      %98 = vector.load %arg7[%c0_61, %c112] : memref<2x256xf32, #tpu.memory_space<vmem>>, vector<1x16xf32>
      %99 = vector.shape_cast %98 : vector<1x16xf32> to vector<16xf32>
      %c10 = arith.constant 10 : index
      %c0_62 = arith.constant 0 : index
      %100 = vector.load %arg8[%c10, %c0_62] : memref<44x128xf32, #tpu.memory_space<vmem>>, vector<1x16xf32>
      %101 = vector.shape_cast %100 : vector<1x16xf32> to vector<16xf32>
      %102 = vector.shape_cast %99 : vector<16xf32> to vector<1x16xf32>
      tpu.vector_store %arg8[%c10, %c0_62], %102 {strides = array<i32>} : memref<44x128xf32, #tpu.memory_space<vmem>>, vector<1x16xf32>,
      %c1_63 = arith.constant 1 : index
      %c112_64 = arith.constant 112 : index
      %103 = vector.load %arg7[%c1_63, %c112_64] : memref<2x256xf32, #tpu.memory_space<vmem>>, vector<1x16xf32>
      %104 = vector.shape_cast %103 : vector<1x16xf32> to vector<16xf32>
      %c32_65 = arith.constant 32 : index
      %c0_66 = arith.constant 0 : index
      %105 = vector.load %arg8[%c32_65, %c0_66] : memref<44x128xf32, #tpu.memory_space<vmem>>, vector<1x16xf32>
      %106 = vector.shape_cast %105 : vector<1x16xf32> to vector<16xf32>
      %107 = vector.shape_cast %104 : vector<16xf32> to vector<1x16xf32>
      tpu.vector_store %arg8[%c32_65, %c0_66], %107 {strides = array<i32>} : memref<44x128xf32, #tpu.memory_space<vmem>>, vector<1x16xf32>,
      %c0_67 = arith.constant 0 : index
      %c128 = arith.constant 128 : index
      %108 = vector.load %arg7[%c0_67, %c128] : memref<2x256xf32, #tpu.memory_space<vmem>>, vector<1x16xf32>
      %109 = vector.shape_cast %108 : vector<1x16xf32> to vector<16xf32>
      %c11 = arith.constant 11 : index
      %c0_68 = arith.constant 0 : index
      %110 = vector.load %arg8[%c11, %c0_68] : memref<44x128xf32, #tpu.memory_space<vmem>>, vector<1x16xf32>
      %111 = vector.shape_cast %110 : vector<1x16xf32> to vector<16xf32>
      %112 = vector.shape_cast %109 : vector<16xf32> to vector<1x16xf32>
      tpu.vector_store %arg8[%c11, %c0_68], %112 {strides = array<i32>} : memref<44x128xf32, #tpu.memory_space<vmem>>, vector<1x16xf32>,
      %c1_69 = arith.constant 1 : index
      %c128_70 = arith.constant 128 : index
      %113 = vector.load %arg7[%c1_69, %c128_70] : memref<2x256xf32, #tpu.memory_space<vmem>>, vector<1x16xf32>
      %114 = vector.shape_cast %113 : vector<1x16xf32> to vector<16xf32>
      %c33 = arith.constant 33 : index
      %c0_71 = arith.constant 0 : index
      %115 = vector.load %arg8[%c33, %c0_71] : memref<44x128xf32, #tpu.memory_space<vmem>>, vector<1x16xf32>
      %116 = vector.shape_cast %115 : vector<1x16xf32> to vector<16xf32>
      %117 = vector.shape_cast %114 : vector<16xf32> to vector<1x16xf32>
      tpu.vector_store %arg8[%c33, %c0_71], %117 {strides = array<i32>} : memref<44x128xf32, #tpu.memory_space<vmem>>, vector<1x16xf32>,
      %c0_72 = arith.constant 0 : index
      %c144 = arith.constant 144 : index
      %118 = vector.load %arg7[%c0_72, %c144] : memref<2x256xf32, #tpu.memory_space<vmem>>, vector<1x16xf32>
      %119 = vector.shape_cast %118 : vector<1x16xf32> to vector<16xf32>
      %c12 = arith.constant 12 : index
      %c0_73 = arith.constant 0 : index
      %120 = vector.load %arg8[%c12, %c0_73] : memref<44x128xf32, #tpu.memory_space<vmem>>, vector<1x16xf32>
      %121 = vector.shape_cast %120 : vector<1x16xf32> to vector<16xf32>
      %122 = vector.shape_cast %119 : vector<16xf32> to vector<1x16xf32>
      tpu.vector_store %arg8[%c12, %c0_73], %122 {strides = array<i32>} : memref<44x128xf32, #tpu.memory_space<vmem>>, vector<1x16xf32>,
      %c1_74 = arith.constant 1 : index
      %c144_75 = arith.constant 144 : index
      %123 = vector.load %arg7[%c1_74, %c144_75] : memref<2x256xf32, #tpu.memory_space<vmem>>, vector<1x16xf32>
      %124 = vector.shape_cast %123 : vector<1x16xf32> to vector<16xf32>
      %c34 = arith.constant 34 : index
      %c0_76 = arith.constant 0 : index
      %125 = vector.load %arg8[%c34, %c0_76] : memref<44x128xf32, #tpu.memory_space<vmem>>, vector<1x16xf32>
      %126 = vector.shape_cast %125 : vector<1x16xf32> to vector<16xf32>
      %127 = vector.shape_cast %124 : vector<16xf32> to vector<1x16xf32>
      tpu.vector_store %arg8[%c34, %c0_76], %127 {strides = array<i32>} : memref<44x128xf32, #tpu.memory_space<vmem>>, vector<1x16xf32>,
      %c0_77 = arith.constant 0 : index
      %c160 = arith.constant 160 : index
      %128 = vector.load %arg7[%c0_77, %c160] : memref<2x256xf32, #tpu.memory_space<vmem>>, vector<1x16xf32>
      %129 = vector.shape_cast %128 : vector<1x16xf32> to vector<16xf32>
      %c13 = arith.constant 13 : index
      %c0_78 = arith.constant 0 : index
      %130 = vector.load %arg8[%c13, %c0_78] : memref<44x128xf32, #tpu.memory_space<vmem>>, vector<1x16xf32>
      %131 = vector.shape_cast %130 : vector<1x16xf32> to vector<16xf32>
      %132 = vector.shape_cast %129 : vector<16xf32> to vector<1x16xf32>
      tpu.vector_store %arg8[%c13, %c0_78], %132 {strides = array<i32>} : memref<44x128xf32, #tpu.memory_space<vmem>>, vector<1x16xf32>,
      %c1_79 = arith.constant 1 : index
      %c160_80 = arith.constant 160 : index
      %133 = vector.load %arg7[%c1_79, %c160_80] : memref<2x256xf32, #tpu.memory_space<vmem>>, vector<1x16xf32>
      %134 = vector.shape_cast %133 : vector<1x16xf32> to vector<16xf32>
      %c35 = arith.constant 35 : index
      %c0_81 = arith.constant 0 : index
      %135 = vector.load %arg8[%c35, %c0_81] : memref<44x128xf32, #tpu.memory_space<vmem>>, vector<1x16xf32>
      %136 = vector.shape_cast %135 : vector<1x16xf32> to vector<16xf32>
      %137 = vector.shape_cast %134 : vector<16xf32> to vector<1x16xf32>
      tpu.vector_store %arg8[%c35, %c0_81], %137 {strides = array<i32>} : memref<44x128xf32, #tpu.memory_space<vmem>>, vector<1x16xf32>,
      %c0_82 = arith.constant 0 : index
      %c176 = arith.constant 176 : index
      %138 = vector.load %arg7[%c0_82, %c176] : memref<2x256xf32, #tpu.memory_space<vmem>>, vector<1x16xf32>
      %139 = vector.shape_cast %138 : vector<1x16xf32> to vector<16xf32>
      %c14 = arith.constant 14 : index
      %c0_83 = arith.constant 0 : index
      %140 = vector.load %arg8[%c14, %c0_83] : memref<44x128xf32, #tpu.memory_space<vmem>>, vector<1x16xf32>
      %141 = vector.shape_cast %140 : vector<1x16xf32> to vector<16xf32>
      %142 = vector.shape_cast %139 : vector<16xf32> to vector<1x16xf32>
      tpu.vector_store %arg8[%c14, %c0_83], %142 {strides = array<i32>} : memref<44x128xf32, #tpu.memory_space<vmem>>, vector<1x16xf32>,
      %c1_84 = arith.constant 1 : index
      %c176_85 = arith.constant 176 : index
      %143 = vector.load %arg7[%c1_84, %c176_85] : memref<2x256xf32, #tpu.memory_space<vmem>>, vector<1x16xf32>
      %144 = vector.shape_cast %143 : vector<1x16xf32> to vector<16xf32>
      %c36 = arith.constant 36 : index
      %c0_86 = arith.constant 0 : index
      %145 = vector.load %arg8[%c36, %c0_86] : memref<44x128xf32, #tpu.memory_space<vmem>>, vector<1x16xf32>
      %146 = vector.shape_cast %145 : vector<1x16xf32> to vector<16xf32>
      %147 = vector.shape_cast %144 : vector<16xf32> to vector<1x16xf32>
      tpu.vector_store %arg8[%c36, %c0_86], %147 {strides = array<i32>} : memref<44x128xf32, #tpu.memory_space<vmem>>, vector<1x16xf32>,
      %c0_87 = arith.constant 0 : index
      %c192 = arith.constant 192 : index
      %148 = vector.load %arg7[%c0_87, %c192] : memref<2x256xf32, #tpu.memory_space<vmem>>, vector<1x16xf32>
      %149 = vector.shape_cast %148 : vector<1x16xf32> to vector<16xf32>
      %c15 = arith.constant 15 : index
      %c0_88 = arith.constant 0 : index
      %150 = vector.load %arg8[%c15, %c0_88] : memref<44x128xf32, #tpu.memory_space<vmem>>, vector<1x16xf32>
      %151 = vector.shape_cast %150 : vector<1x16xf32> to vector<16xf32>
      %152 = vector.shape_cast %149 : vector<16xf32> to vector<1x16xf32>
      tpu.vector_store %arg8[%c15, %c0_88], %152 {strides = array<i32>} : memref<44x128xf32, #tpu.memory_space<vmem>>, vector<1x16xf32>,
      %c1_89 = arith.constant 1 : index
      %c192_90 = arith.constant 192 : index
      %153 = vector.load %arg7[%c1_89, %c192_90] : memref<2x256xf32, #tpu.memory_space<vmem>>, vector<1x16xf32>
      %154 = vector.shape_cast %153 : vector<1x16xf32> to vector<16xf32>
      %c37 = arith.constant 37 : index
      %c0_91 = arith.constant 0 : index
      %155 = vector.load %arg8[%c37, %c0_91] : memref<44x128xf32, #tpu.memory_space<vmem>>, vector<1x16xf32>
      %156 = vector.shape_cast %155 : vector<1x16xf32> to vector<16xf32>
      %157 = vector.shape_cast %154 : vector<16xf32> to vector<1x16xf32>
      tpu.vector_store %arg8[%c37, %c0_91], %157 {strides = array<i32>} : memref<44x128xf32, #tpu.memory_space<vmem>>, vector<1x16xf32>,
      %c0_92 = arith.constant 0 : index
      %c208 = arith.constant 208 : index
      %158 = vector.load %arg7[%c0_92, %c208] : memref<2x256xf32, #tpu.memory_space<vmem>>, vector<1x16xf32>
      %159 = vector.shape_cast %158 : vector<1x16xf32> to vector<16xf32>
      %c16_93 = arith.constant 16 : index
      %c0_94 = arith.constant 0 : index
      %160 = vector.load %arg8[%c16_93, %c0_94] : memref<44x128xf32, #tpu.memory_space<vmem>>, vector<1x16xf32>
      %161 = vector.shape_cast %160 : vector<1x16xf32> to vector<16xf32>
      %162 = vector.shape_cast %159 : vector<16xf32> to vector<1x16xf32>
      tpu.vector_store %arg8[%c16_93, %c0_94], %162 {strides = array<i32>} : memref<44x128xf32, #tpu.memory_space<vmem>>, vector<1x16xf32>,
      %c1_95 = arith.constant 1 : index
      %c208_96 = arith.constant 208 : index
      %163 = vector.load %arg7[%c1_95, %c208_96] : memref<2x256xf32, #tpu.memory_space<vmem>>, vector<1x16xf32>
      %164 = vector.shape_cast %163 : vector<1x16xf32> to vector<16xf32>
      %c38 = arith.constant 38 : index
      %c0_97 = arith.constant 0 : index
      %165 = vector.load %arg8[%c38, %c0_97] : memref<44x128xf32, #tpu.memory_space<vmem>>, vector<1x16xf32>
      %166 = vector.shape_cast %165 : vector<1x16xf32> to vector<16xf32>
      %167 = vector.shape_cast %164 : vector<16xf32> to vector<1x16xf32>
      tpu.vector_store %arg8[%c38, %c0_97], %167 {strides = array<i32>} : memref<44x128xf32, #tpu.memory_space<vmem>>, vector<1x16xf32>,
      %c0_98 = arith.constant 0 : index
      %c224 = arith.constant 224 : index
      %168 = vector.load %arg7[%c0_98, %c224] : memref<2x256xf32, #tpu.memory_space<vmem>>, vector<1x16xf32>
      %169 = vector.shape_cast %168 : vector<1x16xf32> to vector<16xf32>
      %c17 = arith.constant 17 : index
      %c0_99 = arith.constant 0 : index
      %170 = vector.load %arg8[%c17, %c0_99] : memref<44x128xf32, #tpu.memory_space<vmem>>, vector<1x16xf32>
      %171 = vector.shape_cast %170 : vector<1x16xf32> to vector<16xf32>
      %172 = vector.shape_cast %169 : vector<16xf32> to vector<1x16xf32>
      tpu.vector_store %arg8[%c17, %c0_99], %172 {strides = array<i32>} : memref<44x128xf32, #tpu.memory_space<vmem>>, vector<1x16xf32>,
      %c1_100 = arith.constant 1 : index
      %c224_101 = arith.constant 224 : index
      %173 = vector.load %arg7[%c1_100, %c224_101] : memref<2x256xf32, #tpu.memory_space<vmem>>, vector<1x16xf32>
      %174 = vector.shape_cast %173 : vector<1x16xf32> to vector<16xf32>
      %c39 = arith.constant 39 : index
      %c0_102 = arith.constant 0 : index
      %175 = vector.load %arg8[%c39, %c0_102] : memref<44x128xf32, #tpu.memory_space<vmem>>, vector<1x16xf32>
      %176 = vector.shape_cast %175 : vector<1x16xf32> to vector<16xf32>
      %177 = vector.shape_cast %174 : vector<16xf32> to vector<1x16xf32>
      tpu.vector_store %arg8[%c39, %c0_102], %177 {strides = array<i32>} : memref<44x128xf32, #tpu.memory_space<vmem>>, vector<1x16xf32>,
      %c0_103 = arith.constant 0 : index
      %c240 = arith.constant 240 : index
      %178 = vector.load %arg7[%c0_103, %c240] : memref<2x256xf32, #tpu.memory_space<vmem>>, vector<1x16xf32>
      %179 = vector.shape_cast %178 : vector<1x16xf32> to vector<16xf32>
      %c18 = arith.constant 18 : index
      %c0_104 = arith.constant 0 : index
      %180 = vector.load %arg8[%c18, %c0_104] : memref<44x128xf32, #tpu.memory_space<vmem>>, vector<1x16xf32>
      %181 = vector.shape_cast %180 : vector<1x16xf32> to vector<16xf32>
      %182 = vector.shape_cast %179 : vector<16xf32> to vector<1x16xf32>
      tpu.vector_store %arg8[%c18, %c0_104], %182 {strides = array<i32>} : memref<44x128xf32, #tpu.memory_space<vmem>>, vector<1x16xf32>,
      %c1_105 = arith.constant 1 : index
      %c240_106 = arith.constant 240 : index
      %183 = vector.load %arg7[%c1_105, %c240_106] : memref<2x256xf32, #tpu.memory_space<vmem>>, vector<1x16xf32>
      %184 = vector.shape_cast %183 : vector<1x16xf32> to vector<16xf32>
      %c40 = arith.constant 40 : index
      %c0_107 = arith.constant 0 : index
      %185 = vector.load %arg8[%c40, %c0_107] : memref<44x128xf32, #tpu.memory_space<vmem>>, vector<1x16xf32>
      %186 = vector.shape_cast %185 : vector<1x16xf32> to vector<16xf32>
      %187 = vector.shape_cast %184 : vector<16xf32> to vector<1x16xf32>
      tpu.vector_store %arg8[%c40, %c0_107], %187 {strides = array<i32>} : memref<44x128xf32, #tpu.memory_space<vmem>>, vector<1x16xf32>,
      %c0_108 = arith.constant 0 : index
      %188 = memref.load %arg3[%c0_108] : memref<98xf32, #tpu.memory_space<smem>>
      %c1_109 = arith.constant 1 : index
      %189 = memref.load %arg3[%c1_109] : memref<98xf32, #tpu.memory_space<smem>>
      %c2 = arith.constant 2 : index
      %190 = memref.load %arg3[%c2] : memref<98xf32, #tpu.memory_space<smem>>
      %c3_110 = arith.constant 3 : index
      %191 = memref.load %arg3[%c3_110] : memref<98xf32, #tpu.memory_space<smem>>
      %c4_111 = arith.constant 4 : index
      %192 = memref.load %arg3[%c4_111] : memref<98xf32, #tpu.memory_space<smem>>
      %c5_112 = arith.constant 5 : index
      %193 = memref.load %arg3[%c5_112] : memref<98xf32, #tpu.memory_space<smem>>
      %c6_113 = arith.constant 6 : index
      %194 = memref.load %arg3[%c6_113] : memref<98xf32, #tpu.memory_space<smem>>
      %c7_114 = arith.constant 7 : index
      %195 = memref.load %arg3[%c7_114] : memref<98xf32, #tpu.memory_space<smem>>
      %c8_115 = arith.constant 8 : index
      %196 = memref.load %arg3[%c8_115] : memref<98xf32, #tpu.memory_space<smem>>
      %c9_116 = arith.constant 9 : index
      %197 = memref.load %arg3[%c9_116] : memref<98xf32, #tpu.memory_space<smem>>
      %c10_117 = arith.constant 10 : index
      %198 = memref.load %arg3[%c10_117] : memref<98xf32, #tpu.memory_space<smem>>
      %c11_118 = arith.constant 11 : index
      %199 = memref.load %arg3[%c11_118] : memref<98xf32, #tpu.memory_space<smem>>
      %c12_119 = arith.constant 12 : index
      %200 = memref.load %arg3[%c12_119] : memref<98xf32, #tpu.memory_space<smem>>
      %c13_120 = arith.constant 13 : index
      %201 = memref.load %arg3[%c13_120] : memref<98xf32, #tpu.memory_space<smem>>
      %c14_121 = arith.constant 14 : index
      %202 = memref.load %arg3[%c14_121] : memref<98xf32, #tpu.memory_space<smem>>
      %c15_122 = arith.constant 15 : index
      %203 = memref.load %arg3[%c15_122] : memref<98xf32, #tpu.memory_space<smem>>
      %c16_123 = arith.constant 16 : index
      %204 = memref.load %arg3[%c16_123] : memref<98xf32, #tpu.memory_space<smem>>
      %c17_124 = arith.constant 17 : index
      %205 = memref.load %arg3[%c17_124] : memref<98xf32, #tpu.memory_space<smem>>
      %c18_125 = arith.constant 18 : index
      %206 = memref.load %arg3[%c18_125] : memref<98xf32, #tpu.memory_space<smem>>
      %c19 = arith.constant 19 : index
      %207 = memref.load %arg3[%c19] : memref<98xf32, #tpu.memory_space<smem>>
      %c20 = arith.constant 20 : index
      %208 = memref.load %arg3[%c20] : memref<98xf32, #tpu.memory_space<smem>>
      %c21 = arith.constant 21 : index
      %209 = memref.load %arg3[%c21] : memref<98xf32, #tpu.memory_space<smem>>
      %c22 = arith.constant 22 : index
      %210 = memref.load %arg3[%c22] : memref<98xf32, #tpu.memory_space<smem>>
      %c23 = arith.constant 23 : index
      %211 = memref.load %arg3[%c23] : memref<98xf32, #tpu.memory_space<smem>>
      %c24 = arith.constant 24 : index
      %212 = memref.load %arg3[%c24] : memref<98xf32, #tpu.memory_space<smem>>
      %c25_126 = arith.constant 25 : index
      %213 = memref.load %arg3[%c25_126] : memref<98xf32, #tpu.memory_space<smem>>
      %c26_127 = arith.constant 26 : index
      %214 = memref.load %arg3[%c26_127] : memref<98xf32, #tpu.memory_space<smem>>
      %c27_128 = arith.constant 27 : index
      %215 = memref.load %arg3[%c27_128] : memref<98xf32, #tpu.memory_space<smem>>
      %c28_129 = arith.constant 28 : index
      %216 = memref.load %arg3[%c28_129] : memref<98xf32, #tpu.memory_space<smem>>
      %c29_130 = arith.constant 29 : index
      %217 = memref.load %arg3[%c29_130] : memref<98xf32, #tpu.memory_space<smem>>
      %c30_131 = arith.constant 30 : index
      %218 = memref.load %arg3[%c30_131] : memref<98xf32, #tpu.memory_space<smem>>
      %c31_132 = arith.constant 31 : index
      %219 = memref.load %arg3[%c31_132] : memref<98xf32, #tpu.memory_space<smem>>
      %c32_133 = arith.constant 32 : index
      %220 = memref.load %arg3[%c32_133] : memref<98xf32, #tpu.memory_space<smem>>
      %c33_134 = arith.constant 33 : index
      %221 = memref.load %arg3[%c33_134] : memref<98xf32, #tpu.memory_space<smem>>
      %c34_135 = arith.constant 34 : index
      %222 = memref.load %arg3[%c34_135] : memref<98xf32, #tpu.memory_space<smem>>
      %c35_136 = arith.constant 35 : index
      %223 = memref.load %arg3[%c35_136] : memref<98xf32, #tpu.memory_space<smem>>
      %c36_137 = arith.constant 36 : index
      %224 = memref.load %arg3[%c36_137] : memref<98xf32, #tpu.memory_space<smem>>
      %c37_138 = arith.constant 37 : index
      %225 = memref.load %arg3[%c37_138] : memref<98xf32, #tpu.memory_space<smem>>
      %c38_139 = arith.constant 38 : index
      %226 = memref.load %arg3[%c38_139] : memref<98xf32, #tpu.memory_space<smem>>
      %c39_140 = arith.constant 39 : index
      %227 = memref.load %arg3[%c39_140] : memref<98xf32, #tpu.memory_space<smem>>
      %c40_141 = arith.constant 40 : index
      %228 = memref.load %arg3[%c40_141] : memref<98xf32, #tpu.memory_space<smem>>
      %c41 = arith.constant 41 : index
      %229 = memref.load %arg3[%c41] : memref<98xf32, #tpu.memory_space<smem>>
      %c42 = arith.constant 42 : index
      %230 = memref.load %arg3[%c42] : memref<98xf32, #tpu.memory_space<smem>>
      %c43 = arith.constant 43 : index
      %231 = memref.load %arg3[%c43] : memref<98xf32, #tpu.memory_space<smem>>
      %c44 = arith.constant 44 : index
      %232 = memref.load %arg3[%c44] : memref<98xf32, #tpu.memory_space<smem>>
      %c45 = arith.constant 45 : index
      %233 = memref.load %arg3[%c45] : memref<98xf32, #tpu.memory_space<smem>>
      %c46 = arith.constant 46 : index
      %234 = memref.load %arg3[%c46] : memref<98xf32, #tpu.memory_space<smem>>
      %c47 = arith.constant 47 : index
      %235 = memref.load %arg3[%c47] : memref<98xf32, #tpu.memory_space<smem>>
      %c48_142 = arith.constant 48 : index
      %236 = memref.load %arg3[%c48_142] : memref<98xf32, #tpu.memory_space<smem>>
      %c49 = arith.constant 49 : index
      %237 = memref.load %arg3[%c49] : memref<98xf32, #tpu.memory_space<smem>>
      %c50 = arith.constant 50 : index
      %238 = memref.load %arg3[%c50] : memref<98xf32, #tpu.memory_space<smem>>
      %c51 = arith.constant 51 : index
      %239 = memref.load %arg3[%c51] : memref<98xf32, #tpu.memory_space<smem>>
      %c52 = arith.constant 52 : index
      %240 = memref.load %arg3[%c52] : memref<98xf32, #tpu.memory_space<smem>>
      %c53 = arith.constant 53 : index
      %241 = memref.load %arg3[%c53] : memref<98xf32, #tpu.memory_space<smem>>
      %c54 = arith.constant 54 : index
      %242 = memref.load %arg3[%c54] : memref<98xf32, #tpu.memory_space<smem>>
      %c55 = arith.constant 55 : index
      %243 = memref.load %arg3[%c55] : memref<98xf32, #tpu.memory_space<smem>>
      %c56 = arith.constant 56 : index
      %244 = memref.load %arg3[%c56] : memref<98xf32, #tpu.memory_space<smem>>
      %c57 = arith.constant 57 : index
      %245 = memref.load %arg3[%c57] : memref<98xf32, #tpu.memory_space<smem>>
      %c58 = arith.constant 58 : index
      %246 = memref.load %arg3[%c58] : memref<98xf32, #tpu.memory_space<smem>>
      %c59 = arith.constant 59 : index
      %247 = memref.load %arg3[%c59] : memref<98xf32, #tpu.memory_space<smem>>
      %c60 = arith.constant 60 : index
      %248 = memref.load %arg3[%c60] : memref<98xf32, #tpu.memory_space<smem>>
      %c61 = arith.constant 61 : index
      %249 = memref.load %arg3[%c61] : memref<98xf32, #tpu.memory_space<smem>>
      %c62 = arith.constant 62 : index
      %250 = memref.load %arg3[%c62] : memref<98xf32, #tpu.memory_space<smem>>
      %c63 = arith.constant 63 : index
      %251 = memref.load %arg3[%c63] : memref<98xf32, #tpu.memory_space<smem>>
      %c64_143 = arith.constant 64 : index
      %252 = memref.load %arg3[%c64_143] : memref<98xf32, #tpu.memory_space<smem>>
      %c65 = arith.constant 65 : index
      %253 = memref.load %arg3[%c65] : memref<98xf32, #tpu.memory_space<smem>>
      %c66 = arith.constant 66 : index
      %254 = memref.load %arg3[%c66] : memref<98xf32, #tpu.memory_space<smem>>
      %c67 = arith.constant 67 : index
      %255 = memref.load %arg3[%c67] : memref<98xf32, #tpu.memory_space<smem>>
      %c68 = arith.constant 68 : index
      %256 = memref.load %arg3[%c68] : memref<98xf32, #tpu.memory_space<smem>>
      %c69 = arith.constant 69 : index
      %257 = memref.load %arg3[%c69] : memref<98xf32, #tpu.memory_space<smem>>
      %c70 = arith.constant 70 : index
      %258 = memref.load %arg3[%c70] : memref<98xf32, #tpu.memory_space<smem>>
      %c71 = arith.constant 71 : index
      %259 = memref.load %arg3[%c71] : memref<98xf32, #tpu.memory_space<smem>>
      %c72 = arith.constant 72 : index
      %260 = memref.load %arg3[%c72] : memref<98xf32, #tpu.memory_space<smem>>
      %c73 = arith.constant 73 : index
      %261 = memref.load %arg3[%c73] : memref<98xf32, #tpu.memory_space<smem>>
      %c74 = arith.constant 74 : index
      %262 = memref.load %arg3[%c74] : memref<98xf32, #tpu.memory_space<smem>>
      %c75 = arith.constant 75 : index
      %263 = memref.load %arg3[%c75] : memref<98xf32, #tpu.memory_space<smem>>
      %c76 = arith.constant 76 : index
      %264 = memref.load %arg3[%c76] : memref<98xf32, #tpu.memory_space<smem>>
      %c77 = arith.constant 77 : index
      %265 = memref.load %arg3[%c77] : memref<98xf32, #tpu.memory_space<smem>>
      %c78 = arith.constant 78 : index
      %266 = memref.load %arg3[%c78] : memref<98xf32, #tpu.memory_space<smem>>
      %c79 = arith.constant 79 : index
      %267 = memref.load %arg3[%c79] : memref<98xf32, #tpu.memory_space<smem>>
      %c80_144 = arith.constant 80 : index
      %268 = memref.load %arg3[%c80_144] : memref<98xf32, #tpu.memory_space<smem>>
      %c81 = arith.constant 81 : index
      %269 = memref.load %arg3[%c81] : memref<98xf32, #tpu.memory_space<smem>>
      %c82 = arith.constant 82 : index
      %270 = memref.load %arg3[%c82] : memref<98xf32, #tpu.memory_space<smem>>
      %c83 = arith.constant 83 : index
      %271 = memref.load %arg3[%c83] : memref<98xf32, #tpu.memory_space<smem>>
      %c84 = arith.constant 84 : index
      %272 = memref.load %arg3[%c84] : memref<98xf32, #tpu.memory_space<smem>>
      %c85 = arith.constant 85 : index
      %273 = memref.load %arg3[%c85] : memref<98xf32, #tpu.memory_space<smem>>
      %c86 = arith.constant 86 : index
      %274 = memref.load %arg3[%c86] : memref<98xf32, #tpu.memory_space<smem>>
      %c87 = arith.constant 87 : index
      %275 = memref.load %arg3[%c87] : memref<98xf32, #tpu.memory_space<smem>>
      %c88 = arith.constant 88 : index
      %276 = memref.load %arg3[%c88] : memref<98xf32, #tpu.memory_space<smem>>
      %c89 = arith.constant 89 : index
      %277 = memref.load %arg3[%c89] : memref<98xf32, #tpu.memory_space<smem>>
      %c90 = arith.constant 90 : index
      %278 = memref.load %arg3[%c90] : memref<98xf32, #tpu.memory_space<smem>>
      %c91 = arith.constant 91 : index
      %279 = memref.load %arg3[%c91] : memref<98xf32, #tpu.memory_space<smem>>
      %c92 = arith.constant 92 : index
      %280 = memref.load %arg3[%c92] : memref<98xf32, #tpu.memory_space<smem>>
      %c93 = arith.constant 93 : index
      %281 = memref.load %arg3[%c93] : memref<98xf32, #tpu.memory_space<smem>>
      %c94 = arith.constant 94 : index
      %282 = memref.load %arg3[%c94] : memref<98xf32, #tpu.memory_space<smem>>
      %c95 = arith.constant 95 : index
      %283 = memref.load %arg3[%c95] : memref<98xf32, #tpu.memory_space<smem>>
      %c96_145 = arith.constant 96 : index
      %284 = memref.load %arg3[%c96_145] : memref<98xf32, #tpu.memory_space<smem>>
      %c97 = arith.constant 97 : index
      %285 = memref.load %arg3[%c97] : memref<98xf32, #tpu.memory_space<smem>>
      %c0_146 = arith.constant 0 : index
      %c0_147 = arith.constant 0 : index
      %286 = vector.load %arg8[%c0_146, %c0_147] : memref<44x128xf32, #tpu.memory_space<vmem>>, vector<44x128xf32>
      %cst_148 = arith.constant 0.000000e+00 : f32
      %287 = vector.broadcast %cst_148 : f32 to vector<16x128xf32>
      %c3_i32 = arith.constant 3 : i32
      %288 = tpu.dynamic_rotate %286 by %c3_i32 dim 1 : vector<44x128xf32>, i32 -> vector<44x128xf32>
      %289 = vector.extract_strided_slice %288 {offsets = [0, 0], sizes = [16, 128], strides = [1, 1]} : vector<44x128xf32> to vector<16x128xf32>
      %290 = vector.broadcast %188 : f32 to vector<16x128xf32>
      %291 = arith.mulf %290, %289 : vector<16x128xf32>
      %292 = arith.addf %287, %291 : vector<16x128xf32>
      %293 = vector.extract_strided_slice %288 {offsets = [22, 0], sizes = [16, 128], strides = [1, 1]} : vector<44x128xf32> to vector<16x128xf32>
      %294 = vector.broadcast %237 : f32 to vector<16x128xf32>
      %295 = arith.mulf %294, %293 : vector<16x128xf32>
      %296 = arith.addf %292, %295 : vector<16x128xf32>
      %297 = vector.extract_strided_slice %288 {offsets = [1, 0], sizes = [16, 128], strides = [1, 1]} : vector<44x128xf32> to vector<16x128xf32>
      %298 = vector.broadcast %195 : f32 to vector<16x128xf32>
      %299 = arith.mulf %298, %297 : vector<16x128xf32>
      %300 = arith.addf %296, %299 : vector<16x128xf32>
      %301 = vector.extract_strided_slice %288 {offsets = [23, 0], sizes = [16, 128], strides = [1, 1]} : vector<44x128xf32> to vector<16x128xf32>
      %302 = vector.broadcast %244 : f32 to vector<16x128xf32>
      %303 = arith.mulf %302, %301 : vector<16x128xf32>
      %304 = arith.addf %300, %303 : vector<16x128xf32>
      %305 = vector.extract_strided_slice %288 {offsets = [2, 0], sizes = [16, 128], strides = [1, 1]} : vector<44x128xf32> to vector<16x128xf32>
      %306 = vector.broadcast %202 : f32 to vector<16x128xf32>
      %307 = arith.mulf %306, %305 : vector<16x128xf32>
      %308 = arith.addf %304, %307 : vector<16x128xf32>
      %309 = vector.extract_strided_slice %288 {offsets = [24, 0], sizes = [16, 128], strides = [1, 1]} : vector<44x128xf32> to vector<16x128xf32>
      %310 = vector.broadcast %251 : f32 to vector<16x128xf32>
      %311 = arith.mulf %310, %309 : vector<16x128xf32>
      %312 = arith.addf %308, %311 : vector<16x128xf32>
      %313 = vector.extract_strided_slice %288 {offsets = [3, 0], sizes = [16, 128], strides = [1, 1]} : vector<44x128xf32> to vector<16x128xf32>
      %314 = vector.broadcast %209 : f32 to vector<16x128xf32>
      %315 = arith.mulf %314, %313 : vector<16x128xf32>
      %316 = arith.addf %312, %315 : vector<16x128xf32>
      %317 = vector.extract_strided_slice %288 {offsets = [25, 0], sizes = [16, 128], strides = [1, 1]} : vector<44x128xf32> to vector<16x128xf32>
      %318 = vector.broadcast %258 : f32 to vector<16x128xf32>
      %319 = arith.mulf %318, %317 : vector<16x128xf32>
      %320 = arith.addf %316, %319 : vector<16x128xf32>
      %321 = vector.extract_strided_slice %288 {offsets = [4, 0], sizes = [16, 128], strides = [1, 1]} : vector<44x128xf32> to vector<16x128xf32>
      %322 = vector.broadcast %216 : f32 to vector<16x128xf32>
      %323 = arith.mulf %322, %321 : vector<16x128xf32>
      %324 = arith.addf %320, %323 : vector<16x128xf32>
      %325 = vector.extract_strided_slice %288 {offsets = [26, 0], sizes = [16, 128], strides = [1, 1]} : vector<44x128xf32> to vector<16x128xf32>
      %326 = vector.broadcast %265 : f32 to vector<16x128xf32>
      %327 = arith.mulf %326, %325 : vector<16x128xf32>
      %328 = arith.addf %324, %327 : vector<16x128xf32>
      %329 = vector.extract_strided_slice %288 {offsets = [5, 0], sizes = [16, 128], strides = [1, 1]} : vector<44x128xf32> to vector<16x128xf32>
      %330 = vector.broadcast %223 : f32 to vector<16x128xf32>
      %331 = arith.mulf %330, %329 : vector<16x128xf32>
      %332 = arith.addf %328, %331 : vector<16x128xf32>
      %333 = vector.extract_strided_slice %288 {offsets = [27, 0], sizes = [16, 128], strides = [1, 1]} : vector<44x128xf32> to vector<16x128xf32>
      %334 = vector.broadcast %272 : f32 to vector<16x128xf32>
      %335 = arith.mulf %334, %333 : vector<16x128xf32>
      %336 = arith.addf %332, %335 : vector<16x128xf32>
      %337 = vector.extract_strided_slice %288 {offsets = [6, 0], sizes = [16, 128], strides = [1, 1]} : vector<44x128xf32> to vector<16x128xf32>
      %338 = vector.broadcast %230 : f32 to vector<16x128xf32>
      %339 = arith.mulf %338, %337 : vector<16x128xf32>
      %340 = arith.addf %336, %339 : vector<16x128xf32>
      %341 = vector.extract_strided_slice %288 {offsets = [28, 0], sizes = [16, 128], strides = [1, 1]} : vector<44x128xf32> to vector<16x128xf32>
      %342 = vector.broadcast %279 : f32 to vector<16x128xf32>
      %343 = arith.mulf %342, %341 : vector<16x128xf32>
      %344 = arith.addf %340, %343 : vector<16x128xf32>
      %c2_i32 = arith.constant 2 : i32
      %345 = tpu.dynamic_rotate %286 by %c2_i32 dim 1 : vector<44x128xf32>, i32 -> vector<44x128xf32>
      %346 = vector.extract_strided_slice %345 {offsets = [0, 0], sizes = [16, 128], strides = [1, 1]} : vector<44x128xf32> to vector<16x128xf32>
      %347 = vector.broadcast %189 : f32 to vector<16x128xf32>
      %348 = arith.mulf %347, %346 : vector<16x128xf32>
      %349 = arith.addf %344, %348 : vector<16x128xf32>
      %350 = vector.extract_strided_slice %345 {offsets = [22, 0], sizes = [16, 128], strides = [1, 1]} : vector<44x128xf32> to vector<16x128xf32>
      %351 = vector.broadcast %238 : f32 to vector<16x128xf32>
      %352 = arith.mulf %351, %350 : vector<16x128xf32>
      %353 = arith.addf %349, %352 : vector<16x128xf32>
      %354 = vector.extract_strided_slice %345 {offsets = [1, 0], sizes = [16, 128], strides = [1, 1]} : vector<44x128xf32> to vector<16x128xf32>
      %355 = vector.broadcast %196 : f32 to vector<16x128xf32>
      %356 = arith.mulf %355, %354 : vector<16x128xf32>
      %357 = arith.addf %353, %356 : vector<16x128xf32>
      %358 = vector.extract_strided_slice %345 {offsets = [23, 0], sizes = [16, 128], strides = [1, 1]} : vector<44x128xf32> to vector<16x128xf32>
      %359 = vector.broadcast %245 : f32 to vector<16x128xf32>
      %360 = arith.mulf %359, %358 : vector<16x128xf32>
      %361 = arith.addf %357, %360 : vector<16x128xf32>
      %362 = vector.extract_strided_slice %345 {offsets = [2, 0], sizes = [16, 128], strides = [1, 1]} : vector<44x128xf32> to vector<16x128xf32>
      %363 = vector.broadcast %203 : f32 to vector<16x128xf32>
      %364 = arith.mulf %363, %362 : vector<16x128xf32>
      %365 = arith.addf %361, %364 : vector<16x128xf32>
      %366 = vector.extract_strided_slice %345 {offsets = [24, 0], sizes = [16, 128], strides = [1, 1]} : vector<44x128xf32> to vector<16x128xf32>
      %367 = vector.broadcast %252 : f32 to vector<16x128xf32>
      %368 = arith.mulf %367, %366 : vector<16x128xf32>
      %369 = arith.addf %365, %368 : vector<16x128xf32>
      %370 = vector.extract_strided_slice %345 {offsets = [3, 0], sizes = [16, 128], strides = [1, 1]} : vector<44x128xf32> to vector<16x128xf32>
      %371 = vector.broadcast %210 : f32 to vector<16x128xf32>
      %372 = arith.mulf %371, %370 : vector<16x128xf32>
      %373 = arith.addf %369, %372 : vector<16x128xf32>
      %374 = vector.extract_strided_slice %345 {offsets = [25, 0], sizes = [16, 128], strides = [1, 1]} : vector<44x128xf32> to vector<16x128xf32>
      %375 = vector.broadcast %259 : f32 to vector<16x128xf32>
      %376 = arith.mulf %375, %374 : vector<16x128xf32>
      %377 = arith.addf %373, %376 : vector<16x128xf32>
      %378 = vector.extract_strided_slice %345 {offsets = [4, 0], sizes = [16, 128], strides = [1, 1]} : vector<44x128xf32> to vector<16x128xf32>
      %379 = vector.broadcast %217 : f32 to vector<16x128xf32>
      %380 = arith.mulf %379, %378 : vector<16x128xf32>
      %381 = arith.addf %377, %380 : vector<16x128xf32>
      %382 = vector.extract_strided_slice %345 {offsets = [26, 0], sizes = [16, 128], strides = [1, 1]} : vector<44x128xf32> to vector<16x128xf32>
      %383 = vector.broadcast %266 : f32 to vector<16x128xf32>
      %384 = arith.mulf %383, %382 : vector<16x128xf32>
      %385 = arith.addf %381, %384 : vector<16x128xf32>
      %386 = vector.extract_strided_slice %345 {offsets = [5, 0], sizes = [16, 128], strides = [1, 1]} : vector<44x128xf32> to vector<16x128xf32>
      %387 = vector.broadcast %224 : f32 to vector<16x128xf32>
      %388 = arith.mulf %387, %386 : vector<16x128xf32>
      %389 = arith.addf %385, %388 : vector<16x128xf32>
      %390 = vector.extract_strided_slice %345 {offsets = [27, 0], sizes = [16, 128], strides = [1, 1]} : vector<44x128xf32> to vector<16x128xf32>
      %391 = vector.broadcast %273 : f32 to vector<16x128xf32>
      %392 = arith.mulf %391, %390 : vector<16x128xf32>
      %393 = arith.addf %389, %392 : vector<16x128xf32>
      %394 = vector.extract_strided_slice %345 {offsets = [6, 0], sizes = [16, 128], strides = [1, 1]} : vector<44x128xf32> to vector<16x128xf32>
      %395 = vector.broadcast %231 : f32 to vector<16x128xf32>
      %396 = arith.mulf %395, %394 : vector<16x128xf32>
      %397 = arith.addf %393, %396 : vector<16x128xf32>
      %398 = vector.extract_strided_slice %345 {offsets = [28, 0], sizes = [16, 128], strides = [1, 1]} : vector<44x128xf32> to vector<16x128xf32>
      %399 = vector.broadcast %280 : f32 to vector<16x128xf32>
      %400 = arith.mulf %399, %398 : vector<16x128xf32>
      %401 = arith.addf %397, %400 : vector<16x128xf32>
      %c1_i32 = arith.constant 1 : i32
      %402 = tpu.dynamic_rotate %286 by %c1_i32 dim 1 : vector<44x128xf32>, i32 -> vector<44x128xf32>
      %403 = vector.extract_strided_slice %402 {offsets = [0, 0], sizes = [16, 128], strides = [1, 1]} : vector<44x128xf32> to vector<16x128xf32>
      %404 = vector.broadcast %190 : f32 to vector<16x128xf32>
      %405 = arith.mulf %404, %403 : vector<16x128xf32>
      %406 = arith.addf %401, %405 : vector<16x128xf32>
      %407 = vector.extract_strided_slice %402 {offsets = [22, 0], sizes = [16, 128], strides = [1, 1]} : vector<44x128xf32> to vector<16x128xf32>
      %408 = vector.broadcast %239 : f32 to vector<16x128xf32>
      %409 = arith.mulf %408, %407 : vector<16x128xf32>
      %410 = arith.addf %406, %409 : vector<16x128xf32>
      %411 = vector.extract_strided_slice %402 {offsets = [1, 0], sizes = [16, 128], strides = [1, 1]} : vector<44x128xf32> to vector<16x128xf32>
      %412 = vector.broadcast %197 : f32 to vector<16x128xf32>
      %413 = arith.mulf %412, %411 : vector<16x128xf32>
      %414 = arith.addf %410, %413 : vector<16x128xf32>
      %415 = vector.extract_strided_slice %402 {offsets = [23, 0], sizes = [16, 128], strides = [1, 1]} : vector<44x128xf32> to vector<16x128xf32>
      %416 = vector.broadcast %246 : f32 to vector<16x128xf32>
      %417 = arith.mulf %416, %415 : vector<16x128xf32>
      %418 = arith.addf %414, %417 : vector<16x128xf32>
      %419 = vector.extract_strided_slice %402 {offsets = [2, 0], sizes = [16, 128], strides = [1, 1]} : vector<44x128xf32> to vector<16x128xf32>
      %420 = vector.broadcast %204 : f32 to vector<16x128xf32>
      %421 = arith.mulf %420, %419 : vector<16x128xf32>
      %422 = arith.addf %418, %421 : vector<16x128xf32>
      %423 = vector.extract_strided_slice %402 {offsets = [24, 0], sizes = [16, 128], strides = [1, 1]} : vector<44x128xf32> to vector<16x128xf32>
      %424 = vector.broadcast %253 : f32 to vector<16x128xf32>
      %425 = arith.mulf %424, %423 : vector<16x128xf32>
      %426 = arith.addf %422, %425 : vector<16x128xf32>
      %427 = vector.extract_strided_slice %402 {offsets = [3, 0], sizes = [16, 128], strides = [1, 1]} : vector<44x128xf32> to vector<16x128xf32>
      %428 = vector.broadcast %211 : f32 to vector<16x128xf32>
      %429 = arith.mulf %428, %427 : vector<16x128xf32>
      %430 = arith.addf %426, %429 : vector<16x128xf32>
      %431 = vector.extract_strided_slice %402 {offsets = [25, 0], sizes = [16, 128], strides = [1, 1]} : vector<44x128xf32> to vector<16x128xf32>
      %432 = vector.broadcast %260 : f32 to vector<16x128xf32>
      %433 = arith.mulf %432, %431 : vector<16x128xf32>
      %434 = arith.addf %430, %433 : vector<16x128xf32>
      %435 = vector.extract_strided_slice %402 {offsets = [4, 0], sizes = [16, 128], strides = [1, 1]} : vector<44x128xf32> to vector<16x128xf32>
      %436 = vector.broadcast %218 : f32 to vector<16x128xf32>
      %437 = arith.mulf %436, %435 : vector<16x128xf32>
      %438 = arith.addf %434, %437 : vector<16x128xf32>
      %439 = vector.extract_strided_slice %402 {offsets = [26, 0], sizes = [16, 128], strides = [1, 1]} : vector<44x128xf32> to vector<16x128xf32>
      %440 = vector.broadcast %267 : f32 to vector<16x128xf32>
      %441 = arith.mulf %440, %439 : vector<16x128xf32>
      %442 = arith.addf %438, %441 : vector<16x128xf32>
      %443 = vector.extract_strided_slice %402 {offsets = [5, 0], sizes = [16, 128], strides = [1, 1]} : vector<44x128xf32> to vector<16x128xf32>
      %444 = vector.broadcast %225 : f32 to vector<16x128xf32>
      %445 = arith.mulf %444, %443 : vector<16x128xf32>
      %446 = arith.addf %442, %445 : vector<16x128xf32>
      %447 = vector.extract_strided_slice %402 {offsets = [27, 0], sizes = [16, 128], strides = [1, 1]} : vector<44x128xf32> to vector<16x128xf32>
      %448 = vector.broadcast %274 : f32 to vector<16x128xf32>
      %449 = arith.mulf %448, %447 : vector<16x128xf32>
      %450 = arith.addf %446, %449 : vector<16x128xf32>
      %451 = vector.extract_strided_slice %402 {offsets = [6, 0], sizes = [16, 128], strides = [1, 1]} : vector<44x128xf32> to vector<16x128xf32>
      %452 = vector.broadcast %232 : f32 to vector<16x128xf32>
      %453 = arith.mulf %452, %451 : vector<16x128xf32>
      %454 = arith.addf %450, %453 : vector<16x128xf32>
      %455 = vector.extract_strided_slice %402 {offsets = [28, 0], sizes = [16, 128], strides = [1, 1]} : vector<44x128xf32> to vector<16x128xf32>
      %456 = vector.broadcast %281 : f32 to vector<16x128xf32>
      %457 = arith.mulf %456, %455 : vector<16x128xf32>
      %458 = arith.addf %454, %457 : vector<16x128xf32>
      %459 = vector.extract_strided_slice %286 {offsets = [0, 0], sizes = [16, 128], strides = [1, 1]} : vector<44x128xf32> to vector<16x128xf32>
      %460 = vector.broadcast %191 : f32 to vector<16x128xf32>
      %461 = arith.mulf %460, %459 : vector<16x128xf32>
      %462 = arith.addf %458, %461 : vector<16x128xf32>
      %463 = vector.extract_strided_slice %286 {offsets = [22, 0], sizes = [16, 128], strides = [1, 1]} : vector<44x128xf32> to vector<16x128xf32>
      %464 = vector.broadcast %240 : f32 to vector<16x128xf32>
      %465 = arith.mulf %464, %463 : vector<16x128xf32>
      %466 = arith.addf %462, %465 : vector<16x128xf32>
      %467 = vector.extract_strided_slice %286 {offsets = [1, 0], sizes = [16, 128], strides = [1, 1]} : vector<44x128xf32> to vector<16x128xf32>
      %468 = vector.broadcast %198 : f32 to vector<16x128xf32>
      %469 = arith.mulf %468, %467 : vector<16x128xf32>
      %470 = arith.addf %466, %469 : vector<16x128xf32>
      %471 = vector.extract_strided_slice %286 {offsets = [23, 0], sizes = [16, 128], strides = [1, 1]} : vector<44x128xf32> to vector<16x128xf32>
      %472 = vector.broadcast %247 : f32 to vector<16x128xf32>
      %473 = arith.mulf %472, %471 : vector<16x128xf32>
      %474 = arith.addf %470, %473 : vector<16x128xf32>
      %475 = vector.extract_strided_slice %286 {offsets = [2, 0], sizes = [16, 128], strides = [1, 1]} : vector<44x128xf32> to vector<16x128xf32>
      %476 = vector.broadcast %205 : f32 to vector<16x128xf32>
      %477 = arith.mulf %476, %475 : vector<16x128xf32>
      %478 = arith.addf %474, %477 : vector<16x128xf32>
      %479 = vector.extract_strided_slice %286 {offsets = [24, 0], sizes = [16, 128], strides = [1, 1]} : vector<44x128xf32> to vector<16x128xf32>
      %480 = vector.broadcast %254 : f32 to vector<16x128xf32>
      %481 = arith.mulf %480, %479 : vector<16x128xf32>
      %482 = arith.addf %478, %481 : vector<16x128xf32>
      %483 = vector.extract_strided_slice %286 {offsets = [3, 0], sizes = [16, 128], strides = [1, 1]} : vector<44x128xf32> to vector<16x128xf32>
      %484 = vector.broadcast %212 : f32 to vector<16x128xf32>
      %485 = arith.mulf %484, %483 : vector<16x128xf32>
      %486 = arith.addf %482, %485 : vector<16x128xf32>
      %487 = vector.extract_strided_slice %286 {offsets = [25, 0], sizes = [16, 128], strides = [1, 1]} : vector<44x128xf32> to vector<16x128xf32>
      %488 = vector.broadcast %261 : f32 to vector<16x128xf32>
      %489 = arith.mulf %488, %487 : vector<16x128xf32>
      %490 = arith.addf %486, %489 : vector<16x128xf32>
      %491 = vector.extract_strided_slice %286 {offsets = [4, 0], sizes = [16, 128], strides = [1, 1]} : vector<44x128xf32> to vector<16x128xf32>
      %492 = vector.broadcast %219 : f32 to vector<16x128xf32>
      %493 = arith.mulf %492, %491 : vector<16x128xf32>
      %494 = arith.addf %490, %493 : vector<16x128xf32>
      %495 = vector.extract_strided_slice %286 {offsets = [26, 0], sizes = [16, 128], strides = [1, 1]} : vector<44x128xf32> to vector<16x128xf32>
      %496 = vector.broadcast %268 : f32 to vector<16x128xf32>
      %497 = arith.mulf %496, %495 : vector<16x128xf32>
      %498 = arith.addf %494, %497 : vector<16x128xf32>
      %499 = vector.extract_strided_slice %286 {offsets = [5, 0], sizes = [16, 128], strides = [1, 1]} : vector<44x128xf32> to vector<16x128xf32>
      %500 = vector.broadcast %226 : f32 to vector<16x128xf32>
      %501 = arith.mulf %500, %499 : vector<16x128xf32>
      %502 = arith.addf %498, %501 : vector<16x128xf32>
      %503 = vector.extract_strided_slice %286 {offsets = [27, 0], sizes = [16, 128], strides = [1, 1]} : vector<44x128xf32> to vector<16x128xf32>
      %504 = vector.broadcast %275 : f32 to vector<16x128xf32>
      %505 = arith.mulf %504, %503 : vector<16x128xf32>
      %506 = arith.addf %502, %505 : vector<16x128xf32>
      %507 = vector.extract_strided_slice %286 {offsets = [6, 0], sizes = [16, 128], strides = [1, 1]} : vector<44x128xf32> to vector<16x128xf32>
      %508 = vector.broadcast %233 : f32 to vector<16x128xf32>
      %509 = arith.mulf %508, %507 : vector<16x128xf32>
      %510 = arith.addf %506, %509 : vector<16x128xf32>
      %511 = vector.extract_strided_slice %286 {offsets = [28, 0], sizes = [16, 128], strides = [1, 1]} : vector<44x128xf32> to vector<16x128xf32>
      %512 = vector.broadcast %282 : f32 to vector<16x128xf32>
      %513 = arith.mulf %512, %511 : vector<16x128xf32>
      %514 = arith.addf %510, %513 : vector<16x128xf32>
      %c127_i32 = arith.constant 127 : i32
      %515 = tpu.dynamic_rotate %286 by %c127_i32 dim 1 : vector<44x128xf32>, i32 -> vector<44x128xf32>
      %516 = vector.extract_strided_slice %515 {offsets = [0, 0], sizes = [16, 128], strides = [1, 1]} : vector<44x128xf32> to vector<16x128xf32>
      %517 = vector.broadcast %192 : f32 to vector<16x128xf32>
      %518 = arith.mulf %517, %516 : vector<16x128xf32>
      %519 = arith.addf %514, %518 : vector<16x128xf32>
      %520 = vector.extract_strided_slice %515 {offsets = [22, 0], sizes = [16, 128], strides = [1, 1]} : vector<44x128xf32> to vector<16x128xf32>
      %521 = vector.broadcast %241 : f32 to vector<16x128xf32>
      %522 = arith.mulf %521, %520 : vector<16x128xf32>
      %523 = arith.addf %519, %522 : vector<16x128xf32>
      %524 = vector.extract_strided_slice %515 {offsets = [1, 0], sizes = [16, 128], strides = [1, 1]} : vector<44x128xf32> to vector<16x128xf32>
      %525 = vector.broadcast %199 : f32 to vector<16x128xf32>
      %526 = arith.mulf %525, %524 : vector<16x128xf32>
      %527 = arith.addf %523, %526 : vector<16x128xf32>
      %528 = vector.extract_strided_slice %515 {offsets = [23, 0], sizes = [16, 128], strides = [1, 1]} : vector<44x128xf32> to vector<16x128xf32>
      %529 = vector.broadcast %248 : f32 to vector<16x128xf32>
      %530 = arith.mulf %529, %528 : vector<16x128xf32>
      %531 = arith.addf %527, %530 : vector<16x128xf32>
      %532 = vector.extract_strided_slice %515 {offsets = [2, 0], sizes = [16, 128], strides = [1, 1]} : vector<44x128xf32> to vector<16x128xf32>
      %533 = vector.broadcast %206 : f32 to vector<16x128xf32>
      %534 = arith.mulf %533, %532 : vector<16x128xf32>
      %535 = arith.addf %531, %534 : vector<16x128xf32>
      %536 = vector.extract_strided_slice %515 {offsets = [24, 0], sizes = [16, 128], strides = [1, 1]} : vector<44x128xf32> to vector<16x128xf32>
      %537 = vector.broadcast %255 : f32 to vector<16x128xf32>
      %538 = arith.mulf %537, %536 : vector<16x128xf32>
      %539 = arith.addf %535, %538 : vector<16x128xf32>
      %540 = vector.extract_strided_slice %515 {offsets = [3, 0], sizes = [16, 128], strides = [1, 1]} : vector<44x128xf32> to vector<16x128xf32>
      %541 = vector.broadcast %213 : f32 to vector<16x128xf32>
      %542 = arith.mulf %541, %540 : vector<16x128xf32>
      %543 = arith.addf %539, %542 : vector<16x128xf32>
      %544 = vector.extract_strided_slice %515 {offsets = [25, 0], sizes = [16, 128], strides = [1, 1]} : vector<44x128xf32> to vector<16x128xf32>
      %545 = vector.broadcast %262 : f32 to vector<16x128xf32>
      %546 = arith.mulf %545, %544 : vector<16x128xf32>
      %547 = arith.addf %543, %546 : vector<16x128xf32>
      %548 = vector.extract_strided_slice %515 {offsets = [4, 0], sizes = [16, 128], strides = [1, 1]} : vector<44x128xf32> to vector<16x128xf32>
      %549 = vector.broadcast %220 : f32 to vector<16x128xf32>
      %550 = arith.mulf %549, %548 : vector<16x128xf32>
      %551 = arith.addf %547, %550 : vector<16x128xf32>
      %552 = vector.extract_strided_slice %515 {offsets = [26, 0], sizes = [16, 128], strides = [1, 1]} : vector<44x128xf32> to vector<16x128xf32>
      %553 = vector.broadcast %269 : f32 to vector<16x128xf32>
      %554 = arith.mulf %553, %552 : vector<16x128xf32>
      %555 = arith.addf %551, %554 : vector<16x128xf32>
      %556 = vector.extract_strided_slice %515 {offsets = [5, 0], sizes = [16, 128], strides = [1, 1]} : vector<44x128xf32> to vector<16x128xf32>
      %557 = vector.broadcast %227 : f32 to vector<16x128xf32>
      %558 = arith.mulf %557, %556 : vector<16x128xf32>
      %559 = arith.addf %555, %558 : vector<16x128xf32>
      %560 = vector.extract_strided_slice %515 {offsets = [27, 0], sizes = [16, 128], strides = [1, 1]} : vector<44x128xf32> to vector<16x128xf32>
      %561 = vector.broadcast %276 : f32 to vector<16x128xf32>
      %562 = arith.mulf %561, %560 : vector<16x128xf32>
      %563 = arith.addf %559, %562 : vector<16x128xf32>
      %564 = vector.extract_strided_slice %515 {offsets = [6, 0], sizes = [16, 128], strides = [1, 1]} : vector<44x128xf32> to vector<16x128xf32>
      %565 = vector.broadcast %234 : f32 to vector<16x128xf32>
      %566 = arith.mulf %565, %564 : vector<16x128xf32>
      %567 = arith.addf %563, %566 : vector<16x128xf32>
      %568 = vector.extract_strided_slice %515 {offsets = [28, 0], sizes = [16, 128], strides = [1, 1]} : vector<44x128xf32> to vector<16x128xf32>
      %569 = vector.broadcast %283 : f32 to vector<16x128xf32>
      %570 = arith.mulf %569, %568 : vector<16x128xf32>
      %571 = arith.addf %567, %570 : vector<16x128xf32>
      %c126_i32 = arith.constant 126 : i32
      %572 = tpu.dynamic_rotate %286 by %c126_i32 dim 1 : vector<44x128xf32>, i32 -> vector<44x128xf32>
      %573 = vector.extract_strided_slice %572 {offsets = [0, 0], sizes = [16, 128], strides = [1, 1]} : vector<44x128xf32> to vector<16x128xf32>
      %574 = vector.broadcast %193 : f32 to vector<16x128xf32>
      %575 = arith.mulf %574, %573 : vector<16x128xf32>
      %576 = arith.addf %571, %575 : vector<16x128xf32>
      %577 = vector.extract_strided_slice %572 {offsets = [22, 0], sizes = [16, 128], strides = [1, 1]} : vector<44x128xf32> to vector<16x128xf32>
      %578 = vector.broadcast %242 : f32 to vector<16x128xf32>
      %579 = arith.mulf %578, %577 : vector<16x128xf32>
      %580 = arith.addf %576, %579 : vector<16x128xf32>
      %581 = vector.extract_strided_slice %572 {offsets = [1, 0], sizes = [16, 128], strides = [1, 1]} : vector<44x128xf32> to vector<16x128xf32>
      %582 = vector.broadcast %200 : f32 to vector<16x128xf32>
      %583 = arith.mulf %582, %581 : vector<16x128xf32>
      %584 = arith.addf %580, %583 : vector<16x128xf32>
      %585 = vector.extract_strided_slice %572 {offsets = [23, 0], sizes = [16, 128], strides = [1, 1]} : vector<44x128xf32> to vector<16x128xf32>
      %586 = vector.broadcast %249 : f32 to vector<16x128xf32>
      %587 = arith.mulf %586, %585 : vector<16x128xf32>
      %588 = arith.addf %584, %587 : vector<16x128xf32>
      %589 = vector.extract_strided_slice %572 {offsets = [2, 0], sizes = [16, 128], strides = [1, 1]} : vector<44x128xf32> to vector<16x128xf32>
      %590 = vector.broadcast %207 : f32 to vector<16x128xf32>
      %591 = arith.mulf %590, %589 : vector<16x128xf32>
      %592 = arith.addf %588, %591 : vector<16x128xf32>
      %593 = vector.extract_strided_slice %572 {offsets = [24, 0], sizes = [16, 128], strides = [1, 1]} : vector<44x128xf32> to vector<16x128xf32>
      %594 = vector.broadcast %256 : f32 to vector<16x128xf32>
      %595 = arith.mulf %594, %593 : vector<16x128xf32>
      %596 = arith.addf %592, %595 : vector<16x128xf32>
      %597 = vector.extract_strided_slice %572 {offsets = [3, 0], sizes = [16, 128], strides = [1, 1]} : vector<44x128xf32> to vector<16x128xf32>
      %598 = vector.broadcast %214 : f32 to vector<16x128xf32>
      %599 = arith.mulf %598, %597 : vector<16x128xf32>
      %600 = arith.addf %596, %599 : vector<16x128xf32>
      %601 = vector.extract_strided_slice %572 {offsets = [25, 0], sizes = [16, 128], strides = [1, 1]} : vector<44x128xf32> to vector<16x128xf32>
      %602 = vector.broadcast %263 : f32 to vector<16x128xf32>
      %603 = arith.mulf %602, %601 : vector<16x128xf32>
      %604 = arith.addf %600, %603 : vector<16x128xf32>
      %605 = vector.extract_strided_slice %572 {offsets = [4, 0], sizes = [16, 128], strides = [1, 1]} : vector<44x128xf32> to vector<16x128xf32>
      %606 = vector.broadcast %221 : f32 to vector<16x128xf32>
      %607 = arith.mulf %606, %605 : vector<16x128xf32>
      %608 = arith.addf %604, %607 : vector<16x128xf32>
      %609 = vector.extract_strided_slice %572 {offsets = [26, 0], sizes = [16, 128], strides = [1, 1]} : vector<44x128xf32> to vector<16x128xf32>
      %610 = vector.broadcast %270 : f32 to vector<16x128xf32>
      %611 = arith.mulf %610, %609 : vector<16x128xf32>
      %612 = arith.addf %608, %611 : vector<16x128xf32>
      %613 = vector.extract_strided_slice %572 {offsets = [5, 0], sizes = [16, 128], strides = [1, 1]} : vector<44x128xf32> to vector<16x128xf32>
      %614 = vector.broadcast %228 : f32 to vector<16x128xf32>
      %615 = arith.mulf %614, %613 : vector<16x128xf32>
      %616 = arith.addf %612, %615 : vector<16x128xf32>
      %617 = vector.extract_strided_slice %572 {offsets = [27, 0], sizes = [16, 128], strides = [1, 1]} : vector<44x128xf32> to vector<16x128xf32>
      %618 = vector.broadcast %277 : f32 to vector<16x128xf32>
      %619 = arith.mulf %618, %617 : vector<16x128xf32>
      %620 = arith.addf %616, %619 : vector<16x128xf32>
      %621 = vector.extract_strided_slice %572 {offsets = [6, 0], sizes = [16, 128], strides = [1, 1]} : vector<44x128xf32> to vector<16x128xf32>
      %622 = vector.broadcast %235 : f32 to vector<16x128xf32>
      %623 = arith.mulf %622, %621 : vector<16x128xf32>
      %624 = arith.addf %620, %623 : vector<16x128xf32>
      %625 = vector.extract_strided_slice %572 {offsets = [28, 0], sizes = [16, 128], strides = [1, 1]} : vector<44x128xf32> to vector<16x128xf32>
      %626 = vector.broadcast %284 : f32 to vector<16x128xf32>
      %627 = arith.mulf %626, %625 : vector<16x128xf32>
      %628 = arith.addf %624, %627 : vector<16x128xf32>
      %c125_i32 = arith.constant 125 : i32
      %629 = tpu.dynamic_rotate %286 by %c125_i32 dim 1 : vector<44x128xf32>, i32 -> vector<44x128xf32>
      %630 = vector.extract_strided_slice %629 {offsets = [0, 0], sizes = [16, 128], strides = [1, 1]} : vector<44x128xf32> to vector<16x128xf32>
      %631 = vector.broadcast %194 : f32 to vector<16x128xf32>
      %632 = arith.mulf %631, %630 : vector<16x128xf32>
      %633 = arith.addf %628, %632 : vector<16x128xf32>
      %634 = vector.extract_strided_slice %629 {offsets = [22, 0], sizes = [16, 128], strides = [1, 1]} : vector<44x128xf32> to vector<16x128xf32>
      %635 = vector.broadcast %243 : f32 to vector<16x128xf32>
      %636 = arith.mulf %635, %634 : vector<16x128xf32>
      %637 = arith.addf %633, %636 : vector<16x128xf32>
      %638 = vector.extract_strided_slice %629 {offsets = [1, 0], sizes = [16, 128], strides = [1, 1]} : vector<44x128xf32> to vector<16x128xf32>
      %639 = vector.broadcast %201 : f32 to vector<16x128xf32>
      %640 = arith.mulf %639, %638 : vector<16x128xf32>
      %641 = arith.addf %637, %640 : vector<16x128xf32>
      %642 = vector.extract_strided_slice %629 {offsets = [23, 0], sizes = [16, 128], strides = [1, 1]} : vector<44x128xf32> to vector<16x128xf32>
      %643 = vector.broadcast %250 : f32 to vector<16x128xf32>
      %644 = arith.mulf %643, %642 : vector<16x128xf32>
      %645 = arith.addf %641, %644 : vector<16x128xf32>
      %646 = vector.extract_strided_slice %629 {offsets = [2, 0], sizes = [16, 128], strides = [1, 1]} : vector<44x128xf32> to vector<16x128xf32>
      %647 = vector.broadcast %208 : f32 to vector<16x128xf32>
      %648 = arith.mulf %647, %646 : vector<16x128xf32>
      %649 = arith.addf %645, %648 : vector<16x128xf32>
      %650 = vector.extract_strided_slice %629 {offsets = [24, 0], sizes = [16, 128], strides = [1, 1]} : vector<44x128xf32> to vector<16x128xf32>
      %651 = vector.broadcast %257 : f32 to vector<16x128xf32>
      %652 = arith.mulf %651, %650 : vector<16x128xf32>
      %653 = arith.addf %649, %652 : vector<16x128xf32>
      %654 = vector.extract_strided_slice %629 {offsets = [3, 0], sizes = [16, 128], strides = [1, 1]} : vector<44x128xf32> to vector<16x128xf32>
      %655 = vector.broadcast %215 : f32 to vector<16x128xf32>
      %656 = arith.mulf %655, %654 : vector<16x128xf32>
      %657 = arith.addf %653, %656 : vector<16x128xf32>
      %658 = vector.extract_strided_slice %629 {offsets = [25, 0], sizes = [16, 128], strides = [1, 1]} : vector<44x128xf32> to vector<16x128xf32>
      %659 = vector.broadcast %264 : f32 to vector<16x128xf32>
      %660 = arith.mulf %659, %658 : vector<16x128xf32>
      %661 = arith.addf %657, %660 : vector<16x128xf32>
      %662 = vector.extract_strided_slice %629 {offsets = [4, 0], sizes = [16, 128], strides = [1, 1]} : vector<44x128xf32> to vector<16x128xf32>
      %663 = vector.broadcast %222 : f32 to vector<16x128xf32>
      %664 = arith.mulf %663, %662 : vector<16x128xf32>
      %665 = arith.addf %661, %664 : vector<16x128xf32>
      %666 = vector.extract_strided_slice %629 {offsets = [26, 0], sizes = [16, 128], strides = [1, 1]} : vector<44x128xf32> to vector<16x128xf32>
      %667 = vector.broadcast %271 : f32 to vector<16x128xf32>
      %668 = arith.mulf %667, %666 : vector<16x128xf32>
      %669 = arith.addf %665, %668 : vector<16x128xf32>
      %670 = vector.extract_strided_slice %629 {offsets = [5, 0], sizes = [16, 128], strides = [1, 1]} : vector<44x128xf32> to vector<16x128xf32>
      %671 = vector.broadcast %229 : f32 to vector<16x128xf32>
      %672 = arith.mulf %671, %670 : vector<16x128xf32>
      %673 = arith.addf %669, %672 : vector<16x128xf32>
      %674 = vector.extract_strided_slice %629 {offsets = [27, 0], sizes = [16, 128], strides = [1, 1]} : vector<44x128xf32> to vector<16x128xf32>
      %675 = vector.broadcast %278 : f32 to vector<16x128xf32>
      %676 = arith.mulf %675, %674 : vector<16x128xf32>
      %677 = arith.addf %673, %676 : vector<16x128xf32>
      %678 = vector.extract_strided_slice %629 {offsets = [6, 0], sizes = [16, 128], strides = [1, 1]} : vector<44x128xf32> to vector<16x128xf32>
      %679 = vector.broadcast %236 : f32 to vector<16x128xf32>
      %680 = arith.mulf %679, %678 : vector<16x128xf32>
      %681 = arith.addf %677, %680 : vector<16x128xf32>
      %682 = vector.extract_strided_slice %629 {offsets = [28, 0], sizes = [16, 128], strides = [1, 1]} : vector<44x128xf32> to vector<16x128xf32>
      %683 = vector.broadcast %285 : f32 to vector<16x128xf32>
      %684 = arith.mulf %683, %682 : vector<16x128xf32>
      %685 = arith.addf %681, %684 : vector<16x128xf32>
      %cst_149 = arith.constant 0.000000e+00 : f32
      %686 = vector.broadcast %cst_149 : f32 to vector<16x128xf32>
      %687 = arith.subf %686, %685 : vector<16x128xf32>
      %688 = math.exp %687 : vector<16x128xf32>
      %cst_150 = arith.constant 1.000000e+00 : f32
      %689 = vector.broadcast %cst_150 : f32 to vector<16x128xf32>
      %690 = arith.addf %689, %688 : vector<16x128xf32>
      %691 = tpu.reciprocal %690 : vector<16x128xf32> -> vector<16x128xf32>
      %692 = vector.extract_strided_slice %691 {offsets = [0, 0], sizes = [16, 16], strides = [1, 1]} : vector<16x128xf32> to vector<16x16xf32>
      %c0_151 = arith.constant 0 : index
      %c0_152 = arith.constant 0 : index
      %c0_153 = arith.constant 0 : index
      %c0_154 = arith.constant 0 : index
      %693 = vector.load %arg4[%c0_151, %c0_152, %c0_153, %c0_154] : memref<1x1x16x16xf32, #tpu.memory_space<vmem>>, vector<1x1x16x16xf32>
      %694 = vector.shape_cast %693 : vector<1x1x16x16xf32> to vector<16x16xf32>
      %695 = vector.shape_cast %692 : vector<16x16xf32> to vector<1x1x16x16xf32>
      tpu.vector_store %arg4[%c0_151, %c0_152, %c0_153, %c0_154], %695 {strides = array<i32>} : memref<1x1x16x16xf32, #tpu.memory_space<vmem>>, vector<1x1x16x16xf32>,
    } else {
    }
    return
  }
  func.func @transform_0(%arg0: i32, %arg1: i32) -> (i32, i32, i32) {
    %c0_i32 = arith.constant 0 : i32
    %c0_i32_0 = arith.constant 0 : i32
    return %arg0, %arg1, %c0_i32 : i32, i32, i32
  }
  func.func @transform_1(%arg0: i32, %arg1: i32) -> i32 {
    %c0_i32 = arith.constant 0 : i32
    %c0_i32_0 = arith.constant 0 : i32
    return %c0_i32 : i32
  }
  func.func @transform_2(%arg0: i32, %arg1: i32) -> (i32, i32, i32, i32) {
    %c0_i32 = arith.constant 0 : i32
    %c0_i32_0 = arith.constant 0 : i32
    %c0_i32_1 = arith.constant 0 : i32
    %c0_i32_2 = arith.constant 0 : i32
    return %arg0, %c0_i32, %c0_i32_0, %c0_i32_1 : i32, i32, i32, i32
  }
}

</mosaic_0001>

<bundles_post_ra>
// kernel: tpu_custom_call.1
= control target key start
LH: loop header
LB: loop body
LE: loop exit
PB: predicated region body
PF: predicated region fallthrough
CT: control target
= control target key end

     0   :  { %s4640_s0 = inlined_call_operand.hbm [shape: f32[2,4,256], index: 0, kind: input, shape index: {}]   ;;  %s4641_s1 = inlined_call_operand.hbm [shape: f32[98], index: 1, kind: input, shape index: {}]   ;;  %s4642_s2 = inlined_call_operand.hbm [shape: f32[2,1,16,16], index: 2, kind: output, shape index: {}]  }
   0x1   :  { %4677 = sst [smem:[#allocation38_spill]] %s4640_s0 }
   0x2   :  { %7 = vsyncpa [#allocation7], 0 }
   0x3   :  { %9 = vsyncpa [#allocation7 + $0x1], 0 }
   0x4   :  { %10 = vsyncpa [#allocation9], 0 }
   0x5   :  { %11 = vsyncpa [#allocation8], 0 }
   0x6   :  { %13 = vsyncpa [#allocation8 + $0x1], 0  ;;  %s2634_s9 = smov 0   ;;  %s2636_s10 = smov 0  }
   0x7   :  { %s2638_s11 = smov 0   ;;  %s2640_s12 = smov 0  }
   0x8   :  { %s2642_s13 = smov 0   ;;  %s2644_s14 = smov 0  }
   0x9 LB: > { %s2228_s15 = sadd.s32 4294967295, %s2600_s14   ;;  %s2229_s16 = sadd.s32 4294967294, %s2600_s14   ;;  %s2600_s14 = sphi %s2644_s14, %s19_s14   ;;  %s2596_s13 = sphi %s2642_s13, %s4853_s13   ;;  %s2592_s12 = sphi %s2640_s12, %s4852_s12   ;;  %s2588_s11 = sphi %s2638_s11, %s4851_s11   ;;  %s2584_s10 = sphi %s2636_s10, %s4850_s10   ;;  %s2580_s9 = sphi %s2634_s9, %s4849_s9  }
   0xa   : > { %p53_p0 = scmp.ne.s32.totalorder %s2584_s10, %s2580_s9  ;;  %p2668_p1 = scmp.eq.s32.totalorder %s2228_s15, 0 }
   0xb   : > { %p2672_p2 = scmp.eq.s32.totalorder %s2228_s15, 1  ;;  %p104_p3 = scmp.eq.s32.totalorder %s2229_s16, 1 }
   0xc   : > { %p2678_p4 = por %p2668_p1, %p53_p0  ;;  %p2230_p5 = scmp.ge.s32.totalorder %s2600_s14, 1 }
   0xd   : > { %p2683_p6 = por %p104_p3, %p53_p0  ;;  %p111_p7 = scmp.lt.s32.totalorder %s2600_s14, 3 }
   0xe   : > { %s123_s23 = sshll.u32 %s4641_s1, 4  ;;  %s31_s25 = sadd.s32 1, %s2596_s13  ;;  %s124_s23 = int_to_ptr.hbm [resolvable:$true] %s123_s23 }
   0xf   : > { %p2691_p8 = pnand %p2230_p5, %p111_p7  ;;  %s40_s26 = sadd.s32 1, %s2588_s11 }
  0x10   : > { %p33_p12 = scmp.ge.s32.totalorder %s31_s25, 2  ;;  %s2602_s27 = smov [#allocation10]  }
  0x11   : > { %p2352_p10 = pneg %p2691_p8  ;;  %p47_p13 = scmp.ne.s32.totalorder %s2588_s11, %s2584_s10 }
  0x12   : > { %s4855_s25 = smov (%p33_p12, %s31_s25), 0  ;;  %p48_p0 = scmp.eq.s32.totalorder %s2600_s14, 0 }
  0x13   : > { %p2353_p11 = pnand %p2352_p10, %p2668_p1  ;;  %s35_s28 = ssub.s32 %s2596_s13, %s4855_s25 }
  0x14   : > { %p2365_p3 = scmp.lt.s32.totalorder %s2600_s14, 2  ;;  %p38_p5 = scmp.eq.s32.totalorder %s35_s28, 0 }
  0x15   : > { %2355 = dma.hbm_to_smem (!%p2353_p11), %s124_s23, 16, %s2602_s27, [#allocation9]  }
  0x16   : > { %p49_p7 = por %p48_p0, %p47_p13  ;;  %p2712_p9 = por %p2672_p2, %p47_p13 }
  0x17   : > { %s134_s30 = sand.u32 1, %s2588_s11   ;;  %s2342_s5 = sshll.u32 %s2596_s13, 3 }
  0x18   : > { %s2718_s3 = scalar_select %p38_p5, %s2588_s11, %s40_s26  }
  0x19   : > { %s2233_s4 = sshll.u32 %s134_s30, 3  ;;  %s4684_s0 = sld [smem:[#allocation38_spill]] }
  0x1a   : > { %s138_s15 = scalar_lea.vmem [#allocation6], %s2233_s4  ;;  %p2357_p10 = pnand %p2365_p3, %p49_p7 }
  0x1b   : > { %s149_s16 = sshll.u32 %s138_s15, 4  ;;  %s135_s18 = scalar_lea.sflag [#allocation7], %s134_s30  ;;  %s150_s16 = int_to_ptr.vmem [resolvable:$true] %s149_s16 }
  0x1d   : > { %158 = sbr.rel (%p2691_p8) target bundleno = 627 (0x273), region = 28 }
  0x1f   : > { %s145_s8 = scalar_lea.hbm %s4684_s0, %s2342_s5 }
  0x20   : > { %s147_s21 = sshll.u32 %s145_s8, 4  ;;  %s148_s21 = int_to_ptr.hbm [resolvable:$true] %s147_s21 }
  0x21   : > { %2359 = dma.hbm_to_vmem [thread:$0]  (!%p2357_p10), %s148_s21, 128, %s150_s16, %s135_s18  }
  0x22   : > { %s2729_s22 = sand.u32 1, %s2584_s10  }
  0x23   : > { %s2237_s23 = sshll.u32 %s2729_s22, 3  ;;  %s161_s26 = scalar_lea.sflag [#allocation7], %s2729_s22 }
  0x24   : > { %s164_s27 = scalar_lea.vmem [#allocation6], %s2237_s23 }
  0x25   : > { %2567 = dma.done.wait (%p2678_p4), %s161_s26, 128  }
  0x26   : > { %2569 = vsyncadd (%p2678_p4), %s161_s26, 4294967168 }
  0x27   : > { %2571 = dma.done.wait (%p2668_p1), [#allocation9], 16  }
  0x28   : > { %2573 = vsyncadd (%p2668_p1), [#allocation9], 4294967280 }
  0x29   : > { %175 = sfence }
  0x2a   : > { %v200_v0 = vld [vmem:[%s164_s27] sm:$0xff]  ;;  %vm215_vm0 = vcmask 1043456   ;;  %v259_v21 = vlaneseq  ;;  %vm256_vm1 = vcmask 1040384   ;;  %s2603_s17 = smov 16   ;;  %s2604_s19 = smov 32   ;;  %v2610_v58 = vmov 0.0  }
  0x2b   : > { %210 = vst [vmem:[#allocation1] ss:$2 sm:$0xff] %v200_v0  ;;  %s2605_s24 = smov 48   ;;  %s2606_s28 = smov 112   ;;  %vm278_vm3 = vcmask 122880   ;;  %vm610_vm4 = vcmask 1041408  }
  0x2c   : > { %vm261_vm2 = vcmp.lt.s32.totalorder %v259_v21, 256  ;;  %s2607_s30 = smov 96   ;;  %s2608_s4 = smov 80   ;;  %273 = vst [vmem:[#allocation5 + $0x10] sm:$0xff] %v2610_v58  ;;  %vm627_vm5 = vcmask 1046528   ;;  %vm660_vm6 = vcmask 1045504  }
  0x2d   : > { %s2609_s5 = smov 64   ;;  %271 = vst [vmem:[#allocation5] sm:$0xff] %v2610_v58  ;;  %s2611_s6 = smov 3   ;;  %vm682_vm7 = vcmask 1044480   ;;  %vm747_vm8 = vcmask 1042432   ;;  %vm2113_vm11 = vcmask 130048  }
  0x2e   : > { %272 = vst [vmem:[#allocation5 + $0x8] sm:$0xff] %v2610_v58  ;;  %s2612_s7 = smov 2   ;;  %s2613_s8 = smov 1  }
  0x2f   : > { %274 = vst [vmem:[#allocation5 + $0x18] sm:$0xff] %v2610_v58  ;;  %s2614_s15 = smov 127   ;;  %s2615_s16 = smov 126  }
  0x30   : > { %275 = vst [vmem:[#allocation5 + $0x20] sm:$0xff] %v2610_v58  ;;  %s2249_s21 = sld [smem:[#allocation10 + $0xa]] }
  0x31   : > { %276 = vst [vmem:[#allocation5 + $0x28] sm:$0xf] %v2610_v58  ;;  %s2256_s18 = sld [smem:[#allocation10 + $0x11]] }
  0x32   : > { %v211_v1 = vld.sshfl [vmem:[#allocation1] sm:$0xff pattern:$0x75316420]  ;;  %v212_v2 = vld.sshfl [vmem:[#allocation1 + $0x8] sm:$0xff pattern:$0x75316420] }
  0x33   : > { %v216_v3 = vsel %vm215_vm0, %v211_v1, 0.0  ;;  %v223_v4 = vsel %vm215_vm0, %v212_v2, 0.0  ;;  %234 = vst [vmem:[#allocation1] ss:$2 sm:$0xff] %v200_v0  ;;  %s2263_s23 = sld [smem:[#allocation10 + $0x18]] }
  0x34   : > { %v217_v5 = vrot.slane %v216_v3, 4  ;;  %v224_v6 = vrot.slane %v223_v4, 4  ;;  %s2270_s26 = sld [smem:[#allocation10 + $0x1f]] }
  0x35   : > { %s2291_s27 = sld [smem:[#allocation10 + $0x34]] }
  0x36   : > { %v218_v7 = vadd.f32 %v217_v5, %v216_v3  ;;  %v225_v8 = vadd.f32 %v224_v6, %v223_v4  ;;  %s2877_s0 = sld [smem:[#allocation10 + $0x3f]] }
  0x38   : > { %v219_v9 = vrot.slane %v218_v7, 2  ;;  %v226_v10 = vrot.slane %v225_v8, 2 }
  0x3a   : > { %v220_v11 = vadd.f32 %v219_v9, %v218_v7  ;;  %v227_v12 = vadd.f32 %v226_v10, %v225_v8  ;;  %v235_v13 = vld.sshfl [vmem:[#allocation1] sm:$0xff pattern:$0x75316420]  ;;  %v236_v14 = vld.sshfl [vmem:[#allocation1 + $0x8] sm:$0xff pattern:$0x75316420] }
  0x3b   : > { %v239_v15 = vsel %vm215_vm0, %v235_v13, -inf  ;;  %v246_v16 = vsel %vm215_vm0, %v236_v14, -inf }
  0x3c   : > { %v221_v17 = vrot.slane %v220_v11, 1  ;;  %v228_v18 = vrot.slane %v227_v12, 1  ;;  %v240_v19 = vrot.slane %v239_v15, 4  ;;  %v247_v20 = vrot.slane %v246_v16, 4 }
  0x3e   : > { %v222_v22 = vadd.f32 %v221_v17, %v220_v11  ;;  %v229_v23 = vadd.f32 %v228_v18, %v227_v12  ;;  %v241_v24 = vmax.f32 %v239_v15, %v240_v19  ;;  %v248_v25 = vmax.f32 %v246_v16, %v247_v20 }
  0x40   : > { %v230_v26 = vmul.f32 0.25, %v222_v22  ;;  %v231_v27 = vmul.f32 0.25, %v229_v23  ;;  %v242_v28 = vrot.slane %v241_v24, 2  ;;  %v249_v29 = vrot.slane %v248_v25, 2 }
  0x42   : > { %v243_v30 = vmax.f32 %v241_v24, %v242_v28  ;;  %v250_v31 = vmax.f32 %v248_v25, %v249_v29  ;;  %v255_v32 = vrot.slane %v231_v27, 7 }
  0x44   : > { %v244_v33 = vrot.slane %v243_v30, 1  ;;  %v251_v34 = vrot.slane %v250_v31, 1  ;;  %v257_v35 = vsel %vm256_vm1, %v230_v26, %v255_v32 }
  0x45   : > { %263 = vst.msk [vmem:[#allocation4] ss:$2 sm:$0x3] %vm261_vm2, %v257_v35 }
  0x46   : > { %v245_v36 = vmax.f32 %v243_v30, %v244_v33  ;;  %v252_v37 = vmax.f32 %v250_v31, %v251_v34 }
  0x48   : > { %v266_v38 = vrot.slane %v252_v37, 7 }
  0x4a   : > { %v267_v39 = vsel %vm256_vm1, %v245_v36, %v266_v38 }
  0x4b   : > { %270 = vst.msk [vmem:[#allocation4 + $0x1] ss:$2 sm:$0x3] %vm261_vm2, %v267_v39 }
  0x4c   : > { %v2433_v40 = vld [vmem:[#allocation4 + $0x2] ss:$0 sm:$0xff]  ;;  %v2436_v44 = vld [vmem:[#allocation4] ss:$0 sm:$0xff] }
  0x4d   : > { %v2434_v41 = vld [vmem:[#allocation4 + $0x2] ss:$0 sm:$0xff]  ;;  %471 = vrot.lane.b32.xlu0 %v2433_v40, %s2603_s17  ;;  %v2443_v45 = vld [vmem:[#allocation4] ss:$0 sm:$0xff] }
  0x4e   : > { %v2440_v42 = vld [vmem:[#allocation4 + $0x2] ss:$0 sm:$0xff]  ;;  %457 = vrot.lane.b32.xlu1 %v2434_v41, %s2604_s19  ;;  %v2448_v59 = vld [vmem:[#allocation4] ss:$0 sm:$0xff] }
  0x4f   : > { %443 = vrot.lane.b32.xlu2 %v2440_v42, %s2605_s24  ;;  %v2450_v60 = vld [vmem:[#allocation4] ss:$0 sm:$0xff]  ;;  %v2459_v0 = vld [vmem:[#allocation4 + $0x2] ss:$0 sm:$0xff] }
  0x50   : > { %v2458_v61 = vld [vmem:[#allocation4] ss:$0 sm:$0xff]  ;;  %v2454_v1 = vld [vmem:[#allocation4 + $0x2] ss:$0 sm:$0xff] }
  0x51   : > { %v2451_v62 = vld [vmem:[#allocation4] ss:$0 sm:$0xff]  ;;  %v2456_v2 = vld [vmem:[#allocation4 + $0x2] ss:$0 sm:$0xff] }
  0x52   : > { %v2435_v43 = vld [vmem:[#allocation4 + $0x1] ss:$0 sm:$0xff]  ;;  %v2442_v52 = vld [vmem:[#allocation4 + $0x3] ss:$0 sm:$0xff]  ;;  %v2453_v63 = vld [vmem:[#allocation4] ss:$0 sm:$0xff] }
  0x53   : > { %v2437_v46 = vld [vmem:[#allocation4 + $0x1] ss:$0 sm:$0xff]  ;;  %v2444_v53 = vld [vmem:[#allocation4 + $0x3] ss:$0 sm:$0xff]  ;;  %v2460_v3 = vld [vmem:[#allocation4 + $0x2] ss:$0 sm:$0xff] }
  0x54   : > { %v2438_v47 = vld [vmem:[#allocation4 + $0x1] ss:$0 sm:$0xff]  ;;  %v2452_v54 = vld [vmem:[#allocation4 + $0x3] ss:$0 sm:$0xff]  ;;  %v277_v6 = vld [vmem:[#allocation4] sm:$0x1] }
  0x55   : > { %292 = vrot.lane.b32.xlu0 %v2435_v43, %s2606_s28  ;;  %v2446_v48 = vld [vmem:[#allocation4 + $0x1] ss:$0 sm:$0xff]  ;;  %v2445_v55 = vld [vmem:[#allocation4 + $0x3] ss:$0 sm:$0xff]  ;;  %279 = vst.msk [vmem:[#allocation5 + $0x3] sm:$0x1] %vm278_vm3, %v277_v6  ;;  %v1238_v43 = vstv %s2291_s27 }
  0x56   : > { %285 = vrot.lane.b32.xlu1 %v2436_v44, %s2606_s28  ;;  %v2439_v49 = vld [vmem:[#allocation4 + $0x1] ss:$0 sm:$0xff]  ;;  %v2447_v56 = vld [vmem:[#allocation4 + $0x3] ss:$0 sm:$0xff]  ;;  %v380_v20 = vld [vmem:[#allocation4 + $0x2] sm:$0x1]  ;;  %v2865_v44 = vstv %s2249_s21 }
  0x57   : > { %299 = vrot.lane.b32.xlu2 %v2443_v45, %s2607_s30  ;;  %v2441_v50 = vld [vmem:[#allocation4 + $0x1] ss:$0 sm:$0xff]  ;;  %v2455_v57 = vld [vmem:[#allocation4 + $0x3] ss:$0 sm:$0xff]  ;;  %381 = vst.msk [vmem:[#allocation5 + $0xb] sm:$0x1] %vm278_vm3, %v380_v20 }
  0x58   : > { %v2449_v51 = vld [vmem:[#allocation4 + $0x1] ss:$0 sm:$0xff]  ;;  %v2457_v4 = vld [vmem:[#allocation4 + $0x3] ss:$0 sm:$0xff]  ;;  %s4685_s27 = smov 125   ;;  %s2892_s21 = sld [smem:[#allocation10 + $0x7]] }
  0x59   : > { %v280_v5 = vld [vmem:[#allocation4 + $0x1] sm:$0x1]  ;;  %v382_v9 = vld [vmem:[#allocation4 + $0x3] sm:$0x1] }
  0x5a   : > { %281 = vst.msk [vmem:[#allocation5 + $0x19] sm:$0x1] %vm278_vm3, %v280_v5 }
  0x5b   : > { %383 = vst.msk [vmem:[#allocation5 + $0x21] sm:$0x1] %vm278_vm3, %v382_v9 }
  0x5d   : > { %306 = vrot.lane.b32.xlu0 %v2437_v46, %s2607_s30  ;;  %v2869_v46 = vstv %s2256_s18  ;;  %s2905_s18 = sld [smem:[#allocation10 + $0xe]] }
  0x5e   : > { %320 = vrot.lane.b32.xlu1 %v2438_v47, %s2608_s4  ;;  %v2871_v47 = vstv %s2263_s23  ;;  %s2917_s23 = sld [smem:[#allocation10 + $0x15]] }
  0x5f   : > { %348 = vrot.lane.b32.xlu2 %v2446_v48, %s2605_s24 }
  0x65   : > { %376 = vrot.lane.b32.xlu0 %v2439_v49, %s2603_s17 }
  0x66   : > { %334 = vrot.lane.b32.xlu1 %v2441_v50, %s2609_s5  ;;  %v2888_v50 = vstv %s2270_s26  ;;  %s2933_s26 = sld [smem:[#allocation10 + $0x1c]] }
  0x67   : > { %362 = vrot.lane.b32.xlu2 %v2449_v51, %s2604_s19 }
  0x6d   : > { %422 = vrot.lane.b32.xlu0 %v2442_v52, %s2608_s4 }
  0x6e   : > { %394 = vrot.lane.b32.xlu1 %v2444_v53, %s2606_s28 }
  0x6f   : > { %408 = vrot.lane.b32.xlu2 %v2452_v54, %s2607_s30 }
  0x75   : > { %450 = vrot.lane.b32.xlu0 %v2445_v55, %s2605_s24 }
  0x76   : > { %436 = vrot.lane.b32.xlu1 %v2447_v56, %s2609_s5 }
  0x77   : > { %464 = vrot.lane.b32.xlu2 %v2455_v57, %s2604_s19 }
  0x7d   : > { %313 = vrot.lane.b32.xlu0 %v2448_v59, %s2608_s4 }
  0x7e   : > { %327 = vrot.lane.b32.xlu1 %v2450_v60, %s2609_s5 }
  0x7f   : > { %341 = vrot.lane.b32.xlu2 %v2458_v61, %s2605_s24  ;;  %s2284_s24 = sld [smem:[#allocation10 + $0x2d]] }
  0x85   : > { %355 = vrot.lane.b32.xlu0 %v2451_v62, %s2604_s19  ;;  %s2277_s19 = sld [smem:[#allocation10 + $0x26]]  ;;  %v2903_v55 = vstv %s2284_s24 }
  0x86   : > { %369 = vrot.lane.b32.xlu1 %v2453_v63, %s2603_s17  ;;  %s2961_s24 = sld [smem:[#allocation10 + $0x46]] }
  0x87   : > { %387 = vrot.lane.b32.xlu2 %v2459_v0, %s2606_s28  ;;  %s4643_s28 = smov 125  }
  0x8b   : > { %v2890_v51 = vstv %s2277_s19  ;;  %s2947_s19 = sld [smem:[#allocation10 + $0x2a]] }
  0x8d   : > { %401 = vrot.lane.b32.xlu0 %v2454_v1, %s2607_s30  ;;  %s2312_s30 = sld [smem:[#allocation10 + $0x49]] }
  0x8e   : > { %415 = vrot.lane.b32.xlu1 %v2456_v2, %s2608_s4  ;;  %s2319_s4 = sld [smem:[#allocation10 + $0x50]] }
  0x8f   : > { %429 = vrot.lane.b32.xlu2 %v2460_v3, %s2609_s5  ;;  %s2857_s5 = sld [smem:[#allocation10 + $0x57]] }
  0x93   : > { %v2913_v58 = vstv %s2312_s30  ;;  %s2985_s30 = sld [smem:[#allocation10 + $0x54]] }
  0x94   : > { %v2915_v59 = vstv %s2319_s4  ;;  %s2998_s4 = sld [smem:[#allocation10 + $0x5b]] }
  0x95   : > { %478 = vrot.lane.b32.xlu0 %v2457_v4, %s2603_s17  ;;  %s2298_s17 = sld [smem:[#allocation10 + $0x3b]]  ;;  %v2928_v62 = vstv %s2857_s5 }
  0x96   : > { %s3195_s5 = sld [smem:[#allocation10 + $0x32]] }
  0x9b   : > { %v1270_v45 = vstv %s2298_s17  ;;  %s2940_s17 = sld [smem:[#allocation10 + $0x23]] }
  0xa9   : > { %v444_v7 = vpop.permute.xlu2 %443 }
  0xaa   : > { %446 = vst.msk [vmem:[#allocation5 + $0x10] sm:$0x1] %vm278_vm3, %v444_v7 }
  0xb1   : > { %v300_v8 = vpop.permute.xlu2 %299 }
  0xb2   : > { %302 = vst.msk [vmem:[#allocation5 + $0x5] sm:$0x1] %vm278_vm3, %v300_v8 }
  0xb9   : > { %v349_v10 = vpop.permute.xlu2 %348 }
  0xba   : > { %351 = vst.msk [vmem:[#allocation5 + $0x1e] sm:$0x1] %vm278_vm3, %v349_v10 }
  0xbf   : > { %v472_v11 = vpop.permute.xlu0 %471 }
  0xc0   : > { %474 = vst.msk [vmem:[#allocation5 + $0x12] sm:$0x1] %vm278_vm3, %v472_v11  ;;  %v458_v12 = vpop.permute.xlu1 %457 }
  0xc1   : > { %460 = vst.msk [vmem:[#allocation5 + $0x11] sm:$0x1] %vm278_vm3, %v458_v12  ;;  %v363_v13 = vpop.permute.xlu2 %362 }
  0xc2   : > { %365 = vst.msk [vmem:[#allocation5 + $0x1f] sm:$0x1] %vm278_vm3, %v363_v13 }
  0xc7   : > { %v293_v14 = vpop.permute.xlu0 %292 }
  0xc8   : > { %v2784_v15 = vld [vmem:[#allocation5 + $0x10] sm:$0xff]  ;;  %295 = vst.msk [vmem:[#allocation5 + $0x1a] sm:$0x1] %vm278_vm3, %v293_v14  ;;  %v286_v16 = vpop.permute.xlu1 %285 }
  0xc9   : > { %288 = vst.msk [vmem:[#allocation5 + $0x4] sm:$0x1] %vm278_vm3, %v286_v16  ;;  %590 = vrot.lane.b32.xlu1 %v2784_v15, %s2611_s6  ;;  %v409_v17 = vpop.permute.xlu2 %408  ;;  %v1239_v48 = vmul.f32 %v1238_v43, %v2784_v15  ;;  %v2886_v49 = vmul.f32 %v2865_v44, %v2784_v15  ;;  %v1271_v52 = vmul.f32 %v1270_v45, %v2784_v15 }
  0xca   : > { %411 = vst.msk [vmem:[#allocation5 + $0x23] sm:$0x1] %vm278_vm3, %v409_v17  ;;  %v2897_v53 = vmul.f32 %v2869_v46, %v2784_v15  ;;  %v2901_v54 = vmul.f32 %v2871_v47, %v2784_v15  ;;  %v2921_v60 = vmul.f32 %v2888_v50, %v2784_v15  ;;  %v2925_v61 = vmul.f32 %v2890_v51, %v2784_v15 }
  0xcb   : > { %v1245_v0 = vrot.slane %v1239_v48, 6  ;;  %v2938_v2 = vmul.f32 %v2903_v55, %v2784_v15  ;;  %v1277_v3 = vrot.slane %v1271_v52, 7  ;;  %v3028_v48 = vstv %s2940_s17  ;;  %s3304_s17 = sld [smem:[#allocation10 + $0x33]] }
  0xcc   : > { %v3031_v52 = vstv %s2947_s19  ;;  %s3313_s19 = sld [smem:[#allocation10 + $0x3a]] }
  0xcf   : > { %v307_v18 = vpop.permute.xlu0 %306 }
  0xd0   : > { %309 = vst.msk [vmem:[#allocation5 + $0x1b] sm:$0x1] %vm278_vm3, %v307_v18  ;;  %v321_v19 = vpop.permute.xlu1 %320 }
  0xd1   : > { %323 = vst.msk [vmem:[#allocation5 + $0x1c] sm:$0x1] %vm278_vm3, %v321_v19  ;;  %v465_v21 = vpop.permute.xlu2 %464 }
  0xd2   : > { %467 = vst.msk [vmem:[#allocation5 + $0x27] sm:$0x1] %vm278_vm3, %v465_v21 }
  0xd7   : > { %v377_v22 = vpop.permute.xlu0 %376 }
  0xd8   : > { %379 = vst.msk [vmem:[#allocation5 + $0x20] sm:$0x1] %vm278_vm3, %v377_v22  ;;  %v335_v23 = vpop.permute.xlu1 %334 }
  0xd9   : > { %337 = vst.msk [vmem:[#allocation5 + $0x1d] sm:$0x1] %vm278_vm3, %v335_v23  ;;  %v342_v24 = vpop.permute.xlu2 %341 }
  0xda   : > { %344 = vst.msk [vmem:[#allocation5 + $0x8] sm:$0x1] %vm278_vm3, %v342_v24 }
  0xdf   : > { %v423_v25 = vpop.permute.xlu0 %422 }
  0xe0   : > { %v2798_v26 = vld [vmem:[#allocation5 + $0x18] sm:$0xff]  ;;  %425 = vst.msk [vmem:[#allocation5 + $0x24] sm:$0x1] %vm278_vm3, %v423_v25  ;;  %v395_v27 = vpop.permute.xlu1 %394 }
  0xe1   : > { %397 = vst.msk [vmem:[#allocation5 + $0x22] sm:$0x1] %vm278_vm3, %v395_v27  ;;  %592 = vrot.lane.b32.xlu2 %v2798_v26, %s2611_s6  ;;  %v388_v28 = vpop.permute.xlu2 %387  ;;  %v2908_v56 = vmul.f32 %v1238_v43, %v2798_v26  ;;  %v2911_v57 = vmul.f32 %v1270_v45, %v2798_v26  ;;  %v1324_v5 = vmul.f32 %v2913_v58, %v2798_v26 }
  0xe2   : > { %390 = vst.msk [vmem:[#allocation5 + $0xc] sm:$0x1] %vm278_vm3, %v388_v28  ;;  %v1356_v6 = vmul.f32 %v2915_v59, %v2798_v26  ;;  %v2953_v9 = vmul.f32 %v2928_v62, %v2798_v26 }
  0xe3   : > { %v1246_v7 = vrot.slane %v2908_v56, 6  ;;  %v1278_v8 = vrot.slane %v2911_v57, 7  ;;  %v1330_v20 = vrot.slane %v1324_v5, 1  ;;  %v3036_v56 = vstv %s2961_s24  ;;  %s3320_s24 = sld [smem:[#allocation10 + $0x47]] }
  0xe4   : > { %v1362_v21 = vrot.slane %v1356_v6, 2  ;;  %v1394_v25 = vrot.slane %v2953_v9, 3 }
  0xe5   : > { %v2988_v23 = vsel %vm610_vm4, %v1245_v0, %v1246_v7  ;;  %v2991_v24 = vsel %vm256_vm1, %v1277_v3, %v1278_v8 }
  0xe7   : > { %v451_v29 = vpop.permute.xlu0 %450 }
  0xe8   : > { %453 = vst.msk [vmem:[#allocation5 + $0x26] sm:$0x1] %vm278_vm3, %v451_v29  ;;  %v437_v30 = vpop.permute.xlu1 %436 }
  0xe9   : > { %439 = vst.msk [vmem:[#allocation5 + $0x25] sm:$0x1] %vm278_vm3, %v437_v30  ;;  %v430_v31 = vpop.permute.xlu2 %429 }
  0xea   : > { %432 = vst.msk [vmem:[#allocation5 + $0xf] sm:$0x1] %vm278_vm3, %v430_v31 }
  0xef   : > { %v314_v32 = vpop.permute.xlu0 %313 }
  0xf0   : > { %v2808_v33 = vld [vmem:[#allocation5 + $0x20] sm:$0xff]  ;;  %316 = vst.msk [vmem:[#allocation5 + $0x6] sm:$0x1] %vm278_vm3, %v314_v32  ;;  %v328_v34 = vpop.permute.xlu1 %327 }
  0xf1   : > { %330 = vst.msk [vmem:[#allocation5 + $0x7] sm:$0x1] %vm278_vm3, %v328_v34  ;;  %594 = vrot.lane.b32.xlu0 %v2808_v33, %s2611_s6  ;;  %v1273_v16 = vmul.f32 %v1270_v45, %v2808_v33  ;;  %v2973_v17 = vmul.f32 %v2913_v58, %v2808_v33  ;;  %v2983_v22 = vmul.f32 %v2915_v59, %v2808_v33  ;;  %v3025_v45 = vstv %s2933_s26  ;;  %s3292_s26 = sld [smem:[#allocation10 + $0x2b]] }
  0xf2   : > { %v3003_v29 = vmul.f32 %v2928_v62, %v2808_v33 }
  0xf3   : > { %v1280_v34 = vrot.slane %v1273_v16, 7 }
  0xf4   : > { %v4647_v0 = vrot.slane %v3003_v29, 3 }
  0xf5   : > { %v3051_v9 = vsel %vm256_vm1, %v1278_v8, %v1280_v34  ;;  %v3071_v8 = vstv %s2985_s30  ;;  %v3081_v34 = vstv %s2998_s4  ;;  %s3359_s30 = sld [smem:[#allocation10 + $0x4e]] }
  0xf6   : > { %4688 = vst [vmem:[#allocation17_spill] sm:$0xff] %v3051_v9  ;;  %s3365_s4 = sld [smem:[#allocation10 + $0x55]] }
  0xf7   : > { %v356_v35 = vpop.permute.xlu0 %355 }
  0xf8   : > { %v2814_v36 = vld [vmem:[#allocation5] sm:$0xff]  ;;  %358 = vst.msk [vmem:[#allocation5 + $0x9] sm:$0x1] %vm278_vm3, %v356_v35  ;;  %v370_v37 = vpop.permute.xlu1 %369  ;;  %v4645_v35 = vrot.slane %v2973_v17, 1 }
  0xf9   : > { %372 = vst.msk [vmem:[#allocation5 + $0xa] sm:$0x1] %vm278_vm3, %v370_v37  ;;  %586 = vrot.lane.b32.xlu1 %v2814_v36, %s2611_s6  ;;  %v1255_v6 = vmul.f32 %v2865_v44, %v2814_v36 }
  0xfb   : > { %v1261_v14 = vrot.slane %v1255_v6, 1 }
  0xff   : > { %v402_v38 = vpop.permute.xlu0 %401 }
 0x100   : > { %404 = vst.msk [vmem:[#allocation5 + $0xd] sm:$0x1] %vm278_vm3, %v402_v38  ;;  %v416_v39 = vpop.permute.xlu1 %415  ;;  %v3015_v38 = vstv %s2892_s21  ;;  %s3269_s21 = sld [smem:[#allocation10 + $0x16]] }
 0x101   : > { %418 = vst.msk [vmem:[#allocation5 + $0xe] sm:$0x1] %vm278_vm3, %v416_v39  ;;  %809 = vrot.lane.b32.xlu1 %v2784_v15, %s2612_s7  ;;  %v3018_v39 = vstv %s2905_s18  ;;  %s3276_s18 = sld [smem:[#allocation10 + $0x1d]] }
 0x107   : > { %v479_v40 = vpop.permute.xlu0 %478 }
 0x108   : > { %v2823_v41 = vld [vmem:[#allocation5 + $0x8] sm:$0xff]  ;;  %481 = vst.msk [vmem:[#allocation5 + $0x28] sm:$0x1] %vm278_vm3, %v479_v40  ;;  %v4646_v40 = vrot.slane %v2983_v22, 2 }
 0x109   : > { %588 = vrot.lane.b32.xlu2 %v2823_v41, %s2611_s6  ;;  %805 = vrot.lane.b32.xlu1 %v2814_v36, %s2612_s7  ;;  %v1341_v13 = vmul.f32 %v2888_v50, %v2823_v41  ;;  %v3107_v12 = vmul.f32 %v2890_v51, %v2823_v41  ;;  %v3113_v6 = vmul.f32 %v2903_v55, %v2823_v41 }
 0x10f   : > { %v2829_v42 = vld [vmem:[#allocation5 + $0x28] sm:$0xf] }
 0x110   : > { %596 = vrot.lane.b32.xlu0 %v2829_v42, %s2611_s6  ;;  %s2859_s6 = sld [smem:[#allocation10 + $0x5e]]  ;;  %v3093_v18 = vmul.f32 %v2913_v58, %v2829_v42 }
 0x111   : > { %811 = vrot.lane.b32.xlu2 %v2798_v26, %s2612_s7  ;;  %1023 = vrot.lane.b32.xlu1 %v2784_v15, %s2613_s8 }
 0x116   : > { %v2931_v63 = vstv %s2859_s6  ;;  %s3208_s6 = sld [smem:[#allocation10 + $0x39]] }
 0x117   : > { %v2957_v10 = vmul.f32 %v2931_v63, %v2798_v26  ;;  %v3007_v30 = vmul.f32 %v2931_v63, %v2808_v33 }
 0x118   : > { %813 = vrot.lane.b32.xlu0 %v2808_v33, %s2612_s7 }
 0x119   : > { %807 = vrot.lane.b32.xlu2 %v2823_v41, %s2612_s7  ;;  %1019 = vrot.lane.b32.xlu1 %v2814_v36, %s2613_s8  ;;  %v4648_v3 = vrot.slane %v3007_v30, 4 }
 0x120   : > { %815 = vrot.lane.b32.xlu0 %v2829_v42, %s2612_s7  ;;  %s2861_s7 = sld [smem:[#allocation10 + $0x42]] }
 0x121   : > { %1025 = vrot.lane.b32.xlu2 %v2798_v26, %s2613_s8  ;;  %1439 = vrot.lane.b32.xlu1 %v2784_v15, %s2614_s15 }
 0x126   : > { %v1302_v4 = vstv %s2861_s7  ;;  %s3229_s7 = sld [smem:[#allocation10 + $0x40]] }
 0x127   : > { %v2979_v19 = vmul.f32 %v1302_v4, %v2798_v26  ;;  %v3039_v57 = vmul.f32 %v1302_v4, %v2808_v33 }
 0x128   : > { %1027 = vrot.lane.b32.xlu0 %v2808_v33, %s2613_s8 }
 0x129   : > { %1021 = vrot.lane.b32.xlu2 %v2823_v41, %s2613_s8  ;;  %1435 = vrot.lane.b32.xlu1 %v2814_v36, %s2614_s15  ;;  %4686 = vst [vmem:[#allocation15_spill] sm:$0xff] %v2979_v19 }
 0x12a   : > { %4687 = vst [vmem:[#allocation16_spill] sm:$0xff] %v3039_v57 }
 0x130   : > { %1029 = vrot.lane.b32.xlu0 %v2829_v42, %s2613_s8  ;;  %s2863_s8 = sld [smem:[#allocation10 + $0x3]] }
 0x131   : > { %1441 = vrot.lane.b32.xlu2 %v2798_v26, %s2614_s15  ;;  %1653 = vrot.lane.b32.xlu1 %v2784_v15, %s2615_s16 }
 0x136   : > { %v1233_v28 = vstv %s2863_s8  ;;  %s3236_s8 = sld [smem:[#allocation10 + $0x1]] }
 0x137   : > { %v3074_v16 = vmul.f32 %v1233_v28, %v2814_v36 }
 0x138   : > { %1443 = vrot.lane.b32.xlu0 %v2808_v33, %s2614_s15 }
 0x139   : > { %1437 = vrot.lane.b32.xlu2 %v2823_v41, %s2614_s15  ;;  %1649 = vrot.lane.b32.xlu1 %v2814_v36, %s2615_s16 }
 0x13b   : > { %v593_v58 = vpop.permute.xlu2 %592  ;;  %v3109_v11 = vpop.permute.xlu1 %590 }
 0x13c   : > { %v3274_v57 = vmul.f32 %v3028_v48, %v3109_v11 }
 0x140   : > { %1445 = vrot.lane.b32.xlu0 %v2829_v42, %s2614_s15  ;;  %s2867_s15 = sld [smem:[#allocation10 + $0x31]] }
 0x141   : > { %1655 = vrot.lane.b32.xlu2 %v2798_v26, %s2615_s16  ;;  %1867 = vrot.lane.b32.xlu1 %v2784_v15, %s4643_s28  ;;  %s2873_s28 = sld [smem:[#allocation10 + $0x38]]  ;;  %v1241_v15 = vmul.f32 %v1238_v43, %v2808_v33  ;;  %v3022_v43 = vstv %s2917_s23 }
 0x142   : > { %s3289_s23 = sld [smem:[#allocation10 + $0x24]] }
 0x143   : > { %v1248_v32 = vrot.slane %v1241_v15, 6  ;;  %v3068_v15 = vsel %vm660_vm6, %v1362_v21, %v4646_v40  ;;  %v1309_v21 = vmul.f32 %v2871_v47, %v2823_v41  ;;  %v3089_v40 = vmul.f32 %v2890_v51, %v2814_v36 }
 0x144   : > { %4690 = vst [vmem:[#allocation19_spill] sm:$0xff] %v3068_v15 }
 0x145   : > { %v3046_v5 = vsel %vm610_vm4, %v1246_v7, %v1248_v32  ;;  %v1308_v7 = vmul.f32 %v2871_v47, %v2814_v36  ;;  %v1340_v32 = vmul.f32 %v2888_v50, %v2814_v36  ;;  %v1315_v51 = vrot.slane %v1309_v21, 3 }
 0x146   : > { %v2996_v27 = vstv %s2867_s15  ;;  %v1347_v21 = vrot.slane %v1341_v13, 4  ;;  %s3255_s15 = sld [smem:[#allocation10 + $0x8]] }
 0x147   : > { %v3010_v31 = vstv %s2873_s28  ;;  %v1314_v47 = vrot.slane %v1308_v7, 3  ;;  %s3145_s28 = sld [smem:[#allocation10]] }
 0x148   : > { %1657 = vrot.lane.b32.xlu0 %v2808_v33, %s2615_s16 }
 0x149   : > { %1651 = vrot.lane.b32.xlu2 %v2823_v41, %s2615_s16  ;;  %1863 = vrot.lane.b32.xlu1 %v2814_v36, %s4685_s27 }
 0x150   : > { %1659 = vrot.lane.b32.xlu0 %v2829_v42, %s2615_s16  ;;  %s2976_s16 = sld [smem:[#allocation10 + $0x4d]] }
 0x151   : > { %1869 = vrot.lane.b32.xlu2 %v2798_v26, %s4685_s27  ;;  %v1426_v26 = vrot.slane %v2957_v10, 4  ;;  %v1287_v10 = vmul.f32 %v2869_v46, %v2814_v36 }
 0x153   : > { %v1293_v37 = vrot.slane %v1287_v10, 2  ;;  %v3126_v7 = vsel %vm215_vm0, %v1426_v26, %v4648_v3  ;;  %v3141_v26 = vmul.f32 %v3010_v31, %v593_v58  ;;  %v638_v3 = vmul.f32 %v3010_v31, %v3109_v11 }
 0x154   : > { %4692 = vst [vmem:[#allocation21_spill] sm:$0xff] %v3126_v7  ;;  %v4694_v10 = vrot.slane %v2897_v53, 2  ;;  %v4697_v53 = vrot.slane %v2901_v54, 3  ;;  %v4700_v54 = vrot.slane %v2921_v60, 4 }
 0x155   : > { %v644_v15 = vrot.slane %v638_v3, 7  ;;  %v3211_v3 = vmul.f32 %v3071_v8, %v593_v58 }
 0x156   : > { %v3059_v4 = vstv %s2976_s16  ;;  %s3339_s16 = sld [smem:[#allocation10 + $0x41]] }
 0x158   : > { %1871 = vrot.lane.b32.xlu0 %v2808_v33, %s4685_s27  ;;  %v3056_v33 = vsel %vm627_vm5, %v1330_v20, %v4645_v35  ;;  %v1256_v20 = vmul.f32 %v2865_v44, %v2823_v41  ;;  %v1288_v35 = vmul.f32 %v2869_v46, %v2823_v41  ;;  %v3097_v44 = vmul.f32 %v2915_v59, %v2829_v42 }
 0x159   : > { %1865 = vrot.lane.b32.xlu2 %v2823_v41, %s4685_s27  ;;  %4689 = vst [vmem:[#allocation18_spill] sm:$0xff] %v3056_v33  ;;  %v3101_v46 = vmul.f32 %v2903_v55, %v2814_v36  ;;  %v1346_v59 = vrot.slane %v1340_v32, 4  ;;  %v3118_v36 = vsel %vm682_vm7, %v1394_v25, %v4647_v0  ;;  %v3131_v32 = vmul.f32 %v1233_v28, %v2823_v41 }
 0x15a   : > { %v1262_v1 = vrot.slane %v1256_v20, 1  ;;  %4691 = vst [vmem:[#allocation20_spill] sm:$0xff] %v3118_v36  ;;  %v1294_v50 = vrot.slane %v1288_v35, 2  ;;  %v3135_v0 = vmul.f32 %v2996_v27, %v593_v58  ;;  %v604_v35 = vmul.f32 %v2996_v27, %v3109_v11 }
 0x15b   : > { %v4693_v20 = vrot.slane %v2886_v49, 1  ;;  %v3171_v28 = vmul.f32 %v3015_v38, %v3109_v11  ;;  %v3175_v49 = vmul.f32 %v3018_v39, %v3109_v11 }
 0x15c   : > { %v3148_v41 = vsel %vm627_vm5, %v1261_v14, %v1262_v1  ;;  %v3159_v55 = vsel %vm660_vm6, %v1293_v37, %v1294_v50  ;;  %v3164_v7 = vsel %vm660_vm6, %v1294_v50, %v4694_v10  ;;  %v3167_v14 = vsel %vm682_vm7, %v1314_v47, %v1315_v51 }
 0x15d   : > { %v3156_v13 = vsel %vm627_vm5, %v1262_v1, %v4693_v20  ;;  %4695 = vst [vmem:[#allocation22_spill] sm:$0xff] %v3164_v7  ;;  %v3178_v1 = vmul.f32 %v3036_v56, %v593_v58  ;;  %v3183_v37 = vsel %vm682_vm7, %v1315_v51, %v4697_v53  ;;  %v612_v50 = vrot.slane %v3135_v0, 6 }
 0x15e   : > { %4696 = vst [vmem:[#allocation23_spill] sm:$0xff] %v3167_v14  ;;  %v611_v47 = vrot.slane %v604_v35, 6  ;;  %v3187_v10 = vmul.f32 %v3059_v4, %v593_v58  ;;  %v3190_v20 = vsel %vm215_vm0, %v1346_v59, %v1347_v21  ;;  %v3200_v51 = vsel %vm215_vm0, %v1347_v21, %v4700_v54 }
 0x15f   : > { %4698 = vst [vmem:[#allocation24_spill] sm:$0xff] %v3183_v37  ;;  %v4702_v0 = vstv %s2877_s0  ;;  %v4704_v59 = vrot.slane %v3107_v12, 5  ;;  %v4706_v21 = vrot.slane %v2938_v2, 6  ;;  %v4707_v54 = vrot.slane %v3113_v6, 6 }
 0x160   : > { %1873 = vrot.lane.b32.xlu0 %v2829_v42, %s4685_s27  ;;  %4699 = vst [vmem:[#allocation25_spill] sm:$0xff] %v3190_v20  ;;  %v3204_v35 = vmul.f32 %v4702_v0, %v593_v58  ;;  %v3233_v20 = vmul.f32 %v3081_v34, %v593_v58  ;;  %s3258_s27 = sld [smem:[#allocation10 + $0xf]] }
 0x161   : > { %4701 = vst [vmem:[#allocation26_spill] sm:$0xff] %v3200_v51  ;;  %v3225_v0 = vsel %vm610_vm4, %v4707_v54, %v4706_v21  ;;  %v3245_v21 = vmul.f32 %v3025_v45, %v3109_v11  ;;  %v598_v51 = vstv %s3145_s28  ;;  %s3375_s28 = sld [smem:[#allocation10 + $0x5c]] }
 0x162   : > { %4708 = vst [vmem:[#allocation28_spill] sm:$0xff] %v3225_v0 }
 0x163   : > { %v3151_v25 = vpop.permute.xlu0 %594  ;;  %v3206_v53 = vpop.permute.xlu2 %588 }
 0x164   : > { %v606_v33 = vmul.f32 %v2996_v27, %v3151_v25  ;;  %v4703_v27 = vrot.slane %v2925_v61, 5  ;;  %v622_v58 = vmul.f32 %v3015_v38, %v3206_v53  ;;  %v4709_v61 = vrot.slane %v3141_v26, 7 }
 0x166   : > { %v3218_v60 = vsel %vm747_vm8, %v4704_v59, %v4703_v27  ;;  %v613_v27 = vsel %vm610_vm4, %v611_v47, %v612_v50  ;;  %v3241_v59 = vmul.f32 %v3022_v43, %v3109_v11  ;;  %v614_v54 = vrot.slane %v606_v33, 6 }
 0x167   : > { %4705 = vst [vmem:[#allocation27_spill] sm:$0xff] %v3218_v60  ;;  %v646_v47 = vsel %vm256_vm1, %v644_v15, %v4709_v61  ;;  %v1390_v33 = vmul.f32 %v2928_v62, %v2829_v42  ;;  %v1422_v60 = vmul.f32 %v2931_v63, %v2829_v42  ;;  %v3282_v63 = vmul.f32 %v3031_v52, %v3109_v11 }
 0x168   : > { %v629_v14 = vrot.slane %v622_v58, 1  ;;  %v3287_v61 = vmul.f32 %v3018_v39, %v3206_v53  ;;  %v4711_v42 = vrot.slane %v2973_v17, 1  ;;  %v3434_v62 = vmul.f32 %v3071_v8, %v3151_v25 }
 0x16b   : > { %v3253_v36 = vpop.permute.xlu1 %586 }
 0x16c   : > { %v599_v2 = vmul.f32 %v598_v51, %v3253_v36  ;;  %v621_v37 = vmul.f32 %v3015_v38, %v3253_v36  ;;  %v654_v15 = vmul.f32 %v3018_v39, %v3253_v36  ;;  %v615_v38 = vsel %vm610_vm4, %v612_v50, %v614_v54 }
 0x16d   : > { %v1397_v50 = vrot.slane %v1390_v33, 3  ;;  %v1429_v54 = vrot.slane %v1422_v60, 4  ;;  %v640_v39 = vmul.f32 %v3010_v31, %v3151_v25  ;;  %v676_v33 = vmul.f32 %v3022_v43, %v3253_v36 }
 0x16e   : > { %v618_v0 = vadd.f32 %v613_v27, %v599_v2  ;;  %v628_v7 = vrot.slane %v621_v37, 1  ;;  %v600_v27 = vmul.f32 %v598_v51, %v3206_v53  ;;  %v4710_v2 = vrot.slane %v3093_v18, 1 }
 0x16f   : > { %v661_v58 = vrot.slane %v654_v15, 2  ;;  %v4713_v51 = vrot.slane %v3097_v44, 2  ;;  %v4714_v18 = vrot.slane %v2983_v22, 2  ;;  %v4716_v22 = vrot.slane %v3107_v12, 5 }
 0x170   : > { %v3299_v11 = vsel %vm627_vm5, %v4711_v42, %v4710_v2  ;;  %v630_v37 = vsel %vm627_vm5, %v628_v7, %v629_v14  ;;  %v619_v42 = vadd.f32 %v615_v38, %v600_v27  ;;  %v662_v7 = vrot.slane %v3287_v61, 2 }
 0x171   : > { %4712 = vst [vmem:[#allocation29_spill] sm:$0xff] %v3299_v11  ;;  %v3311_v17 = vsel %vm660_vm6, %v4714_v18, %v4713_v51  ;;  %v635_v2 = vadd.f32 %v630_v37, %v618_v0  ;;  %v4717_v44 = vrot.slane %v3089_v40, 5  ;;  %v4719_v15 = vrot.slane %v3113_v6, 6 }
 0x172   : > { %4715 = vst [vmem:[#allocation30_spill] sm:$0xff] %v3311_v17  ;;  %v4720_v38 = vrot.slane %v3101_v46, 6  ;;  %v3337_v27 = vstv %s3195_s5  ;;  %v4722_v12 = vrot.slane %v3003_v29, 3  ;;  %v4724_v51 = vrot.slane %v3007_v30, 4  ;;  %s3641_s5 = sld [smem:[#allocation10 + $0x9]] }
 0x173   : > { %v3327_v0 = vsel %vm747_vm8, %v4717_v44, %v4716_v22  ;;  %v651_v37 = vadd.f32 %v646_v47, %v635_v2  ;;  %v647_v46 = vrot.slane %v640_v39, 7  ;;  %v4726_v18 = vrot.slane %v3171_v28, 1 }
 0x174   : > { %4718 = vst [vmem:[#allocation31_spill] sm:$0xff] %v3327_v0  ;;  %v3334_v61 = vsel %vm610_vm4, %v4720_v38, %v4719_v15  ;;  %v3344_v40 = vsel %vm682_vm7, %v4722_v12, %v1397_v50  ;;  %v3349_v6 = vsel %vm215_vm0, %v4724_v51, %v1429_v54  ;;  %v3356_v2 = vmul.f32 %v3022_v43, %v3206_v53 }
 0x175   : > { %4721 = vst [vmem:[#allocation32_spill] sm:$0xff] %v3334_v61  ;;  %v632_v47 = vsel %vm627_vm5, %v629_v14, %v4726_v18  ;;  %v663_v29 = vsel %vm660_vm6, %v661_v58, %v662_v7  ;;  %v3362_v50 = vstv %s3208_s6  ;;  %v683_v28 = vrot.slane %v676_v33, 3  ;;  %s3646_s6 = sld [smem:[#allocation10 + $0x10]] }
 0x176   : > { %4723 = vst [vmem:[#allocation33_spill] sm:$0xff] %v3344_v40  ;;  %v636_v30 = vadd.f32 %v632_v47, %v619_v42  ;;  %v668_v39 = vadd.f32 %v663_v29, %v651_v37  ;;  %v3369_v22 = vstv %s3255_s15  ;;  %v3373_v43 = vmul.f32 %v3036_v56, %v3151_v25  ;;  %s3667_s15 = sld [smem:[#allocation10 + $0x25]] }
 0x177   : > { %4725 = vst [vmem:[#allocation34_spill] sm:$0xff] %v3349_v6  ;;  %v3378_v58 = vstv %s3258_s27  ;;  %v3381_v42 = vstv %s3269_s21  ;;  %v3384_v44 = vstv %s3276_s18  ;;  %v3387_v15 = vstv %s3289_s23  ;;  %s3672_s27 = sld [smem:[#allocation10 + $0x2c]] }
 0x178   : > { %v4727_v33 = vrot.slane %v3141_v26, 7  ;;  %v684_v37 = vrot.slane %v3356_v2, 3  ;;  %v709_v12 = vmul.f32 %v3025_v45, %v3253_v36  ;;  %v673_v51 = vadd.f32 %v3204_v35, %v668_v39  ;;  %s3713_s21 = sld [smem:[#allocation10 + $0x35]] }
 0x179   : > { %v3397_v18 = vstv %s3292_s26  ;;  %v3400_v47 = vstv %s3304_s17  ;;  %v3403_v29 = vstv %s3313_s19  ;;  %v710_v26 = vmul.f32 %v3025_v45, %v3206_v53  ;;  %s3724_s18 = sld [smem:[#allocation10 + $0x3c]] }
 0x17a   : > { %v648_v38 = vsel %vm256_vm1, %v4727_v33, %v647_v46  ;;  %v700_v46 = vrot.slane %v3373_v43, 1  ;;  %v3410_v2 = vmul.f32 %v3059_v4, %v3151_v25  ;;  %v685_v35 = vsel %vm682_vm7, %v683_v28, %v684_v37  ;;  %v3417_v33 = vpop.permute.xlu2 %811  ;;  %s3745_s23 = sld [smem:[#allocation10 + $0x43]] }
 0x17b   : > { %v652_v31 = vadd.f32 %v648_v38, %v636_v30  ;;  %v3415_v39 = vmul.f32 %v3028_v48, %v3206_v53  ;;  %v690_v38 = vadd.f32 %v685_v35, %v673_v51  ;;  %v3421_v45 = vstv %s3320_s24  ;;  %s3753_s26 = sld [smem:[#allocation10 + $0x48]] }
 0x17c   : > { %v3425_v43 = vmul.f32 %v3031_v52, %v3206_v53  ;;  %v715_v60 = vrot.slane %v709_v12, 4  ;;  %v741_v28 = vmul.f32 %v3028_v48, %v3253_v36  ;;  %v4728_v14 = vrot.slane %v3175_v49, 2  ;;  %v3442_v53 = vpop.permute.xlu1 %809  ;;  %s3764_s17 = sld [smem:[#allocation10 + $0x4f]] }
 0x17d   : > { %v3437_v51 = vstv %s3359_s30  ;;  %v3440_v35 = vstv %s3365_s4  ;;  %v716_v6 = vrot.slane %v710_v26, 4  ;;  %v4729_v12 = vrot.slane %v3178_v1, 1  ;;  %s3773_s19 = sld [smem:[#allocation10 + $0x56]] }
 0x17e   : > { %v665_v54 = vsel %vm660_vm6, %v662_v7, %v4728_v14  ;;  %v732_v49 = vrot.slane %v3410_v2, 2  ;;  %v3449_v40 = vstv %s3375_s28  ;;  %v4730_v7 = vstv %s2877_s0  ;;  %s3543_s0 = sld [smem:[#allocation10 + $0x2]] }
 0x17f   : > { %v669_v30 = vadd.f32 %v665_v54, %v652_v31  ;;  %v701_v48 = vsel %vm627_vm5, %v4729_v12, %v700_v46  ;;  %v672_v14 = vmul.f32 %v4730_v7, %v3151_v25  ;;  %v749_v31 = vrot.slane %v3415_v39, 5  ;;  %s3801_s24 = sld [smem:[#allocation10 + $0x5d]] }
 0x180   : > { %v3457_v54 = vmul.f32 %v3081_v34, %v3151_v25  ;;  %v706_v26 = vadd.f32 %v701_v48, %v690_v38  ;;  %v748_v17 = vrot.slane %v741_v28, 5  ;;  %v774_v1 = vmul.f32 %v3031_v52, %v3253_v36  ;;  %s3835_s30 = sld [smem:[#allocation10 + $0xb]] }
 0x181   : > { %v717_v2 = vsel %vm215_vm0, %v715_v60, %v716_v6  ;;  %v3465_v12 = vmul.f32 %v3337_v27, %v3417_v33  ;;  %v765_v39 = vrot.slane %v3434_v62, 3  ;;  %v674_v0 = vadd.f32 %v672_v14, %v669_v30  ;;  %s3839_s4 = sld [smem:[#allocation10 + $0x12]] }
 0x182   : > { %v597_v7 = vpop.permute.xlu0 %596  ;;  %v722_v25 = vadd.f32 %v717_v2, %v706_v26  ;;  %v4731_v38 = vrot.slane %v3187_v10, 2  ;;  %v4732_v28 = vrot.slane %v3241_v59, 3  ;;  %v3478_v60 = vmul.f32 %v3362_v50, %v3417_v33  ;;  %s3846_s28 = sld [smem:[#allocation10 + $0x19]] }
 0x183   : > { %v695_v52 = vmul.f32 %v3036_v56, %v597_v7  ;;  %v727_v36 = vmul.f32 %v3059_v4, %v597_v7  ;;  %v4733_v30 = vrot.slane %v3245_v21, 4  ;;  %v4734_v26 = vstv %s3229_s7 }
 0x184   : > { %v733_v48 = vsel %vm660_vm6, %v4731_v38, %v732_v49  ;;  %v687_v61 = vsel %vm682_vm7, %v684_v37, %v4732_v28  ;;  %v3487_v59 = vmul.f32 %v4734_v26, %v3417_v33  ;;  %v780_v37 = vrot.slane %v774_v1, 6  ;;  %v808_v38 = vpop.permute.xlu2 %807 }
 0x185   : > { %v719_v10 = vsel %vm215_vm0, %v716_v6, %v4733_v30  ;;  %v738_v14 = vadd.f32 %v733_v48, %v722_v25  ;;  %v702_v56 = vrot.slane %v695_v52, 1  ;;  %v750_v4 = vsel %vm747_vm8, %v748_v17, %v749_v31 }
 0x186   : > { %v4735_v28 = vrot.slane %v3211_v3, 3  ;;  %v691_v21 = vadd.f32 %v687_v61, %v674_v0  ;;  %v823_v6 = vmul.f32 %v3337_v27, %v3442_v53  ;;  %v734_v48 = vrot.slane %v727_v36, 2 }
 0x187   : > { %v755_v11 = vadd.f32 %v750_v4, %v738_v14  ;;  %v703_v25 = vsel %vm627_vm5, %v700_v46, %v702_v56  ;;  %v760_v1 = vmul.f32 %v3071_v8, %v597_v7  ;;  %v4736_v17 = vrot.slane %v3457_v54, 4  ;;  %v3512_v8 = vpop.permute.xlu1 %805 }
 0x188   : > { %v766_v62 = vsel %vm682_vm7, %v4735_v28, %v765_v39  ;;  %v4737_v30 = vrot.slane %v3233_v20, 4  ;;  %v707_v26 = vadd.f32 %v703_v25, %v691_v21  ;;  %v4738_v61 = vstv %s3236_s8  ;;  %s3662_s8 = sld [smem:[#allocation10 + $0x1e]] }
 0x189   : > { %v771_v0 = vadd.f32 %v766_v62, %v755_v11  ;;  %v819_v14 = vmul.f32 %v4738_v61, %v808_v38  ;;  %v3507_v4 = vmul.f32 %v3369_v22, %v808_v38  ;;  %v3510_v46 = vmul.f32 %v3378_v58, %v808_v38 }
 0x18a   : > { %v798_v3 = vsel %vm215_vm0, %v4737_v30, %v4736_v17  ;;  %v4739_v36 = vrot.slane %v3425_v43, 6  ;;  %v3518_v20 = vmul.f32 %v3381_v42, %v808_v38  ;;  %v3521_v28 = vmul.f32 %v3384_v44, %v808_v38  ;;  %v3530_v19 = vpop.permute.xlu0 %813 }
 0x18b   : > { %v723_v11 = vadd.f32 %v719_v10, %v707_v26  ;;  %v829_v21 = vrot.slane %v823_v6, 6  ;;  %v735_v25 = vsel %vm660_vm6, %v732_v49, %v734_v48  ;;  %v767_v17 = vrot.slane %v760_v1, 3 }
 0x18c   : > { %v782_v56 = vsel %vm610_vm4, %v780_v37, %v4739_v36  ;;  %v792_v30 = vmul.f32 %v3081_v34, %v597_v7  ;;  %v818_v52 = vmul.f32 %v4738_v61, %v3512_v8  ;;  %v839_v37 = vmul.f32 %v3369_v22, %v3512_v8 }
 0x18d   : > { %v787_v62 = vadd.f32 %v782_v56, %v771_v0  ;;  %v739_v36 = vadd.f32 %v735_v25, %v723_v11  ;;  %v3533_v9 = vmul.f32 %v3387_v15, %v808_v38  ;;  %v3536_v10 = vmul.f32 %v3397_v18, %v808_v38 }
 0x18e   : > { %v855_v49 = vmul.f32 %v3362_v50, %v3442_v53  ;;  %v4740_v34 = vrot.slane %v3274_v57, 5  ;;  %v846_v6 = vrot.slane %v3507_v4, 1  ;;  %v878_v48 = vrot.slane %v3510_v46, 2 }
 0x18f   : > { %v803_v2 = vadd.f32 %v798_v3, %v787_v62  ;;  %v899_v26 = vrot.slane %v3518_v20, 3  ;;  %v768_v38 = vsel %vm682_vm7, %v765_v39, %v767_v17  ;;  %v799_v0 = vrot.slane %v792_v30, 4 }
 0x190   : > { %v752_v7 = vsel %vm747_vm8, %v749_v31, %v4740_v34  ;;  %v825_v56 = vmul.f32 %v3337_v27, %v3530_v19  ;;  %v841_v57 = vmul.f32 %v3369_v22, %v3442_v53  ;;  %v845_v31 = vrot.slane %v839_v37, 1  ;;  %v3573_v34 = vpop.permute.xlu2 %1025 }
 0x191   : > { %v756_v1 = vadd.f32 %v752_v7, %v739_v36  ;;  %v820_v3 = vadd.f32 %v818_v52, %v803_v2  ;;  %v4741_v62 = vrot.slane %v3465_v12, 6  ;;  %v861_v46 = vrot.slane %v855_v49, 7 }
 0x192   : > { %v873_v2 = vmul.f32 %v3378_v58, %v3442_v53  ;;  %v4742_v52 = vrot.slane %v3282_v63, 6  ;;  %v4743_v39 = vrot.slane %v3425_v43, 6  ;;  %v931_v17 = vrot.slane %v3521_v28, 4 }
 0x193   : > { %v772_v11 = vadd.f32 %v768_v38, %v756_v1  ;;  %v831_v4 = vsel %vm610_vm4, %v829_v21, %v4741_v62  ;;  %v963_v22 = vrot.slane %v3533_v9, 5  ;;  %v871_v30 = vmul.f32 %v3378_v58, %v3512_v8 }
 0x194   : > { %v784_v25 = vsel %vm610_vm4, %v4743_v39, %v4742_v52  ;;  %v836_v27 = vadd.f32 %v831_v4, %v820_v3  ;;  %v995_v61 = vrot.slane %v3536_v10, 6  ;;  %v4744_v37 = vrot.slane %v3457_v54, 4 }
 0x195   : > { %v788_v21 = vadd.f32 %v784_v25, %v772_v11  ;;  %v832_v36 = vrot.slane %v825_v56, 6  ;;  %v857_v43 = vmul.f32 %v3362_v50, %v3530_v19  ;;  %v848_v49 = vrot.slane %v841_v57, 1 }
 0x196   : > { %v800_v63 = vsel %vm215_vm0, %v4744_v37, %v799_v0  ;;  %v847_v7 = vsel %vm627_vm5, %v845_v31, %v846_v6  ;;  %v892_v58 = vmul.f32 %v3381_v42, %v3512_v8  ;;  %v4745_v3 = vrot.slane %v3478_v60, 7  ;;  %v3610_v37 = vpop.permute.xlu0 %815 }
 0x197   : > { %v804_v1 = vadd.f32 %v800_v63, %v788_v21  ;;  %v880_v38 = vrot.slane %v873_v2, 2  ;;  %v852_v0 = vadd.f32 %v847_v7, %v836_v27  ;;  %v1031_v56 = vstv %s3543_s0  ;;  %s3852_s0 = sld [smem:[#allocation10 + $0x20]] }
 0x198   : > { %v863_v54 = vsel %vm256_vm1, %v861_v46, %v4745_v3  ;;  %v877_v11 = vrot.slane %v871_v30, 2  ;;  %v924_v50 = vmul.f32 %v3384_v44, %v3512_v8  ;;  %v3586_v57 = vmul.f32 %v3387_v15, %v3512_v8 }
 0x199   : > { %v821_v31 = vadd.f32 %v819_v14, %v804_v1  ;;  %v3590_v62 = vmul.f32 %v3400_v47, %v3573_v34  ;;  %v3594_v4 = vmul.f32 %v3403_v29, %v3573_v34  ;;  %v4746_v46 = vrot.slane %v3465_v12, 6 }
 0x19a   : > { %v864_v52 = vrot.slane %v857_v43, 7  ;;  %v4747_v39 = vstv %s3339_s16  ;;  %v898_v27 = vrot.slane %v892_v58, 3  ;;  %v909_v30 = vmul.f32 %v3421_v45, %v3530_v19 }
 0x19b   : > { %v833_v2 = vsel %vm610_vm4, %v4746_v46, %v832_v36  ;;  %v3602_v25 = vmul.f32 %v4747_v39, %v3573_v34  ;;  %v3608_v21 = vmul.f32 %v3397_v18, %v3512_v8  ;;  %v849_v12 = vsel %vm627_vm5, %v846_v6, %v848_v49 }
 0x19c   : > { %v837_v14 = vadd.f32 %v833_v2, %v821_v31  ;;  %v868_v63 = vadd.f32 %v863_v54, %v852_v0  ;;  %v894_v36 = vmul.f32 %v3381_v42, %v3442_v53  ;;  %v879_v43 = vsel %vm660_vm6, %v877_v11, %v878_v48 }
 0x19d   : > { %v930_v7 = vrot.slane %v924_v50, 4  ;;  %v962_v58 = vrot.slane %v3586_v57, 5  ;;  %v865_v31 = vsel %vm256_vm1, %v4745_v3, %v864_v52  ;;  %v4748_v8 = vstv %s3229_s7  ;;  %s3655_s7 = sld [smem:[#allocation10 + $0x17]] }
 0x19e   : > { %v853_v1 = vadd.f32 %v849_v12, %v837_v14  ;;  %v888_v46 = vmul.f32 %v4748_v8, %v3530_v19  ;;  %v884_v2 = vadd.f32 %v879_v43, %v868_v63  ;;  %v908_v6 = vmul.f32 %v3421_v45, %v3417_v33 }
 0x19f   : > { %v915_v49 = vrot.slane %v909_v30, 1  ;;  %v941_v42 = vmul.f32 %v3437_v51, %v3530_v19  ;;  %v910_v0 = vmul.f32 %v3421_v45, %v3610_v37  ;;  %v881_v11 = vsel %vm660_vm6, %v878_v48, %v880_v38 }
 0x1a0   : > { %v869_v54 = vadd.f32 %v865_v31, %v853_v1  ;;  %v889_v60 = vadd.f32 %v3487_v59, %v884_v2  ;;  %v901_v50 = vrot.slane %v894_v36, 3  ;;  %v926_v57 = vmul.f32 %v3384_v44, %v3442_v53  ;;  %v3648_v36 = vpop.permute.xlu1 %1023 }
 0x1a1   : > { %v900_v39 = vsel %vm682_vm7, %v898_v27, %v899_v26  ;;  %v914_v14 = vrot.slane %v908_v6, 1  ;;  %v940_v30 = vmul.f32 %v3437_v51, %v3417_v33  ;;  %v994_v12 = vrot.slane %v3608_v21, 6 }
 0x1a2   : > { %v885_v52 = vadd.f32 %v881_v11, %v869_v54  ;;  %v905_v45 = vadd.f32 %v900_v39, %v889_v60  ;;  %v917_v63 = vrot.slane %v910_v0, 1  ;;  %v942_v59 = vmul.f32 %v3437_v51, %v3610_v37 }
 0x1a3   : > { %v947_v48 = vrot.slane %v941_v42, 2  ;;  %v973_v44 = vmul.f32 %v3440_v35, %v3530_v19  ;;  %v916_v27 = vsel %vm627_vm5, %v914_v14, %v915_v49  ;;  %v902_v21 = vsel %vm682_vm7, %v899_v26, %v901_v50 }
 0x1a4   : > { %v890_v38 = vadd.f32 %v888_v46, %v885_v52  ;;  %v921_v43 = vadd.f32 %v916_v27, %v905_v45  ;;  %v933_v1 = vrot.slane %v926_v57, 4  ;;  %v958_v51 = vmul.f32 %v3387_v15, %v3442_v53 }
 0x1a5   : > { %v932_v31 = vsel %vm215_vm0, %v930_v7, %v931_v17  ;;  %v946_v8 = vrot.slane %v940_v30, 2  ;;  %v972_v46 = vmul.f32 %v3440_v35, %v3417_v33  ;;  %v918_v20 = vsel %vm627_vm5, %v915_v49, %v917_v63 }
 0x1a6   : > { %v906_v3 = vadd.f32 %v902_v21, %v890_v38  ;;  %v937_v26 = vadd.f32 %v932_v31, %v921_v43  ;;  %v949_v2 = vrot.slane %v942_v59, 2  ;;  %v974_v15 = vmul.f32 %v3440_v35, %v3610_v37  ;;  %v1022_v21 = vpop.permute.xlu2 %1021 }
 0x1a7   : > { %v979_v6 = vrot.slane %v973_v44, 3  ;;  %v1005_v42 = vmul.f32 %v3449_v40, %v3530_v19  ;;  %v948_v54 = vsel %vm660_vm6, %v946_v8, %v947_v48  ;;  %v934_v49 = vsel %vm215_vm0, %v931_v17, %v933_v1 }
 0x1a8   : > { %v922_v7 = vadd.f32 %v918_v20, %v906_v3  ;;  %v953_v0 = vadd.f32 %v948_v54, %v937_v26  ;;  %v965_v11 = vrot.slane %v958_v51, 5  ;;  %v990_v35 = vmul.f32 %v3397_v18, %v3442_v53  ;;  %v1020_v9 = vpop.permute.xlu1 %1019  ;;  %v3718_v20 = vpop.permute.xlu0 %1027 }
 0x1a9   : > { %v964_v19 = vsel %vm747_vm8, %v962_v58, %v963_v22  ;;  %v978_v50 = vrot.slane %v972_v46, 3  ;;  %v1004_v57 = vmul.f32 %v3449_v40, %v3417_v33  ;;  %v1044_v28 = vrot.slane %v3590_v62, 6 }
 0x1aa   : > { %v938_v60 = vadd.f32 %v934_v49, %v922_v7  ;;  %v950_v17 = vsel %vm660_vm6, %v947_v48, %v949_v2  ;;  %v969_v52 = vadd.f32 %v964_v19, %v953_v0  ;;  %v981_v39 = vrot.slane %v974_v15, 3 }
 0x1ab   : > { %v1011_v14 = vrot.slane %v1005_v42, 4  ;;  %v980_v18 = vsel %vm682_vm7, %v978_v50, %v979_v6  ;;  %v1006_v53 = vmul.f32 %v3449_v40, %v3610_v37  ;;  %v1052_v58 = vstv %s3641_s5  ;;  %s3856_s5 = sld [smem:[#allocation10 + $0x27]] }
 0x1ac   : > { %v954_v30 = vadd.f32 %v950_v17, %v938_v60  ;;  %v966_v33 = vsel %vm747_vm8, %v963_v22, %v965_v11  ;;  %v985_v45 = vadd.f32 %v980_v18, %v969_v52  ;;  %v997_v63 = vrot.slane %v990_v35, 6 }
 0x1ad   : > { %v1084_v59 = vstv %s3646_s6  ;;  %v996_v44 = vsel %vm610_vm4, %v994_v12, %v995_v61  ;;  %v1010_v38 = vrot.slane %v1004_v57, 4  ;;  %v3698_v27 = vstv %s3655_s7  ;;  %s3860_s6 = sld [smem:[#allocation10 + $0x2e]] }
 0x1ae   : > { %v970_v48 = vadd.f32 %v966_v33, %v954_v30  ;;  %v1037_v40 = vmul.f32 %v3400_v47, %v3648_v36  ;;  %v982_v22 = vsel %vm682_vm7, %v979_v6, %v981_v39  ;;  %v1001_v37 = vadd.f32 %v996_v44, %v985_v45  ;;  %s3892_s7 = sld [smem:[#allocation10 + $0x36]] }
 0x1af   : > { %v3704_v43 = vstv %s3662_s8  ;;  %v1012_v51 = vsel %vm215_vm0, %v1010_v38, %v1011_v14  ;;  %v1013_v3 = vrot.slane %v1006_v53, 4  ;;  %v3708_v31 = vstv %s3667_s15  ;;  %s3902_s8 = sld [smem:[#allocation10 + $0x3d]] }
 0x1b0   : > { %v986_v1 = vadd.f32 %v982_v22, %v970_v48  ;;  %v3711_v12 = vstv %s3672_s27  ;;  %v998_v8 = vsel %vm610_vm4, %v995_v61, %v997_v63  ;;  %v1017_v46 = vadd.f32 %v1012_v51, %v1001_v37  ;;  %v3775_v22 = vpop.permute.xlu2 %1441  ;;  %s3928_s15 = sld [smem:[#allocation10 + $0x44]] }
 0x1b1   : > { %v3720_v26 = vmul.f32 %v1052_v58, %v1022_v21  ;;  %v3722_v2 = vmul.f32 %v1084_v59, %v1022_v21  ;;  %v1032_v15 = vmul.f32 %v1031_v56, %v1020_v9  ;;  %v3729_v42 = vmul.f32 %v3698_v27, %v1022_v21  ;;  %s3952_s27 = sld [smem:[#allocation10 + $0x5]] }
 0x1b2   : > { %v1002_v6 = vadd.f32 %v998_v8, %v986_v1  ;;  %v3732_v10 = vmul.f32 %v3704_v43, %v1022_v21  ;;  %v1043_v61 = vrot.slane %v1037_v40, 6  ;;  %v1053_v7 = vmul.f32 %v1052_v58, %v1020_v9 }
 0x1b3   : > { %v3735_v54 = vmul.f32 %v3708_v31, %v1022_v21  ;;  %v1014_v49 = vsel %vm215_vm0, %v1011_v14, %v1013_v3  ;;  %v1034_v0 = vadd.f32 %v1032_v15, %v1017_v46  ;;  %v1039_v11 = vmul.f32 %v3400_v47, %v3718_v20 }
 0x1b4   : > { %v1076_v35 = vrot.slane %v3594_v4, 7  ;;  %v1033_v60 = vmul.f32 %v1031_v56, %v1022_v21  ;;  %v1069_v19 = vmul.f32 %v3403_v29, %v3648_v36  ;;  %v1018_v50 = vadd.f32 %v1014_v49, %v1002_v6 }
 0x1b5   : > { %v1060_v57 = vrot.slane %v3720_v26, 1  ;;  %v1092_v17 = vrot.slane %v3722_v2, 2  ;;  %v3750_v52 = vmul.f32 %v3711_v12, %v1022_v21  ;;  %v1055_v39 = vmul.f32 %v1052_v58, %v3648_v36 }
 0x1b6   : > { %v1113_v47 = vrot.slane %v3729_v42, 3  ;;  %v1145_v56 = vrot.slane %v3732_v10, 4  ;;  %v1059_v4 = vrot.slane %v1053_v7, 1  ;;  %v1045_v14 = vsel %vm610_vm4, %v1043_v61, %v1044_v28 }
 0x1b7   : > { %v1177_v30 = vrot.slane %v3735_v54, 5  ;;  %v1085_v18 = vmul.f32 %v1084_v59, %v1020_v9  ;;  %v1050_v53 = vadd.f32 %v1045_v14, %v1034_v0  ;;  %v1046_v33 = vrot.slane %v1039_v11, 6 }
 0x1b8   : > { %v1075_v45 = vrot.slane %v1069_v19, 7  ;;  %v1087_v58 = vmul.f32 %v1084_v59, %v3648_v36  ;;  %v1035_v63 = vadd.f32 %v1033_v60, %v1018_v50  ;;  %v1071_v48 = vmul.f32 %v3403_v29, %v3718_v20  ;;  %v3809_v50 = vpop.permute.xlu0 %1029 }
 0x1b9   : > { %v1209_v44 = vrot.slane %v3750_v52, 6  ;;  %v1062_v38 = vrot.slane %v1055_v39, 1  ;;  %v3768_v21 = vstv %s3713_s21  ;;  %v3771_v40 = vstv %s3724_s18  ;;  %s3960_s21 = sld [smem:[#allocation10 + $0xc]] }
 0x1ba   : > { %v1061_v59 = vsel %vm627_vm5, %v1059_v4, %v1060_v57  ;;  %v1106_v37 = vmul.f32 %v3698_v27, %v1020_v9  ;;  %v3780_v29 = vmul.f32 %v3704_v43, %v1020_v9  ;;  %v3783_v1 = vmul.f32 %v3708_v31, %v1020_v9  ;;  %s3973_s18 = sld [smem:[#allocation10 + $0x13]] }
 0x1bb   : > { %v1091_v51 = vrot.slane %v1085_v18, 2  ;;  %v3786_v3 = vmul.f32 %v3711_v12, %v1020_v9  ;;  %v1066_v8 = vadd.f32 %v1061_v59, %v1050_v53  ;;  %v1047_v46 = vsel %vm610_vm4, %v1044_v28, %v1046_v33 }
 0x1bc   : > { %v1077_v26 = vsel %vm256_vm1, %v1075_v45, %v1076_v35  ;;  %v1094_v2 = vrot.slane %v1087_v58, 2  ;;  %v1051_v15 = vadd.f32 %v1047_v46, %v1035_v63  ;;  %v1078_v6 = vrot.slane %v1071_v48, 7 }
 0x1bd   : > { %v4655_v61 = vstv %s3745_s23  ;;  %v3795_v7 = vmul.f32 %v3768_v21, %v3775_v22  ;;  %v3799_v9 = vmul.f32 %v3771_v40, %v3775_v22  ;;  %v1121_v62 = vstv %s3753_s26  ;;  %s3980_s26 = sld [smem:[#allocation10 + $0x1a]] }
 0x1be   : > { %v1112_v28 = vrot.slane %v1106_v37, 3  ;;  %v1144_v49 = vrot.slane %v3780_v29, 4  ;;  %v1176_v0 = vrot.slane %v3783_v1, 5  ;;  %v1123_v11 = vmul.f32 %v1121_v62, %v3718_v20 }
 0x1bf   : > { %v1093_v60 = vsel %vm660_vm6, %v1091_v51, %v1092_v17  ;;  %v1208_v19 = vrot.slane %v3786_v3, 6  ;;  %v1063_v39 = vsel %vm627_vm5, %v1060_v57, %v1062_v38  ;;  %v1082_v4 = vadd.f32 %v1077_v26, %v1066_v8 }
 0x1c0   : > { %v1079_v14 = vsel %vm256_vm1, %v1076_v35, %v1078_v6  ;;  %v4749_v18 = vstv %s3339_s16  ;;  %v1153_v33 = vstv %s3764_s17  ;;  %v1067_v45 = vadd.f32 %v1063_v39, %v1051_v15  ;;  %s3831_s16 = sld [smem:[#allocation10 + $0x4]] }
 0x1c1   : > { %v1102_v53 = vmul.f32 %v4749_v18, %v3718_v20  ;;  %v1155_v58 = vmul.f32 %v1153_v33, %v3718_v20  ;;  %v1185_v63 = vstv %s3773_s19  ;;  %v1098_v48 = vadd.f32 %v1093_v60, %v1082_v4  ;;  %s3986_s17 = sld [smem:[#allocation10 + $0x21]] }
 0x1c2   : > { %v1108_v59 = vmul.f32 %v3698_v27, %v3648_v36  ;;  %v1129_v37 = vrot.slane %v1123_v11, 1  ;;  %v1083_v29 = vadd.f32 %v1079_v14, %v1067_v45  ;;  %v1122_v57 = vmul.f32 %v1121_v62, %v3573_v34  ;;  %s3998_s19 = sld [smem:[#allocation10 + $0x28]] }
 0x1c3   : > { %v1124_v38 = vmul.f32 %v1121_v62, %v3809_v50  ;;  %v1095_v35 = vsel %vm660_vm6, %v1092_v17, %v1094_v2  ;;  %v1103_v51 = vadd.f32 %v3602_v25, %v1098_v48  ;;  %v1140_v46 = vmul.f32 %v3704_v43, %v3648_v36 }
 0x1c4   : > { %v1115_v8 = vrot.slane %v1108_v59, 3  ;;  %v1099_v26 = vadd.f32 %v1095_v35, %v1083_v29  ;;  %v1114_v15 = vsel %vm682_vm7, %v1112_v28, %v1113_v47  ;;  %v1128_v27 = vrot.slane %v1122_v57, 1 }
 0x1c5   : > { %v1154_v6 = vmul.f32 %v1153_v33, %v3573_v34  ;;  %v1217_v11 = vstv %s3801_s24  ;;  %v1119_v62 = vadd.f32 %v1114_v15, %v1103_v51  ;;  %v1131_v60 = vrot.slane %v1124_v38, 1  ;;  %s4004_s24 = sld [smem:[#allocation10 + $0x2f]] }
 0x1c6   : > { %v1156_v17 = vmul.f32 %v1153_v33, %v3809_v50  ;;  %v1161_v25 = vrot.slane %v1155_v58, 2  ;;  %v1187_v43 = vmul.f32 %v1185_v63, %v3718_v20  ;;  %v1104_v2 = vadd.f32 %v1102_v53, %v1099_v26 }
 0x1c7   : > { %v1130_v39 = vsel %vm627_vm5, %v1128_v27, %v1129_v37  ;;  %v1116_v28 = vsel %vm682_vm7, %v1113_v47, %v1115_v8  ;;  %v1147_v14 = vrot.slane %v1140_v46, 4  ;;  %v1172_v18 = vmul.f32 %v3708_v31, %v3648_v36  ;;  %v3880_v27 = vpop.permute.xlu1 %1439 }
 0x1c8   : > { %v1135_v4 = vadd.f32 %v1130_v39, %v1119_v62  ;;  %v1120_v33 = vadd.f32 %v1116_v28, %v1104_v2  ;;  %v1146_v53 = vsel %vm215_vm0, %v1144_v49, %v1145_v56  ;;  %v1160_v45 = vrot.slane %v1154_v6, 2 }
 0x1c9   : > { %v1186_v58 = vmul.f32 %v1185_v63, %v3573_v34  ;;  %v1132_v42 = vsel %vm627_vm5, %v1129_v37, %v1131_v60  ;;  %v1163_v48 = vrot.slane %v1156_v17, 2  ;;  %v1188_v59 = vmul.f32 %v1185_v63, %v3809_v50 }
 0x1ca   : > { %v1151_v47 = vadd.f32 %v1146_v53, %v1135_v4  ;;  %v1193_v31 = vrot.slane %v1187_v43, 3  ;;  %v1219_v29 = vmul.f32 %v1217_v11, %v3718_v20  ;;  %v1136_v57 = vadd.f32 %v1132_v42, %v1120_v33 }
 0x1cb   : > { %v1162_v49 = vsel %vm660_vm6, %v1160_v45, %v1161_v25  ;;  %v1148_v38 = vsel %vm215_vm0, %v1145_v56, %v1147_v14  ;;  %v1179_v35 = vrot.slane %v1172_v18, 5  ;;  %v1204_v63 = vmul.f32 %v3711_v12, %v3648_v36  ;;  %v1438_v12 = vpop.permute.xlu2 %1437 }
 0x1cc   : > { %v1167_v37 = vadd.f32 %v1162_v49, %v1151_v47  ;;  %v1152_v51 = vadd.f32 %v1148_v38, %v1136_v57  ;;  %v1178_v20 = vsel %vm747_vm8, %v1176_v0, %v1177_v30  ;;  %v1192_v8 = vrot.slane %v1186_v58, 3 }
 0x1cd   : > { %v1218_v46 = vmul.f32 %v1217_v11, %v3573_v34  ;;  %v1164_v10 = vsel %vm660_vm6, %v1161_v25, %v1163_v48  ;;  %v1195_v26 = vrot.slane %v1188_v59, 3  ;;  %v1220_v15 = vmul.f32 %v1217_v11, %v3809_v50 }
 0x1ce   : > { %v1183_v56 = vadd.f32 %v1178_v20, %v1167_v37  ;;  %v3878_v36 = vmul.f32 %v4655_v61, %v3775_v22  ;;  %v1225_v1 = vrot.slane %v1219_v29, 4  ;;  %v1168_v0 = vadd.f32 %v1164_v10, %v1152_v51  ;;  %v4775_v61 = vld [vmem:[#allocation27_spill] sm:$0xff] }
 0x1cf   : > { %v1194_v6 = vsel %vm682_vm7, %v1192_v8, %v1193_v31  ;;  %v3884_v34 = vstv %s3835_s30  ;;  %v1180_v50 = vsel %vm747_vm8, %v1177_v30, %v1179_v35  ;;  %v1211_v62 = vrot.slane %v1204_v63, 6  ;;  %s4076_s30 = sld [smem:[#allocation10 + $0x3e]] }
 0x1d0   : > { %v1199_v11 = vadd.f32 %v1194_v6, %v1183_v56  ;;  %v3890_v60 = vstv %s3839_s4  ;;  %v1184_v17 = vadd.f32 %v1180_v50, %v1168_v0  ;;  %v1210_v25 = vsel %vm610_vm4, %v1208_v19, %v1209_v44  ;;  %s4100_s4 = sld [smem:[#allocation10 + $0x45]] }
 0x1d1   : > { %v1224_v43 = vrot.slane %v1218_v46, 4  ;;  %v3900_v2 = vstv %s3846_s28  ;;  %v1196_v54 = vsel %vm682_vm7, %v1193_v31, %v1195_v26  ;;  %v1227_v39 = vrot.slane %v1220_v15, 4  ;;  %v1436_v46 = vpop.permute.xlu1 %1435  ;;  %s4149_s28 = sld [smem:[#allocation10 + $0x4a]] }
 0x1d2   : > { %v1215_v30 = vadd.f32 %v1210_v25, %v1199_v11  ;;  %v1447_v28 = vstv %s3831_s16  ;;  %v3907_v4 = vstv %s3852_s0  ;;  %v1200_v14 = vadd.f32 %v1196_v54, %v1184_v17  ;;  %s4065_s16 = sld [smem:[#allocation10 + $0x37]] }
 0x1d3   : > { %v1226_v18 = vsel %vm215_vm0, %v1224_v43, %v1225_v1  ;;  %v3911_v33 = vstv %s3856_s5  ;;  %v3914_v3 = vstv %s3860_s6  ;;  %v1212_v19 = vsel %vm610_vm4, %v1209_v44, %v1211_v62  ;;  %v3957_v8 = vpop.permute.xlu2 %1655  ;;  %s4166_s0 = sld [smem:[#allocation10 + $0x51]] }
 0x1d4   : > { %v1231_v53 = vadd.f32 %v1226_v18, %v1215_v30  ;;  %v3920_v45 = vmul.f32 %v3884_v34, %v1438_v12  ;;  %v3923_v58 = vmul.f32 %v3890_v60, %v1438_v12  ;;  %v3926_v42 = vmul.f32 %v3900_v2, %v1438_v12  ;;  %4750 = vst [vmem:[#allocation35_spill] sm:$0xff] %v3957_v8  ;;  %v4753_v18 = vld [vmem:[#allocation17_spill] sm:$0xff]  ;;  %s4175_s5 = sld [smem:[#allocation10 + $0x58]] }
 0x1d5   : > { %v1216_v47 = vadd.f32 %v1212_v19, %v1200_v14  ;;  %v4654_v48 = vrot.slane %v3795_v7, 6  ;;  %v4653_v59 = vrot.slane %v3799_v9, 7  ;;  %v1228_v52 = vsel %vm215_vm0, %v1225_v1, %v1227_v39  ;;  %s4261_s6 = sld [smem:[#allocation10 + $0x6]] }
 0x1d6   : > { %v1236_v44 = vadd.f32 %v3074_v16, %v1231_v53  ;;  %v3936_v31 = vmul.f32 %v1447_v28, %v1438_v12  ;;  %v1453_v29 = vmul.f32 %v3768_v21, %v3880_v27  ;;  %v1485_v57 = vmul.f32 %v3771_v40, %v3880_v27  ;;  %v4755_v53 = vld [vmem:[#allocation15_spill] sm:$0xff] }
 0x1d7   : > { %v1232_v49 = vadd.f32 %v1228_v52, %v1216_v47  ;;  %v3943_v38 = vmul.f32 %v3907_v4, %v1438_v12  ;;  %v3946_v37 = vmul.f32 %v3911_v33, %v1438_v12  ;;  %v3949_v16 = vmul.f32 %v3914_v3, %v1438_v12 }
 0x1d8   : > { %v1252_v35 = vadd.f32 %v2988_v23, %v1236_v44  ;;  %v4651_v63 = vrot.slane %v3920_v45, 1  ;;  %v4650_v51 = vrot.slane %v3923_v58, 2  ;;  %v3964_v56 = vmul.f32 %v3884_v34, %v3880_v27 }
 0x1d9   : > { %v1237_v10 = vadd.f32 %v3131_v32, %v1232_v49  ;;  %v3967_v23 = vstv %s3892_s7  ;;  %v3970_v26 = vstv %s3902_s8  ;;  %v1459_v12 = vrot.slane %v1453_v29, 6  ;;  %s4268_s7 = sld [smem:[#allocation10 + $0xd]] }
 0x1da   : > { %4751 = vst [vmem:[#allocation36_spill] sm:$0xff] %v3970_v26  ;;  %v1268_v15 = vadd.f32 %v3148_v41, %v1252_v35  ;;  %v1491_v1 = vrot.slane %v1485_v57, 7  ;;  %v3977_v32 = vmul.f32 %v3890_v60, %v3880_v27  ;;  %v4649_v62 = vstv %s3928_s15  ;;  %v4756_v57 = vld [vmem:[#allocation22_spill] sm:$0xff]  ;;  %s4276_s8 = sld [smem:[#allocation10 + $0x14]] }
 0x1db   : > { %v1253_v0 = vadd.f32 %v3046_v5, %v1237_v10  ;;  %v3991_v17 = vmul.f32 %v3967_v23, %v3957_v8  ;;  %v3995_v5 = vmul.f32 %v3970_v26, %v3957_v8  ;;  %v1501_v54 = vmul.f32 %v3890_v60, %v1436_v46 }
 0x1dc   : > { %v1284_v41 = vadd.f32 %v2991_v24, %v1268_v15  ;;  %v1469_v24 = vmul.f32 %v3884_v34, %v1436_v46  ;;  %v4009_v39 = vsel %vm610_vm4, %v1459_v12, %v4654_v48  ;;  %v4024_v60 = vmul.f32 %v3900_v2, %v1436_v46  ;;  %v4757_v12 = vld [vmem:[#allocation23_spill] sm:$0xff] }
 0x1dd   : > { %4752 = vst [vmem:[#allocation37_spill] sm:$0xff] %v3991_v17  ;;  %v1269_v25 = vadd.f32 %v3156_v13, %v1253_v0  ;;  %v4014_v13 = vsel %vm256_vm1, %v1491_v1, %v4653_v59  ;;  %v4027_v19 = vmul.f32 %v3907_v4, %v1436_v46  ;;  %v4034_v29 = vmul.f32 %v1447_v28, %v1436_v46 }
 0x1de   : > { %v1300_v30 = vadd.f32 %v3159_v55, %v1284_v41  ;;  %v4021_v55 = vmul.f32 %v4649_v62, %v3957_v8  ;;  %v1475_v35 = vrot.slane %v1469_v24, 1  ;;  %v1507_v10 = vrot.slane %v1501_v54, 2  ;;  %v4758_v41 = vld [vmem:[#allocation16_spill] sm:$0xff]  ;;  %v4764_v24 = vld [vmem:[#allocation19_spill] sm:$0xff] }
 0x1df   : > { %v1285_v34 = vadd.f32 %v4753_v18, %v1269_v25  ;;  %v4038_v15 = vmul.f32 %v3911_v33, %v1436_v46  ;;  %v4042_v0 = vmul.f32 %v3914_v3, %v1436_v46  ;;  %v1682_v28 = vstv %s3960_s21  ;;  %v1652_v18 = vpop.permute.xlu2 %1651  ;;  %s4287_s21 = sld [smem:[#allocation10 + $0x22]] }
 0x1e0   : > { %4754 = vst [vmem:[#allocation17_spill] sm:$0xff] %v4021_v55  ;;  %v1305_v47 = vadd.f32 %v4755_v53, %v1300_v30  ;;  %v4047_v30 = vstv %s3973_s18  ;;  %v4760_v53 = vld [vmem:[#allocation18_spill] sm:$0xff]  ;;  %v4652_v62 = vstv %s3952_s27  ;;  %v4057_v46 = vstv %s3980_s26  ;;  %s4294_s18 = sld [smem:[#allocation10 + $0x29]] }
 0x1e1   : > { %v1301_v49 = vadd.f32 %v4756_v57, %v1285_v34  ;;  %v4049_v34 = vpop.permute.xlu1 %1653  ;;  %v4060_v52 = vstv %s3986_s17  ;;  %v4069_v50 = vstv %s4004_s24  ;;  %v4071_v6 = vmul.f32 %v1682_v28, %v1652_v18  ;;  %s4300_s26 = sld [smem:[#allocation10 + $0x30]] }
 0x1e2   : > { %v1321_v1 = vadd.f32 %v4757_v12, %v1305_v47  ;;  %4759 = vst [vmem:[#allocation15_spill] sm:$0xff] %v4049_v34  ;;  %v4761_v47 = vld [vmem:[#allocation24_spill] sm:$0xff]  ;;  %v4093_v14 = vmul.f32 %v4057_v46, %v1652_v18  ;;  %v4096_v43 = vmul.f32 %v4060_v52, %v1652_v18  ;;  %v4117_v54 = vmul.f32 %v3967_v23, %v4049_v34  ;;  %s4326_s17 = sld [smem:[#allocation10 + $0x4b]] }
 0x1e3   : > { %v1306_v25 = vadd.f32 %v4758_v41, %v1301_v49  ;;  %v4063_v49 = vstv %s3998_s19  ;;  %v4762_v41 = vld [vmem:[#allocation25_spill] sm:$0xff]  ;;  %v1699_v59 = vmul.f32 %v3970_v26, %v4049_v34  ;;  %v4130_v44 = vmul.f32 %v1682_v28, %v4049_v34  ;;  %s4355_s19 = sld [smem:[#allocation10 + $0x52]] }
 0x1e4   : > { %v1337_v57 = vadd.f32 %v4760_v53, %v1321_v1  ;;  %v4074_v1 = vmul.f32 %v4047_v30, %v1652_v18  ;;  %v4086_v53 = vsel %vm660_vm6, %v1507_v10, %v4650_v51  ;;  %4765 = vst [vmem:[#allocation22_spill] sm:$0xff] %v4093_v14  ;;  %v4767_v10 = vld [vmem:[#allocation26_spill] sm:$0xff]  ;;  %v4142_v48 = vstv %s4065_s16  ;;  %s4368_s24 = sld [smem:[#allocation10 + $0x59]] }
 0x1e5   : > { %v1322_v12 = vadd.f32 %v4761_v47, %v1306_v25  ;;  %v4081_v25 = vsel %vm627_vm5, %v1475_v35, %v4651_v63  ;;  %v4763_v47 = vld [vmem:[#allocation29_spill] sm:$0xff]  ;;  %4766 = vst [vmem:[#allocation23_spill] sm:$0xff] %v4096_v43  ;;  %v4098_v35 = vpop.permute.xlu0 %1443  ;;  %v4772_v63 = vld [vmem:[#allocation31_spill] sm:$0xff]  ;;  %v4145_v43 = vstv %s4076_s30  ;;  %s4388_s16 = sld [smem:[#allocation10 + $0x60]] }
 0x1e6   : > { %v1353_v11 = vadd.f32 %v4762_v41, %v1337_v57  ;;  %v4105_v57 = vmul.f32 %v4652_v62, %v1652_v18  ;;  %4771 = vst [vmem:[#allocation25_spill] sm:$0xff] %v4117_v54  ;;  %v4781_v54 = vld [vmem:[#allocation28_spill] sm:$0xff]  ;;  %s4498_s30 = sld [smem:[#allocation10 + $0x53]] }
 0x1e7   : > { %v1338_v41 = vadd.f32 %v4763_v47, %v1322_v12  ;;  %v4108_v12 = vmul.f32 %v4063_v49, %v1652_v18  ;;  %4776 = vst [vmem:[#allocation29_spill] sm:$0xff] %v4145_v43  ;;  %v4147_v14 = vpop.permute.xlu2 %1869 }
 0x1e8   : > { %v1369_v20 = vadd.f32 %v4764_v24, %v1353_v11  ;;  %4768 = vst [vmem:[#allocation16_spill] sm:$0xff] %v4105_v57  ;;  %v4111_v11 = vmul.f32 %v4069_v50, %v1652_v18  ;;  %v1455_v18 = vmul.f32 %v3768_v21, %v4098_v35  ;;  %v1487_v24 = vmul.f32 %v3771_v40, %v4098_v35 }
 0x1e9   : > { %v1354_v51 = vadd.f32 %v4767_v10, %v1338_v41  ;;  %4769 = vst [vmem:[#allocation18_spill] sm:$0xff] %v4108_v12  ;;  %v4773_v10 = vld [vmem:[#allocation30_spill] sm:$0xff]  ;;  %v4137_v21 = vmul.f32 %v4047_v30, %v4049_v34  ;;  %v1650_v55 = vpop.permute.xlu1 %1649  ;;  %v4780_v34 = vld [vmem:[#allocation21_spill] sm:$0xff]  ;;  %v4159_v26 = vmul.f32 %v4142_v48, %v4147_v14 }
 0x1ea   : > { %4770 = vst [vmem:[#allocation24_spill] sm:$0xff] %v4111_v11  ;;  %v1385_v41 = vadd.f32 %v4772_v63, %v1369_v20  ;;  %v4774_v63 = vld [vmem:[#allocation20_spill] sm:$0xff]  ;;  %v1462_v12 = vrot.slane %v1455_v18, 6  ;;  %v1494_v8 = vrot.slane %v1487_v24, 7  ;;  %v1683_v47 = vmul.f32 %v1682_v28, %v1650_v55 }
 0x1eb   : > { %v1370_v62 = vadd.f32 %v4773_v10, %v1354_v51  ;;  %4777 = vst [vmem:[#allocation19_spill] sm:$0xff] %v4147_v14  ;;  %v1705_v10 = vrot.slane %v1699_v59, 7  ;;  %v4779_v51 = vld [vmem:[#allocation33_spill] sm:$0xff]  ;;  %v4163_v59 = vmul.f32 %v4145_v43, %v4147_v14  ;;  %v1715_v24 = vmul.f32 %v4047_v30, %v1650_v55  ;;  %v4784_v30 = vld [vmem:[#allocation34_spill] sm:$0xff] }
 0x1ec   : > { %v1401_v20 = vadd.f32 %v4774_v63, %v1385_v41  ;;  %v4778_v41 = vld [vmem:[#allocation32_spill] sm:$0xff]  ;;  %v4782_v18 = vstv %s3745_s23  ;;  %v1689_v43 = vrot.slane %v1683_v47, 1  ;;  %s4199_s23 = sld [smem:[#allocation10 + $0x5f]] }
 0x1ed   : > { %v1386_v40 = vadd.f32 %v4775_v61, %v1370_v62  ;;  %v4674_v62 = vstv %s4100_s4 }
 0x1ee   : > { %v1417_v63 = vadd.f32 %v4778_v41, %v1401_v20  ;;  %v4173_v20 = vmul.f32 %v4057_v46, %v1650_v55  ;;  %v4785_v41 = vrot.slane %v3795_v7, 6  ;;  %v4193_v61 = vmul.f32 %v4674_v62, %v4147_v14 }
 0x1ef   : > { %v1402_v11 = vadd.f32 %v4779_v51, %v1386_v40  ;;  %v4791_v62 = vrot.slane %v3920_v45, 1  ;;  %v1601_v45 = vstv %s4175_s5  ;;  %s2239_s5 = sshll.u32 %s2729_s22, 4 }
 0x1f0   : > { %v1433_v57 = vadd.f32 %v4780_v34, %v1417_v63  ;;  %v1518_v34 = vmul.f32 %v4782_v18, %v4098_v35  ;;  %v1463_v63 = vsel %vm610_vm4, %v4785_v41, %v1462_v12  ;;  %v4786_v18 = vrot.slane %v3799_v9, 7  ;;  %4787 = vst [vmem:[#allocation26_spill] sm:$0xff] %v4193_v61 }
 0x1f1   : > { %v1418_v17 = vadd.f32 %v4781_v54, %v1402_v11  ;;  %v4783_v11 = vrot.slane %v3995_v5, 7  ;;  %v1569_v9 = vstv %s4166_s0  ;;  %s4539_s0 = sld [smem:[#allocation10 + $0x61]] }
 0x1f2   : > { %v1450_v54 = vadd.f32 %v4034_v29, %v1433_v57  ;;  %v1495_v28 = vsel %vm256_vm1, %v4786_v18, %v1494_v8  ;;  %v4788_v29 = vstv %s3952_s27  ;;  %v1721_v8 = vrot.slane %v1715_v24, 2  ;;  %s4279_s27 = sld [smem:[#allocation10 + $0x1b]] }
 0x1f3   : > { %v4181_v51 = vsel %vm256_vm1, %v1705_v10, %v4783_v11  ;;  %v1434_v40 = vadd.f32 %v4784_v30, %v1418_v17  ;;  %v4197_v57 = vmul.f32 %v4788_v29, %v1650_v55  ;;  %v4207_v11 = vmul.f32 %v4060_v52, %v1650_v55 }
 0x1f4   : > { %v1466_v17 = vadd.f32 %v4009_v39, %v1450_v54  ;;  %v1537_v30 = vstv %s4149_s28  ;;  %v4212_v39 = vmul.f32 %v4063_v49, %v1650_v55  ;;  %v4789_v24 = vrot.slane %v4071_v6, 1  ;;  %s4520_s28 = sld [smem:[#allocation10 + $0x5a]] }
 0x1f5   : > { %v1451_v7 = vadd.f32 %v3936_v31, %v1434_v40  ;;  %v4215_v31 = vmul.f32 %v4069_v50, %v1650_v55  ;;  %v1539_v54 = vmul.f32 %v1537_v30, %v4098_v35  ;;  %v1446_v40 = vpop.permute.xlu0 %1445  ;;  %v4790_v29 = vrot.slane %v3964_v56, 1 }
 0x1f6   : > { %v1482_v47 = vadd.f32 %v4081_v25, %v1466_v17  ;;  %v4221_v18 = vsel %vm627_vm5, %v1689_v43, %v4789_v24  ;;  %v1524_v55 = vmul.f32 %v3900_v2, %v3880_v27  ;;  %v4792_v17 = vrot.slane %v4074_v1, 2 }
 0x1f7   : > { %v1467_v41 = vadd.f32 %v1463_v63, %v1451_v7  ;;  %v1479_v25 = vsel %vm627_vm5, %v4791_v62, %v4790_v29  ;;  %v1538_v24 = vmul.f32 %v1537_v30, %v3775_v22  ;;  %v1571_v56 = vmul.f32 %v1569_v9, %v4098_v35 }
 0x1f8   : > { %v1498_v63 = vadd.f32 %v4014_v13, %v1482_v47  ;;  %v4234_v7 = vsel %vm660_vm6, %v1721_v8, %v4792_v17  ;;  %v1540_v62 = vmul.f32 %v1537_v30, %v1446_v40  ;;  %v1545_v29 = vrot.slane %v1539_v54, 1 }
 0x1f9   : > { %v1483_v43 = vadd.f32 %v1479_v25, %v1467_v41  ;;  %v1603_v13 = vmul.f32 %v1601_v45, %v4098_v35  ;;  %v1556_v2 = vmul.f32 %v3907_v4, %v3880_v27  ;;  %v1633_v10 = vstv %s4199_s23 }
 0x1fa   : > { %v1514_v12 = vadd.f32 %v4086_v53, %v1498_v63  ;;  %v4793_v8 = vrot.slane %v3977_v32, 2  ;;  %v4794_v41 = vrot.slane %v3923_v58, 2  ;;  %v1531_v61 = vrot.slane %v1524_v55, 3 }
 0x1fb   : > { %v1499_v47 = vadd.f32 %v1495_v28, %v1483_v43  ;;  %v4795_v53 = vrot.slane %v3926_v42, 3  ;;  %v4796_v30 = vrot.slane %v4024_v60, 3  ;;  %v1544_v54 = vrot.slane %v1538_v24, 1 }
 0x1fc   : > { %v1511_v25 = vsel %vm660_vm6, %v4794_v41, %v4793_v8  ;;  %v1519_v17 = vadd.f32 %v3878_v36, %v1514_v12  ;;  %v1570_v4 = vmul.f32 %v1569_v9, %v3775_v22  ;;  %v4258_v63 = vmul.f32 %v1633_v10, %v4098_v35 }
 0x1fd   : > { %v1515_v14 = vadd.f32 %v1511_v25, %v1499_v47  ;;  %v1530_v28 = vsel %vm682_vm7, %v4796_v30, %v4795_v53  ;;  %v1547_v58 = vrot.slane %v1540_v62, 1  ;;  %v1572_v43 = vmul.f32 %v1569_v9, %v1446_v40 }
 0x1fe   : > { %v1535_v32 = vadd.f32 %v1530_v28, %v1519_v17  ;;  %v1577_v8 = vrot.slane %v1571_v56, 2  ;;  %v1546_v36 = vsel %vm627_vm5, %v1544_v54, %v1545_v29  ;;  %v1563_v12 = vrot.slane %v1556_v2, 4 }
 0x1ff   : > { %v1520_v41 = vadd.f32 %v1518_v34, %v1515_v14  ;;  %v4797_v60 = vmov %v4795_v53  ;;  %v1588_v47 = vmul.f32 %v3911_v33, %v3880_v27  ;;  %v1604_v35 = vmul.f32 %v1601_v45, %v1446_v40 }
 0x200   : > { %v1532_v55 = vsel %vm682_vm7, %v4797_v60, %v1531_v61  ;;  %v1551_v24 = vadd.f32 %v1546_v36, %v1535_v32  ;;  %v4798_v9 = vrot.slane %v3943_v38, 4  ;;  %v4799_v14 = vrot.slane %v4027_v19, 4 }
 0x201   : > { %v1536_v62 = vadd.f32 %v1532_v55, %v1520_v41  ;;  %v1576_v56 = vrot.slane %v1570_v4, 2  ;;  %v1602_v2 = vmul.f32 %v1601_v45, %v3775_v22  ;;  %v1609_v42 = vrot.slane %v1603_v13, 3 }
 0x202   : > { %v1562_v34 = vsel %vm215_vm0, %v4799_v14, %v4798_v9  ;;  %v1548_v61 = vsel %vm627_vm5, %v1545_v29, %v1547_v58  ;;  %v1579_v33 = vrot.slane %v1572_v43, 2  ;;  %v4800_v53 = vmov %v4798_v9 }
 0x203   : > { %v1567_v25 = vadd.f32 %v1562_v34, %v1551_v24  ;;  %v1552_v17 = vadd.f32 %v1548_v61, %v1536_v62  ;;  %v1564_v30 = vsel %vm215_vm0, %v4800_v53, %v1563_v12  ;;  %v1578_v19 = vsel %vm660_vm6, %v1576_v56, %v1577_v8 }
 0x204   : > { %v1620_v28 = vmul.f32 %v3914_v3, %v3880_v27  ;;  %v4801_v13 = vrot.slane %v3946_v37, 5  ;;  %v4802_v29 = vrot.slane %v4038_v15, 5  ;;  %v1595_v4 = vrot.slane %v1588_v47, 5  ;;  %v1866_v37 = vpop.permute.xlu2 %1865 }
 0x205   : > { %v1583_v45 = vadd.f32 %v1578_v19, %v1567_v25  ;;  %v1611_v32 = vrot.slane %v1604_v35, 3  ;;  %v1568_v38 = vadd.f32 %v1564_v30, %v1552_v17  ;;  %v1608_v58 = vrot.slane %v1602_v2, 3 }
 0x206   : > { %v1594_v54 = vsel %vm747_vm8, %v4802_v29, %v4801_v13  ;;  %v1634_v43 = vmul.f32 %v1633_v10, %v3775_v22  ;;  %v1636_v41 = vmul.f32 %v1633_v10, %v1446_v40  ;;  %v1774_v27 = vrot.slane %v4207_v11, 4  ;;  %v4304_v22 = vpop.permute.xlu0 %1657 }
 0x207   : > { %v1806_v3 = vrot.slane %v4212_v39, 5  ;;  %v1580_v36 = vsel %vm660_vm6, %v1577_v8, %v1579_v33  ;;  %v1599_v12 = vadd.f32 %v1594_v54, %v1583_v45  ;;  %v1641_v15 = vrot.slane %v4258_v63, 4 }
 0x208   : > { %v1584_v60 = vadd.f32 %v1580_v36, %v1568_v38  ;;  %v1610_v55 = vsel %vm682_vm7, %v1608_v58, %v1609_v42  ;;  %v1627_v24 = vrot.slane %v1620_v28, 6  ;;  %v4803_v10 = vmov %v4801_v13  ;;  %v4807_v58 = vld [vmem:[#allocation36_spill] sm:$0xff]  ;;  %v4808_v36 = vld [vmem:[#allocation37_spill] sm:$0xff] }
 0x209   : > { %v1596_v40 = vsel %vm747_vm8, %v4803_v10, %v1595_v4  ;;  %v1612_v47 = vsel %vm682_vm7, %v1609_v42, %v1611_v32  ;;  %v1615_v8 = vadd.f32 %v1610_v55, %v1599_v12  ;;  %v4804_v35 = vrot.slane %v3949_v16, 6 }
 0x20a   : > { %v4805_v62 = vrot.slane %v4042_v0, 6  ;;  %v1600_v9 = vadd.f32 %v1596_v40, %v1584_v60  ;;  %v1640_v14 = vrot.slane %v1634_v43, 4  ;;  %v1643_v34 = vrot.slane %v1636_v41, 4 }
 0x20b   : > { %v4316_v56 = vstv %s4268_s7  ;;  %v4319_v61 = vstv %s4276_s8  ;;  %v4322_v42 = vstv %s4279_s27  ;;  %v1669_v25 = vmul.f32 %v3967_v23, %v4304_v22 }
 0x20c   : > { %v1626_v63 = vsel %vm610_vm4, %v4805_v62, %v4804_v35  ;;  %v1616_v0 = vadd.f32 %v1612_v47, %v1600_v9  ;;  %v4806_v33 = vmov %v4804_v35  ;;  %v1642_v53 = vsel %vm215_vm0, %v1640_v14, %v1641_v15  ;;  %v4812_v35 = vld [vmem:[#allocation16_spill] sm:$0xff] }
 0x20d   : > { %v1631_v2 = vadd.f32 %v1626_v63, %v1615_v8  ;;  %v1628_v17 = vsel %vm610_vm4, %v4806_v33, %v1627_v24  ;;  %v1875_v30 = vstv %s4261_s6  ;;  %v4334_v28 = vstv %s4287_s21  ;;  %s2117_s21 = scalar_lea.sflag [#allocation8], %s2729_s22 }
 0x20e   : > { %v4337_v45 = vstv %s4294_s18  ;;  %v4340_v13 = vmul.f32 %v4316_v56, %v1866_v37  ;;  %v1632_v29 = vadd.f32 %v1628_v17, %v1616_v0  ;;  %v1644_v23 = vsel %vm215_vm0, %v1641_v15, %v1643_v34  ;;  %v4810_v15 = vld [vmem:[#allocation25_spill] sm:$0xff]  ;;  %v4382_v34 = vpop.permute.xlu1 %1867 }
 0x20f   : > { %v1647_v19 = vadd.f32 %v1642_v53, %v1631_v2  ;;  %v4344_v54 = vmul.f32 %v4319_v61, %v1866_v37  ;;  %v4347_v16 = vmul.f32 %v4322_v42, %v1866_v37  ;;  %v4351_v32 = vstv %s4300_s26 }
 0x210   : > { %v1676_v38 = vrot.slane %v1669_v25, 6  ;;  %v1701_v43 = vmul.f32 %v4807_v58, %v4304_v22  ;;  %v1648_v41 = vadd.f32 %v1644_v23, %v1632_v29  ;;  %v4809_v12 = vrot.slane %v4808_v36, 6  ;;  %v1660_v23 = vpop.permute.xlu0 %1659 }
 0x211   : > { %v1664_v4 = vadd.f32 %v4197_v57, %v1647_v19  ;;  %v4811_v60 = vrot.slane %v4810_v15, 6  ;;  %v4363_v24 = vmul.f32 %v4334_v28, %v1866_v37  ;;  %v4366_v57 = vmul.f32 %v4337_v45, %v1866_v37 }
 0x212   : > { %v1838_v10 = vrot.slane %v4215_v31, 6  ;;  %v4373_v47 = vmul.f32 %v1875_v30, %v1866_v37  ;;  %v1904_v8 = vrot.slane %v4340_v13, 1  ;;  %v1665_v62 = vadd.f32 %v4812_v35, %v1648_v41  ;;  %v4816_v41 = vld [vmem:[#allocation15_spill] sm:$0xff] }
 0x213   : > { %v1675_v55 = vsel %vm610_vm4, %v4811_v60, %v4809_v12  ;;  %v1936_v63 = vrot.slane %v4344_v54, 2  ;;  %v1957_v9 = vrot.slane %v4347_v16, 3  ;;  %v4380_v14 = vmul.f32 %v4351_v32, %v1866_v37 }
 0x214   : > { %v1680_v40 = vadd.f32 %v1675_v55, %v1664_v4  ;;  %v4813_v25 = vmov %v4809_v12  ;;  %v1708_v33 = vrot.slane %v1701_v43, 7  ;;  %v1751_v17 = vstv %s4326_s17 }
 0x215   : > { %v1677_v0 = vsel %vm610_vm4, %v4813_v25, %v1676_v38  ;;  %v1753_v29 = vmul.f32 %v1751_v17, %v4304_v22  ;;  %v4814_v4 = vrot.slane %v4130_v44, 1  ;;  %v4815_v38 = vrot.slane %v4071_v6, 1 }
 0x216   : > { %v1696_v2 = vadd.f32 %v4221_v18, %v1680_v40  ;;  %v1681_v37 = vadd.f32 %v1677_v0, %v1665_v62  ;;  %v4396_v18 = vmul.f32 %v4142_v48, %v4382_v34  ;;  %v1738_v36 = vmul.f32 %v4057_v46, %v4816_v41  ;;  %v4818_v40 = vld [vmem:[#allocation35_spill] sm:$0xff] }
 0x217   : > { %v1693_v58 = vsel %vm627_vm5, %v4815_v38, %v4814_v4  ;;  %v4408_v12 = vmul.f32 %v4316_v56, %v4382_v34  ;;  %v4817_v15 = vstv %s3928_s15  ;;  %v1752_v35 = vmul.f32 %v1751_v17, %v4818_v40  ;;  %s4482_s15 = sld [smem:[#allocation10 + $0x4c]] }
 0x218   : > { %v1712_v43 = vadd.f32 %v4181_v51, %v1696_v2  ;;  %v1732_v60 = vmul.f32 %v4817_v15, %v4304_v22  ;;  %v1697_v55 = vadd.f32 %v1693_v58, %v1681_v37  ;;  %v4819_v44 = vrot.slane %v3995_v5, 7  ;;  %v4822_v15 = vld [vmem:[#allocation17_spill] sm:$0xff] }
 0x219   : > { %v1783_v62 = vstv %s4355_s19  ;;  %v1754_v2 = vmul.f32 %v1751_v17, %v1660_v23  ;;  %v1759_v46 = vrot.slane %v1753_v29, 1  ;;  %v1815_v0 = vstv %s4368_s24  ;;  %s2534_s24 = scalar_lea.hbm %s4642_s2, 32 }
 0x21a   : > { %v1709_v6 = vsel %vm256_vm1, %v4819_v44, %v1708_v33  ;;  %v1728_v51 = vadd.f32 %v4234_v7, %v1712_v43  ;;  %v1785_v25 = vmul.f32 %v1783_v62, %v4304_v22  ;;  %v4820_v38 = vrot.slane %v4137_v21, 2  ;;  %v4823_v7 = vld [vmem:[#allocation22_spill] sm:$0xff] }
 0x21b   : > { %v1713_v4 = vadd.f32 %v1709_v6, %v1697_v55  ;;  %v4821_v37 = vrot.slane %v4074_v1, 2  ;;  %v1745_v19 = vrot.slane %v1738_v36, 3  ;;  %v1770_v33 = vmul.f32 %v4060_v52, %v4816_v41 }
 0x21c   : > { %v1733_v5 = vadd.f32 %v4822_v15, %v1728_v51  ;;  %v4824_v17 = vrot.slane %v4823_v7, 3  ;;  %v4825_v29 = vrot.slane %v4173_v20, 3  ;;  %v1758_v55 = vrot.slane %v1752_v35, 1 }
 0x21d   : > { %v1725_v58 = vsel %vm660_vm6, %v4821_v37, %v4820_v38  ;;  %v1784_v21 = vmul.f32 %v1783_v62, %v4818_v40  ;;  %v1847_v6 = vstv %s4388_s16  ;;  %v1761_v53 = vrot.slane %v1754_v2, 1 }
 0x21e   : > { %v1729_v44 = vadd.f32 %v1725_v58, %v1713_v4  ;;  %v1744_v43 = vsel %vm682_vm7, %v4825_v29, %v4824_v17  ;;  %v1786_v38 = vmul.f32 %v1783_v62, %v1660_v23  ;;  %v1791_v37 = vrot.slane %v1785_v25, 2  ;;  %v4827_v29 = vld [vmem:[#allocation23_spill] sm:$0xff] }
 0x21f   : > { %v1749_v1 = vadd.f32 %v1744_v43, %v1733_v5  ;;  %v1817_v36 = vmul.f32 %v1815_v0, %v4304_v22  ;;  %v1760_v52 = vsel %vm627_vm5, %v1758_v55, %v1759_v46  ;;  %v4826_v4 = vmov %v4824_v17 }
 0x220   : > { %v1734_v51 = vadd.f32 %v1732_v60, %v1729_v44  ;;  %v1746_v58 = vsel %vm682_vm7, %v4826_v4, %v1745_v19  ;;  %v1777_v15 = vrot.slane %v1770_v33, 4  ;;  %v1802_v35 = vmul.f32 %v4063_v49, %v4816_v41 }
 0x221   : > { %v1765_v20 = vadd.f32 %v1760_v52, %v1749_v1  ;;  %v4828_v5 = vrot.slane %v4827_v29, 4  ;;  %v1790_v2 = vrot.slane %v1784_v21, 2  ;;  %v1816_v60 = vmul.f32 %v1815_v0, %v4818_v40  ;;  %v1864_v52 = vpop.permute.xlu1 %1863 }
 0x222   : > { %v1750_v17 = vadd.f32 %v1746_v58, %v1734_v51  ;;  %v1762_v25 = vsel %vm627_vm5, %v1759_v46, %v1761_v53  ;;  %v1793_v7 = vrot.slane %v1786_v38, 2  ;;  %v1818_v19 = vmul.f32 %v1815_v0, %v1660_v23  ;;  %v4830_v46 = vld [vmem:[#allocation18_spill] sm:$0xff] }
 0x223   : > { %v1776_v62 = vsel %vm215_vm0, %v1774_v27, %v4828_v5  ;;  %v1823_v43 = vrot.slane %v1817_v36, 3  ;;  %v1849_v33 = vmul.f32 %v1847_v6, %v4304_v22  ;;  %v1792_v49 = vsel %vm660_vm6, %v1790_v2, %v1791_v37  ;;  %v4834_v2 = vld [vmem:[#allocation24_spill] sm:$0xff] }
 0x224   : > { %v1781_v44 = vadd.f32 %v1776_v62, %v1765_v20  ;;  %v1766_v55 = vadd.f32 %v1762_v25, %v1750_v17  ;;  %v4829_v1 = vmov %v4828_v5  ;;  %v1809_v27 = vrot.slane %v1802_v35, 5  ;;  %v4832_v35 = vld [vmem:[#allocation29_spill] sm:$0xff]  ;;  %v4467_v5 = vpop.permute.xlu0 %1871 }
 0x225   : > { %v1778_v11 = vsel %vm215_vm0, %v4829_v1, %v1777_v15  ;;  %v1834_v21 = vmul.f32 %v4069_v50, %v4816_v41  ;;  %v4831_v38 = vrot.slane %v4830_v46, 5  ;;  %v1822_v0 = vrot.slane %v1816_v60, 3 }
 0x226   : > { %v1797_v51 = vadd.f32 %v1792_v49, %v1781_v44  ;;  %v1782_v53 = vadd.f32 %v1778_v11, %v1766_v55  ;;  %v1848_v36 = vmul.f32 %v1847_v6, %v4818_v40  ;;  %v1794_v4 = vsel %vm660_vm6, %v1791_v37, %v1793_v7 }
 0x227   : > { %v1808_v22 = vsel %vm747_vm8, %v1806_v3, %v4831_v38  ;;  %v1825_v20 = vrot.slane %v1818_v19, 3  ;;  %v1850_v15 = vmul.f32 %v1847_v6, %v1660_v23  ;;  %v1913_v17 = vmul.f32 %v4832_v35, %v4382_v34 }
 0x228   : > { %v1813_v58 = vadd.f32 %v1808_v22, %v1797_v51  ;;  %v1855_v50 = vrot.slane %v1849_v33, 4  ;;  %v1798_v41 = vadd.f32 %v1794_v4, %v1782_v53  ;;  %v1824_v29 = vsel %vm682_vm7, %v1822_v0, %v1823_v43 }
 0x229   : > { %v1897_v39 = vmul.f32 %v4316_v56, %v1864_v52  ;;  %v4833_v3 = vmov %v4831_v38  ;;  %v1841_v62 = vrot.slane %v1834_v21, 6  ;;  %v1929_v23 = vmul.f32 %v4319_v61, %v1864_v52 }
 0x22a   : > { %v1810_v40 = vsel %vm747_vm8, %v4833_v3, %v1809_v27  ;;  %v1829_v37 = vadd.f32 %v1824_v29, %v1813_v58  ;;  %v4835_v60 = vrot.slane %v4834_v2, 6  ;;  %v1854_v44 = vrot.slane %v1848_v36, 4 }
 0x22b   : > { %v1814_v6 = vadd.f32 %v1810_v40, %v1798_v41  ;;  %v1826_v7 = vsel %vm682_vm7, %v1823_v43, %v1825_v20  ;;  %v1857_v19 = vrot.slane %v1850_v15, 4  ;;  %v1883_v33 = vmul.f32 %v4142_v48, %v4467_v5 }
 0x22c   : > { %v1840_v25 = vsel %vm610_vm4, %v1838_v10, %v4835_v60  ;;  %v1887_v55 = vrot.slane %v4396_v18, 6  ;;  %v1931_v49 = vmul.f32 %v4319_v61, %v4382_v34  ;;  %v1856_v31 = vsel %vm215_vm0, %v1854_v44, %v1855_v50  ;;  %v4524_v2 = vpop.permute.xlu0 %1873 }
 0x22d   : > { %v1845_v56 = vadd.f32 %v1840_v25, %v1829_v37  ;;  %v1830_v1 = vadd.f32 %v1826_v7, %v1814_v6  ;;  %v1876_v10 = vmul.f32 %v1875_v30, %v1864_v52  ;;  %v1950_v11 = vmul.f32 %v4322_v42, %v1864_v52 }
 0x22e   : > { %v4836_v43 = vmov %v4835_v60  ;;  %v1906_v48 = vrot.slane %v4408_v12, 1  ;;  %v1903_v21 = vrot.slane %v1897_v39, 1  ;;  %v1935_v53 = vrot.slane %v1929_v23, 2 }
 0x22f   : > { %v1842_v51 = vsel %vm610_vm4, %v4836_v43, %v1841_v62  ;;  %v1861_v27 = vadd.f32 %v1856_v31, %v1845_v56  ;;  %v1858_v46 = vsel %vm215_vm0, %v1855_v50, %v1857_v19  ;;  %v1890_v38 = vrot.slane %v1883_v33, 6 }
 0x230   : > { %v1846_v18 = vadd.f32 %v1842_v51, %v1830_v1  ;;  %v1915_v22 = vmul.f32 %v4832_v35, %v4467_v5  ;;  %v1919_v30 = vrot.slane %v1913_v17, 7  ;;  %v1982_v0 = vmul.f32 %v4334_v28, %v1864_v52 }
 0x231   : > { %v1878_v61 = vadd.f32 %v1876_v10, %v1861_v27  ;;  %v4837_v4 = vrot.slane %v4159_v26, 6  ;;  %v1938_v58 = vrot.slane %v1931_v49, 2  ;;  %v1956_v20 = vrot.slane %v1950_v11, 3 }
 0x232   : > { %v1862_v36 = vadd.f32 %v1858_v46, %v1846_v18  ;;  %v4505_v15 = vmul.f32 %v4337_v45, %v1864_v52  ;;  %v1905_v35 = vsel %vm627_vm5, %v1903_v21, %v1904_v8  ;;  %v1937_v17 = vsel %vm660_vm6, %v1935_v53, %v1936_v63  ;;  %v4843_v21 = vld [vmem:[#allocation26_spill] sm:$0xff] }
 0x233   : > { %v1889_v12 = vsel %vm610_vm4, %v1887_v55, %v4837_v4  ;;  %v4514_v41 = vmul.f32 %v4351_v32, %v1864_v52  ;;  %v4838_v3 = vmov %v4837_v4  ;;  %v1922_v37 = vrot.slane %v1915_v22, 7  ;;  %v4840_v55 = vld [vmem:[#allocation19_spill] sm:$0xff] }
 0x234   : > { %v1894_v50 = vadd.f32 %v1889_v12, %v1878_v61  ;;  %v1879_v29 = vadd.f32 %v4373_v47, %v1862_v36  ;;  %v1891_v40 = vsel %vm610_vm4, %v4838_v3, %v1890_v38  ;;  %v1965_v62 = vstv %s4482_s15 }
 0x235   : > { %v1988_v23 = vrot.slane %v1982_v0, 4  ;;  %v1967_v6 = vmul.f32 %v1965_v62, %v4467_v5  ;;  %v4839_v52 = vrot.slane %v4163_v59, 7  ;;  %v1958_v26 = vsel %vm682_vm7, %v1956_v20, %v1957_v9 }
 0x236   : > { %v1910_v39 = vadd.f32 %v1905_v35, %v1894_v50  ;;  %v1895_v60 = vadd.f32 %v1891_v40, %v1879_v29  ;;  %v1907_v25 = vsel %vm627_vm5, %v1904_v8, %v1906_v48  ;;  %v1952_v7 = vmul.f32 %v4322_v42, %v4382_v34 }
 0x237   : > { %v1921_v47 = vsel %vm256_vm1, %v1919_v30, %v4839_v52  ;;  %v2020_v56 = vrot.slane %v4505_v15, 5  ;;  %v2052_v19 = vrot.slane %v4514_v41, 6  ;;  %v1966_v49 = vmul.f32 %v1965_v62, %v4840_v55 }
 0x238   : > { %v1926_v44 = vadd.f32 %v1921_v47, %v1910_v39  ;;  %v1911_v33 = vadd.f32 %v1907_v25, %v1895_v60  ;;  %v1997_v1 = vstv %s4498_s30  ;;  %v4841_v31 = vmov %v4839_v52 }
 0x239   : > { %v1923_v13 = vsel %vm256_vm1, %v4841_v31, %v1922_v37  ;;  %v1968_v10 = vmul.f32 %v1965_v62, %v4524_v2  ;;  %v4842_v42 = vrot.slane %v4363_v24, 4  ;;  %v1973_v43 = vrot.slane %v1967_v6, 1 }
 0x23a   : > { %v1942_v8 = vadd.f32 %v1937_v17, %v1926_v44  ;;  %v1999_v51 = vmul.f32 %v1997_v1, %v4467_v5  ;;  %v1927_v27 = vadd.f32 %v1923_v13, %v1911_v33  ;;  %v1939_v48 = vsel %vm660_vm6, %v1936_v63, %v1938_v58 }
 0x23b   : > { %v1990_v11 = vsel %vm215_vm0, %v1988_v23, %v4842_v42  ;;  %v1959_v53 = vrot.slane %v1952_v7, 3  ;;  %v1984_v18 = vmul.f32 %v4334_v28, %v4382_v34  ;;  %v4844_v46 = vstv %s4100_s4  ;;  %s2343_s4 = sshll.u32 %s2592_s12, 4  ;;  %s191_s12 = scalar_lea.vmem [#allocation11], %s2239_s5 }
 0x23c   : > { %v1947_v59 = vadd.f32 %v4843_v21, %v1942_v8  ;;  %v1946_v61 = vmul.f32 %v4844_v46, %v4467_v5  ;;  %v1943_v38 = vadd.f32 %v1939_v48, %v1927_v27  ;;  %v1972_v22 = vrot.slane %v1966_v49, 1  ;;  %s2128_s7 = scalar_lea.hbm %s4642_s2, %s2343_s4  ;;  %s2129_s8 = sshll.u32 %s191_s12, 4  ;;  %s2130_s8 = int_to_ptr.vmem [resolvable:$true] %s2129_s8 }
 0x23d   : > { %v1998_v30 = vmul.f32 %v1997_v1, %v4840_v55  ;;  %v2029_v0 = vstv %s4520_s28  ;;  %v1975_v4 = vrot.slane %v1968_v10, 1  ;;  %v2000_v54 = vmul.f32 %v1997_v1, %v4524_v2  ;;  %s2131_s27 = sshll.u32 %s2128_s7, 4  ;;  %s2132_s27 = int_to_ptr.hbm [resolvable:$true] %s2131_s27 }
 0x23e   : > { %v1963_v36 = vadd.f32 %v1958_v26, %v1947_v59  ;;  %v2005_v63 = vrot.slane %v1999_v51, 2  ;;  %v2031_v12 = vmul.f32 %v2029_v0, %v4467_v5  ;;  %v1948_v58 = vadd.f32 %v1946_v61, %v1943_v38  ;;  %s2528_s18 = sshra.s32 %s2132_s27, 4  ;;  %s2529_s18 = int_to_ptr.hbm [resolvable:$true] %s2528_s18 }
 0x23f   : > { %v1974_v20 = vsel %vm627_vm5, %v1972_v22, %v1973_v43  ;;  %v1960_v28 = vsel %vm682_vm7, %v1957_v9, %v1959_v53  ;;  %v1991_v50 = vrot.slane %v1984_v18, 4  ;;  %v2016_v35 = vmul.f32 %v4337_v45, %v4382_v34  ;;  %s2530_s26 = scalar_lea.hbm %s2529_s18, 16  ;;  %p2535_p8 = scmp.lt.s32.totalorder %s2529_s18, %s4642_s2 }
 0x240   : > { %v1979_v15 = vadd.f32 %v1974_v20, %v1963_v36  ;;  %v2061_v17 = vstv %s4539_s0  ;;  %v1964_v29 = vadd.f32 %v1960_v28, %v1948_v58  ;;  %v2004_v39 = vrot.slane %v1998_v30, 2  ;;  %p2531_p1 = scmp.ne.s32.totalorder %s2529_s18, %s2530_s26  ;;  %p2536_p11 = scmp.lt.s32.totalorder %s2534_s24, %s2530_s26 }
 0x241   : > { %v2030_v3 = vmul.f32 %v2029_v0, %v4840_v55  ;;  %v1976_v40 = vsel %vm627_vm5, %v1973_v43, %v1975_v4  ;;  %v2007_v62 = vrot.slane %v2000_v54, 2  ;;  %v2032_v23 = vmul.f32 %v2029_v0, %v4524_v2 }
 0x242   : > { %v1995_v37 = vadd.f32 %v1990_v11, %v1979_v15  ;;  %v2037_v6 = vrot.slane %v2031_v12, 3  ;;  %v2063_v16 = vmul.f32 %v2061_v17, %v4467_v5  ;;  %v1980_v9 = vadd.f32 %v1976_v40, %v1964_v29  ;;  %p2532_p2 = pnand %p2531_p1, %p2712_p9  ;;  %p2537_p12 = por %p2536_p11, %p2535_p8 }
 0x243   : > { %v2006_v60 = vsel %vm660_vm6, %v2004_v39, %v2005_v63  ;;  %v4845_v52 = vmov %v4842_v42  ;;  %v2023_v26 = vrot.slane %v2016_v35, 5  ;;  %v2048_v25 = vmul.f32 %v4351_v32, %v4382_v34 }
 0x244   : > { %v1992_v45 = vsel %vm215_vm0, %v4845_v52, %v1991_v50  ;;  %v2011_v47 = vadd.f32 %v2006_v60, %v1995_v37  ;;  %v4846_v44 = vrot.slane %v4366_v57, 5  ;;  %v2036_v49 = vrot.slane %v2030_v3, 3  ;;  %p2533_p4 = pneg %p2532_p2 }
 0x245   : > { %v1996_v33 = vadd.f32 %v1992_v45, %v1980_v9  ;;  %v2062_v5 = vmul.f32 %v2061_v17, %v4840_v55  ;;  %v2008_v1 = vsel %vm660_vm6, %v2005_v63, %v2007_v62  ;;  %v2039_v13 = vrot.slane %v2032_v23, 3 }
 0x246   : > { %v2022_v7 = vsel %vm747_vm8, %v2020_v56, %v4846_v44  ;;  %v2064_v24 = vmul.f32 %v2061_v17, %v4524_v2  ;;  %v2053_v8 = vrot.slane %v4380_v14, 6  ;;  %v2069_v10 = vrot.slane %v2063_v16, 4  ;;  %p2538_p13 = pnand %p2537_p12, %p2533_p4 }
 0x247   : > { %v2027_v31 = vadd.f32 %v2022_v7, %v2011_v47  ;;  %v2012_v42 = vadd.f32 %v2008_v1, %v1996_v33  ;;  %v2038_v32 = vsel %vm682_vm7, %v2036_v49, %v2037_v6  ;;  %v4847_v34 = vmov %v4846_v44 }
 0x248   : > { %v2024_v56 = vsel %vm747_vm8, %v4847_v34, %v2023_v26  ;;  %v2055_v43 = vrot.slane %v2048_v25, 6  ;;  %v2054_v55 = vsel %vm610_vm4, %v2052_v19, %v2053_v8  ;;  %v2068_v27 = vrot.slane %v2062_v5, 4 }
 0x249   : > { %v2043_v11 = vadd.f32 %v2038_v32, %v2027_v31  ;;  %v2028_v51 = vadd.f32 %v2024_v56, %v2012_v42  ;;  %v2040_v2 = vsel %vm682_vm7, %v2037_v6, %v2039_v13  ;;  %v2071_v14 = vrot.slane %v2064_v24, 4 }
 0x24a   : > { %v2070_v59 = vsel %vm215_vm0, %v2068_v27, %v2069_v10  ;;  %v2056_v53 = vsel %vm610_vm4, %v2053_v8, %v2055_v43 }
 0x24b   : > { %v2059_v48 = vadd.f32 %v2054_v55, %v2043_v11  ;;  %v2044_v21 = vadd.f32 %v2040_v2, %v2028_v51  ;;  %v2072_v46 = vsel %vm215_vm0, %v2069_v10, %v2071_v14 }
 0x24d   : > { %v2075_v57 = vadd.f32 %v2070_v59, %v2059_v48  ;;  %v2060_v18 = vadd.f32 %v2056_v53, %v2044_v21 }
 0x24f   : > { %v2077_v61 = vsub.f32 0.0, %v2075_v57  ;;  %v2076_v41 = vadd.f32 %v2072_v46, %v2060_v18 }
 0x251   : > { %v2079_v38 = vmul.f32 1.442695, %v2077_v61  ;;  %v2078_v19 = vsub.f32 0.0, %v2076_v41 }
 0x253   : > { %2461 = vpow2.f32 %v2079_v38  ;;  %v2081_v22 = vmul.f32 1.442695, %v2078_v19 }
 0x255   : > { %2463 = vpow2.f32 %v2081_v22 }
 0x259   : > { %v2462_v30 = vpop.eup %2461 }
 0x25a   : > { %v2083_v0 = vadd.f32 1.0, %v2462_v30 }
 0x25b   : > { %v2464_v36 = vpop.eup %2463 }
 0x25c   : > { %2465 = vrcp.f32 %v2083_v0  ;;  %v2084_v4 = vadd.f32 1.0, %v2464_v36  ;;  %v2096_v20 = vand.u32 2147483648, %v2083_v0  ;;  %v2094_v50 = vand.u32 2147483647, %v2083_v0 }
 0x25d   : > { %vm2090_vm10 = vweird.f32 %v2083_v0 }
 0x25e   : > { %2467 = vrcp.f32 %v2084_v4  ;;  %v2110_v29 = vand.u32 2147483648, %v2084_v4  ;;  %v2097_v39 = vor.u32 1.1754944e-38, %v2096_v20  ;;  %v2108_v40 = vand.u32 2147483647, %v2084_v4 }
 0x25f   : > { %vm2095_vm14 = vcmp.eq.f32.partialorder %v2094_v50, 8.507059e+37  ;;  %vm2104_vm15 = vweird.f32 %v2084_v4 }
 0x260   : > { %v2111_v6 = vor.u32 1.1754944e-38, %v2110_v29  ;;  %vm2109_vm1 = vcmp.eq.f32.partialorder %v2108_v40, 8.507059e+37 }
 0x262   : > { %v2466_v54 = vpop.eup %2465 }
 0x263   : > { %v2086_v63 = vmul.f32 %v2466_v54, %v2083_v0  ;;  %vm2091_vm9 = vweird.f32 %v2466_v54 }
 0x264   : > { %v2468_v12 = vpop.eup %2467  ;;  %vm2092_vm12 = vmor %vm2090_vm10, %vm2091_vm9 }
 0x265   : > { %v2087_v58 = vsub.f32 1.0, %v2086_v63  ;;  %v2100_v28 = vmul.f32 %v2468_v12, %v2084_v4  ;;  %vm2105_vm13 = vweird.f32 %v2468_v12 }
 0x266   : > { %vm2106_vm0 = vmor %vm2104_vm15, %vm2105_vm13 }
 0x267   : > { %v2088_v15 = vmul.f32 %v2466_v54, %v2087_v58  ;;  %v2101_v35 = vsub.f32 1.0, %v2100_v28 }
 0x269   : > { %v2089_v17 = vadd.f32 %v2466_v54, %v2088_v15  ;;  %v2102_v3 = vmul.f32 %v2468_v12, %v2101_v35 }
 0x26b   : > { %v2093_v37 = vsel %vm2092_vm12, %v2466_v54, %v2089_v17  ;;  %v2103_v23 = vadd.f32 %v2468_v12, %v2102_v3 }
 0x26c   : > { %v2098_v62 = vsel %vm2095_vm14, %v2097_v39, %v2093_v37 }
 0x26d   : > { %2114 = vst.msk [vmem:[%s191_s12] sm:$0xff] %vm2113_vm11, %v2098_v62  ;;  %v2107_v16 = vsel %vm2106_vm0, %v2468_v12, %v2103_v23 }
 0x26e   : > { %v2112_v9 = vsel %vm2109_vm1, %v2111_v6, %v2107_v16 }
 0x26f   : > { %2115 = vst.msk [vmem:[%s191_s12 + $0x8] sm:$0xff] %vm2113_vm11, %v2112_v9 }
 0x270   : > { %2541 = shalt.err (!%p2538_p13)
}
 0x271   : > { %s2617_s22 = smov 128   ;;  %s2618_s30 = smov 8  }
 0x272   : > { %2350 = dma.vmem_to_hbm [thread:$0]  (%p2712_p9), %s2130_s8, 256, %s2132_s27, %s2117_s21, %s2617_s22, %s2617_s22, %s2618_s30  }
 0x273 PF: > { %s2146_s28 = sand.u32 1, %s2580_s9   ;;  %p4848_p0 = scmp.ge.s32.totalorder %s2600_s14, 2 }
 0x274   : > { %s2147_s0 = scalar_lea.sflag [#allocation8], %s2146_s28 }
 0x275   : > { %p2361_p3 = pnand %p4848_p0, %p2683_p6 }
 0x277   : > { %p2362_p5 = pneg %p2361_p3 }
 0x279   : > { %2575 = dma.done.wait (%p2362_p5), %s2147_s0, 256  }
 0x27a   : > { %2577 = vsyncadd (%p2362_p5), %s2147_s0, 4294967040  ;;  %s19_s14 = sadd.s32 1, %s2600_s14   ;;  %s4849_s9 = smov %s2584_s10 }
 0x27b   : > { %p16_p7 = scmp.ge.s32.totalorder %s19_s14, 4   ;;  %s4850_s10 = smov %s2588_s11 }
 0x27c   : > { %s4851_s11 = smov %s2718_s3  ;;  %s4852_s12 = smov %s2596_s13 }
 0x27d   : > { %s4853_s13 = smov %s4855_s25  ;;  %18 = sbr.rel (!%p16_p7) target bundleno = 9 (0x9), region = 87 }
 0x282   :  { %2153 = vsyncpa [#allocation7], 1 }
 0x283   :  { %2155 = vsyncpa [#allocation7 + $0x1], 1 }
 0x284   :  { %2156 = vsyncpa [#allocation8], 1 }
 0x285   :  { %2158 = vsyncpa [#allocation8 + $0x1], 1 }
 0x286   :  { %2159 = vsyncpa [#allocation9], 1 }
 0x287   :  { %2161 = vsyncpa [#allocation9 + $0x1], 1 }

</bundles_post_ra>
